<compile_context>
chip_gen: v6e
topology: v6e:2x2x1
jax: 0.10.0
libtpu: 0.0.40
codegen_flags: <defaults>
</compile_context>

<pallas_src>
import functools

import jax
import jax.numpy as jnp
from jax.experimental import pallas as pl
from jax.experimental.pallas import tpu as pltpu

# ----------------- configuration (small, forward-consistent) -----------------
IMG_SIZE = 16
PATCH_SIZE = 4
IN_CHANS = 4
EMBED_DIM = 32
DEPTH = 2
NUM_HEADS = 4
MLP_RATIO = 4.0
NUM_CLASSES = 10

HEAD_DIM = EMBED_DIM // NUM_HEADS                    # 8
SCALE = HEAD_DIM ** -0.5
NUM_PATCHES = (IMG_SIZE // PATCH_SIZE) ** 2          # 16
SEQ_LEN = NUM_PATCHES + 1                            # 17 real tokens
N_PAD = ((SEQ_LEN + 7) // 8) * 8                     # 24: pad rows to 8-sublane multiple
PATCH_DIM = IN_CHANS * PATCH_SIZE * PATCH_SIZE       # 64
MLP_HIDDEN = int(EMBED_DIM * MLP_RATIO)              # 128
NC_PAD = 128                                         # lane-dense classifier output
LN_EPS = 1e-5                                        # torch.nn.LayerNorm default
NEG_INF = -1e30
BVEC_W = 128                                         # lane width of packed bias slab

assert N_PAD % 8 == 0 and N_PAD >= SEQ_LEN
assert max(3 * EMBED_DIM, MLP_HIDDEN, NC_PAD) <= BVEC_W


# =========================== in-kernel helpers ===========================
def _ln_norm(x):
    """Row-wise LayerNorm *normalization only* (biased variance, eps=1e-5).

    The affine gamma/beta of every LayerNorm is folded into the weights/bias of the
    matmul that consumes its output (done at init time)."""
    mu = jnp.mean(x, axis=-1, keepdims=True)
    var = jnp.mean(jnp.square(x - mu), axis=-1, keepdims=True)
    return (x - mu) * jax.lax.rsqrt(var + LN_EPS)


def _erf(x):
    # TODO(synk): exact erf is evaluated with the Abramowitz-Stegun 7.1.26 polynomial
    # (|error| < 1.5e-7) because a lax.erf lowering inside Mosaic is not guaranteed
    # across jax versions; the internal divide uses the EUP approximate reciprocal
    # (adds ~1e-4 abs error -> use tolerance-based comparisons vs. torch).
    ax = jnp.abs(x)
    t = pl.reciprocal(1.0 + 0.3275911 * ax, approx=True)
    poly = ((((1.061405429 * t - 1.453152027) * t + 1.421413741) * t
             - 0.284496736) * t + 0.254829592) * t
    y = 1.0 - poly * jnp.exp(-ax * ax)
    return jnp.where(x < 0.0, -y, y)


def _gelu_exact(x):
    return 0.5 * x * (1.0 + _erf(x * 0.7071067811865476))


# =========================== fused ViT kernel ===========================
def _vit_kernel(
    patches_ref, pos_ref, mask_ref, patch_w_ref,
    qkv_w_ref, proj_w_ref, fc1_w_ref, fc2_w_ref,
    head_w_ref, bvec_ref,
    o_ref,
    *, b_tile,
):
    f32 = jnp.float32
    E, Dh = EMBED_DIM, HEAD_DIM

    # ---- patch embed.  patches are pre-padded to N_PAD rows per image, so the
    # matmul directly yields the (b_tile*N_PAD, E) token slab.  patch_b, cls_token
    # and the positional embedding are all folded into pos_ref. ----
    h = (jnp.dot(patches_ref[...], patch_w_ref[...], preferred_element_type=f32)
         + pos_ref[...])                               # (b_tile*N_PAD, E)

    # additive attention bias: -1e30 for padded key columns and cross-image
    # (off-block-diagonal) pairs; precomputed in the wrapper.
    mask = mask_ref[...]                               # (NT, NT)

    for d in range(DEPTH):
        bv = bvec_ref[d]                               # (4, BVEC_W) packed biases

        # ---------- attention branch: h = h + proj(attn(LN1(h))) ----------
        xn = _ln_norm(h)                               # LN1 affine folded into qkv_w
        # SCALE and LN1 gamma/beta are folded into qkv_w / its bias row at init.
        qkv = (jnp.dot(xn, qkv_w_ref[d], preferred_element_type=f32)
               + bv[0:1, 0:3 * E])                     # (NT, 3E)
        heads = []
        for hd in range(NUM_HEADS):
            q = qkv[:, hd * Dh:(hd + 1) * Dh]
            k = qkv[:, E + hd * Dh:E + (hd + 1) * Dh]
            v = qkv[:, 2 * E + hd * Dh:2 * E + (hd + 1) * Dh]
            # q @ k^T without materialising a transpose (transposed-RHS contraction)
            s = jax.lax.dot_general(q, k, (((1,), (1,)), ((), ())),
                                    preferred_element_type=f32)   # (NT, NT)
            s = s + mask
            s = s - jnp.max(s, axis=-1, keepdims=True)
            p = jnp.exp(s)
            p = p * pl.reciprocal(jnp.sum(p, axis=-1, keepdims=True), approx=True)
            heads.append(jnp.dot(p, v, preferred_element_type=f32))
        # lane-concatenate the per-head outputs in vregs (no VMEM round trip)
        attn_out = jnp.concatenate(heads, axis=-1)     # (NT, E)
        proj = (jnp.dot(attn_out, proj_w_ref[d], preferred_element_type=f32)
                + bv[1:2, 0:E])
        h = h + proj

        # ---------- MLP branch: h = h + fc2(gelu(fc1(LN2(h)))) ----------
        xn = _ln_norm(h)                               # LN2 affine folded into fc1
        m = (jnp.dot(xn, fc1_w_ref[d], preferred_element_type=f32)
             + bv[2:3, 0:MLP_HIDDEN])
        m = _gelu_exact(m)                             # GELU fused as FC1 epilogue
        m = (jnp.dot(m, fc2_w_ref[d], preferred_element_type=f32)
             + bv[3:4, 0:E])
        h = h + m

    # ---------- final LN + classifier head, only on the 8-row sublane group
    # containing each image's cls row (row NUM_PATCHES of that image) ----------
    grp = [h[bt * N_PAD + NUM_PATCHES:(bt + 1) * N_PAD, :] for bt in range(b_tile)]
    cls_grp = grp[0] if b_tile == 1 else jnp.concatenate(grp, axis=0)  # (b_tile*8, E)
    xn = _ln_norm(cls_grp)                             # final-LN affine folded into head
    head_b = bvec_ref[DEPTH][0:1, 0:NC_PAD]
    logits = (jnp.dot(xn, head_w_ref[...], preferred_element_type=f32)
              + head_b)                                # (b_tile*8, NC_PAD) lane-dense
    o_ref[...] = logits


# =========================== parameters ===========================
def _trunc_normal(key, shape, std=0.02):
    return std * jax.random.truncated_normal(key, -2.0, 2.0, shape, jnp.float32)


def _pad_lane(v, width=BVEC_W):
    return jnp.zeros((width,), jnp.float32).at[:v.shape[0]].set(v)


def init_params(key):
    """Builds kernel-ready parameters with all init-time foldings applied."""
    keys = iter(jax.random.split(key, 4 + 4 * DEPTH))
    params = {}

    # ----- PatchEmbed: Conv2d(IN_CHANS, EMBED_DIM, kernel=P, stride=P) as matmul -----
    conv_w = 0.02 * jax.random.normal(
        next(keys), (EMBED_DIM, IN_CHANS, PATCH_SIZE, PATCH_SIZE), jnp.float32)
    params["patch_w"] = conv_w.reshape(EMBED_DIM, -1).T          # (C*P*P, E)
    patch_b = jnp.zeros((EMBED_DIM,), jnp.float32)

    cls_token = _trunc_normal(next(keys), (EMBED_DIM,))
    pos = _trunc_normal(next(keys), (SEQ_LEN, EMBED_DIM))        # module order [cls, p0..15]

    # pos_embed in kernel token order [patch_0..15, cls, pad*7] with the conv bias
    # folded into the patch rows and cls_token folded into the cls row.
    pos_k = jnp.zeros((N_PAD, EMBED_DIM), jnp.float32)
    pos_k = pos_k.at[:NUM_PATCHES].set(pos[1:] + patch_b[None, :])
    pos_k = pos_k.at[NUM_PATCHES].set(pos[0] + cls_token)
    params["pos_embed"] = pos_k                                  # (N_PAD, E)

    qkv_w_l, proj_w_l, fc1_w_l, fc2_w_l, bias_rows = [], [], [], [], []
    for _ in range(DEPTH):
        # "module" parameters (torch layout / default init)
        ln1_g = jnp.ones((EMBED_DIM,), jnp.float32)
        ln1_b = jnp.zeros((EMBED_DIM,), jnp.float32)
        ln2_g = jnp.ones((EMBED_DIM,), jnp.float32)
        ln2_b = jnp.zeros((EMBED_DIM,), jnp.float32)
        qkv_w = _trunc_normal(next(keys), (3 * EMBED_DIM, EMBED_DIM)).T   # (E, 3E)
        proj_w = _trunc_normal(next(keys), (EMBED_DIM, EMBED_DIM)).T      # (E, E)
        proj_b = jnp.zeros((EMBED_DIM,), jnp.float32)
        fc1_w = _trunc_normal(next(keys), (MLP_HIDDEN, EMBED_DIM)).T      # (E, H)
        fc1_b = jnp.zeros((MLP_HIDDEN,), jnp.float32)
        fc2_w = _trunc_normal(next(keys), (EMBED_DIM, MLP_HIDDEN)).T      # (H, E)
        fc2_b = jnp.zeros((EMBED_DIM,), jnp.float32)

        # fold LN1 affine + attention scale into qkv weights / bias
        # (qkv_bias=False in the module, so the only bias source is beta @ W)
        qkv_w_f = ln1_g[:, None] * qkv_w
        qkv_b_f = ln1_b @ qkv_w
        qkv_w_f = qkv_w_f.at[:, :EMBED_DIM].multiply(SCALE)
        qkv_b_f = qkv_b_f.at[:EMBED_DIM].multiply(SCALE)

        # fold LN2 affine into fc1
        fc1_w_f = ln2_g[:, None] * fc1_w
        fc1_b_f = fc1_b + ln2_b @ fc1_w

        qkv_w_l.append(qkv_w_f)
        proj_w_l.append(proj_w)
        fc1_w_l.append(fc1_w_f)
        fc2_w_l.append(fc2_w)
        bias_rows.append(jnp.stack([_pad_lane(qkv_b_f), _pad_lane(proj_b),
                                    _pad_lane(fc1_b_f), _pad_lane(fc2_b)]))

    params["qkv_w"] = jnp.stack(qkv_w_l)     # (DEPTH, E, 3E)
    params["proj_w"] = jnp.stack(proj_w_l)   # (DEPTH, E, E)
    params["fc1_w"] = jnp.stack(fc1_w_l)     # (DEPTH, E, H)
    params["fc2_w"] = jnp.stack(fc2_w_l)     # (DEPTH, H, E)

    # final LayerNorm affine folded into the classifier head
    lnf_g = jnp.ones((EMBED_DIM,), jnp.float32)
    lnf_b = jnp.zeros((EMBED_DIM,), jnp.float32)
    head_w = _trunc_normal(next(keys), (NUM_CLASSES, EMBED_DIM)).T        # (E, NC)
    head_b = jnp.zeros((NUM_CLASSES,), jnp.float32)
    head_w_f = lnf_g[:, None] * head_w
    head_b_f = head_b + lnf_b @ head_w
    params["head_w"] = (jnp.zeros((EMBED_DIM, NC_PAD), jnp.float32)
                        .at[:, :NUM_CLASSES].set(head_w_f))
    zero_row = jnp.zeros((BVEC_W,), jnp.float32)
    bias_rows.append(jnp.stack([_pad_lane(head_b_f), zero_row, zero_row, zero_row]))

    # one packed slab holding every remaining small bias vector
    params["bvec"] = jnp.stack(bias_rows)    # (DEPTH+1, 4, 128)
    return params


# =========================== forward pass ===========================
def _pick_batch_tile(batch):
    """Images folded into sublanes per grid step.  v7x has 2 TensorCores, so keep a
    parallel grid of >= 2 steps there; v5e/v6e are single-core, so fold the whole
    (small) batch into one grid step.  Tile is capped so the (tile*24)^2 attention
    mask stays tiny."""
    kind = ""
    try:
        kind = jax.devices()[0].device_kind.lower()
    except Exception:
        pass
    n_tc = 2 if ("v7" in kind or "7x" in kind) else 1
    for bt in range(min(batch, 8), 0, -1):
        if batch % bt == 0 and (batch // bt) % n_tc == 0:
            return bt
    return 1


def _vit_forward_impl(x, params, batch_tile):
    B = x.shape[0]
    P = PATCH_SIZE
    hp = IMG_SIZE // P
    BT = batch_tile
    assert B % BT == 0
    num_tiles = B // BT
    NT = BT * N_PAD

    # NCHW -> (B, num_patches, C*P*P); feature order (C, ph, pw) matches the Conv2d
    # weight flatten order used for params["patch_w"].  Token rows are zero-padded
    # to N_PAD per image so the in-kernel patch matmul directly builds the slab.
    patches = (
        x.reshape(B, IN_CHANS, hp, P, hp, P)
        .transpose(0, 2, 4, 1, 3, 5)
        .reshape(B, NUM_PATCHES, PATCH_DIM)
    )
    patches = jnp.pad(patches, ((0, 0), (0, N_PAD - NUM_PATCHES), (0, 0)))
    patches = patches.reshape(num_tiles, NT, PATCH_DIM)

    # positional slab tiled over the images of one grid step
    pos_full = jnp.tile(params["pos_embed"], (BT, 1))            # (NT, E)

    # additive attention bias: padded key columns and cross-image pairs -> -1e30
    tok_valid = jnp.tile(jnp.arange(N_PAD) < SEQ_LEN, BT)        # (NT,)
    img = jnp.repeat(jnp.arange(BT), N_PAD)                      # (NT,)
    ok = (img[:, None] == img[None, :]) & tok_valid[None, :]
    mask = jnp.where(ok, 0.0, NEG_INF).astype(jnp.float32)       # (NT, NT)

    def full(shape):
        return pl.BlockSpec(shape, lambda t, _n=len(shape): (0,) * _n)

    in_specs = [
        pl.BlockSpec((None, NT, PATCH_DIM), lambda t: (t, 0, 0)),  # patches (per tile)
        full((NT, EMBED_DIM)),                       # pos (cls, patch_b folded)
        full((NT, NT)),                              # attention additive mask
        full((PATCH_DIM, EMBED_DIM)),                # patch_w
        full((DEPTH, EMBED_DIM, 3 * EMBED_DIM)),     # qkv_w  (LN1 + scale folded)
        full((DEPTH, EMBED_DIM, EMBED_DIM)),         # proj_w
        full((DEPTH, EMBED_DIM, MLP_HIDDEN)),        # fc1_w  (LN2 folded)
        full((DEPTH, MLP_HIDDEN, EMBED_DIM)),        # fc2_w
        full((EMBED_DIM, NC_PAD)),                   # head_w (final LN folded, padded)
        full((DEPTH + 1, 4, BVEC_W)),                # packed bias slab
    ]

    out = pl.pallas_call(
        functools.partial(_vit_kernel, b_tile=BT),
        out_shape=jax.ShapeDtypeStruct((num_tiles, BT * 8, NC_PAD), jnp.float32),
        grid=(num_tiles,),
        in_specs=in_specs,
        out_specs=pl.BlockSpec((None, BT * 8, NC_PAD), lambda t: (t, 0, 0)),
        compiler_params=pltpu.CompilerParams(
            dimension_semantics=("parallel",),   # v7x: shard batch tiles across TCs
        ),
    )(
        patches, pos_full, mask, params["patch_w"],
        params["qkv_w"], params["proj_w"], params["fc1_w"], params["fc2_w"],
        params["head_w"], params["bvec"],
    )
    # row 0 of each 8-row group is the cls row of one image
    return out.reshape(B, 8, NC_PAD)[:, 0, :NUM_CLASSES]


vit_forward = jax.jit(_vit_forward_impl, static_argnames=("batch_tile",))


# =========================== main ===========================
if __name__ == "__main__":
    key = jax.random.PRNGKey(0)
    pkey, xkey = jax.random.split(key)
    params = init_params(pkey)
    x = jax.random.normal(xkey, (2, IN_CHANS, IMG_SIZE, IMG_SIZE), jnp.float32)

    bt = _pick_batch_tile(x.shape[0])
    logits = vit_forward(x, params, batch_tile=bt)
    jax.block_until_ready(logits)
    assert logits.shape == (2, NUM_CLASSES), logits.shape
    assert bool(jnp.all(jnp.isfinite(logits)))
    print("KERNEL_OK")
</pallas_src>

<mosaic_0001>
module attributes {stable_mosaic.version = 11 : i64} {
  func.func @_vit_kernel(%arg0: i32, %arg1: memref<1x48x64xf32, #tpu.memory_space<vmem>>, %arg2: memref<48x32xf32, #tpu.memory_space<vmem>>, %arg3: memref<48x48xf32, #tpu.memory_space<vmem>>, %arg4: memref<64x32xf32, #tpu.memory_space<vmem>>, %arg5: memref<2x32x96xf32, #tpu.memory_space<vmem>>, %arg6: memref<2x32x32xf32, #tpu.memory_space<vmem>>, %arg7: memref<2x32x128xf32, #tpu.memory_space<vmem>>, %arg8: memref<2x128x32xf32, #tpu.memory_space<vmem>>, %arg9: memref<32x128xf32, #tpu.memory_space<vmem>>, %arg10: memref<3x4x128xf32, #tpu.memory_space<vmem>>, %arg11: memref<1x16x128xf32, #tpu.memory_space<vmem>>) attributes {dimension_semantics = [#tpu.dimension_semantics<parallel>], iteration_bounds = array<i64: 1>, scalar_prefetch = 0 : i64, scratch_operands = 0 : i64, tpu.core_type = #tpu.core_type<tc>, window_params = [{transform_indices = @transform_0, window_bounds = array<i64: 1, 48, 64>}, {pipeline_mode = #tpu.pipeline_mode<synchronous>, transform_indices = @transform_1, window_bounds = array<i64: 48, 32>}, {pipeline_mode = #tpu.pipeline_mode<synchronous>, transform_indices = @transform_2, window_bounds = array<i64: 48, 48>}, {pipeline_mode = #tpu.pipeline_mode<synchronous>, transform_indices = @transform_3, window_bounds = array<i64: 64, 32>}, {pipeline_mode = #tpu.pipeline_mode<synchronous>, transform_indices = @transform_4, window_bounds = array<i64: 2, 32, 96>}, {pipeline_mode = #tpu.pipeline_mode<synchronous>, transform_indices = @transform_5, window_bounds = array<i64: 2, 32, 32>}, {pipeline_mode = #tpu.pipeline_mode<synchronous>, transform_indices = @transform_6, window_bounds = array<i64: 2, 32, 128>}, {pipeline_mode = #tpu.pipeline_mode<synchronous>, transform_indices = @transform_7, window_bounds = array<i64: 2, 128, 32>}, {pipeline_mode = #tpu.pipeline_mode<synchronous>, transform_indices = @transform_8, window_bounds = array<i64: 32, 128>}, {pipeline_mode = #tpu.pipeline_mode<synchronous>, transform_indices = @transform_9, window_bounds = array<i64: 3, 4, 128>}, {transform_indices = @transform_10, window_bounds = array<i64: 1, 16, 128>}]} {
    %c0 = arith.constant 0 : index
    %c0_0 = arith.constant 0 : index
    %c0_1 = arith.constant 0 : index
    %0 = vector.load %arg1[%c0, %c0_0, %c0_1] : memref<1x48x64xf32, #tpu.memory_space<vmem>>, vector<1x48x64xf32>
    %1 = vector.shape_cast %0 : vector<1x48x64xf32> to vector<48x64xf32>
    %c0_2 = arith.constant 0 : index
    %c0_3 = arith.constant 0 : index
    %2 = vector.load %arg4[%c0_2, %c0_3] : memref<64x32xf32, #tpu.memory_space<vmem>>, vector<64x32xf32>
    %cst = arith.constant dense<0.000000e+00> : vector<48x32xf32>
    %3 = tpu.matmul %1, %2, %cst {dimension_numbers = #tpu.dot_dimension_numbers<[1], [0], [0], [1], [0, 0, 1, 1], [], []>} : vector<48x64xf32>, vector<64x32xf32>, vector<48x32xf32> -> vector<48x32xf32>
    %c0_4 = arith.constant 0 : index
    %c0_5 = arith.constant 0 : index
    %4 = vector.load %arg2[%c0_4, %c0_5] : memref<48x32xf32, #tpu.memory_space<vmem>>, vector<48x32xf32>
    %5 = arith.addf %3, %4 : vector<48x32xf32>
    %c0_6 = arith.constant 0 : index
    %c0_7 = arith.constant 0 : index
    %6 = vector.load %arg3[%c0_6, %c0_7] : memref<48x48xf32, #tpu.memory_space<vmem>>, vector<48x48xf32>
    %c0_8 = arith.constant 0 : index
    %c0_9 = arith.constant 0 : index
    %c0_10 = arith.constant 0 : index
    %7 = vector.load %arg10[%c0_8, %c0_9, %c0_10] : memref<3x4x128xf32, #tpu.memory_space<vmem>>, vector<1x4x128xf32>
    %8 = vector.shape_cast %7 : vector<1x4x128xf32> to vector<4x128xf32>
    %cst_11 = arith.constant dense<0.000000e+00> : vector<48xf32>
    %9 = vector.multi_reduction <add>, %5, %cst_11 [1] : vector<48x32xf32> to vector<48xf32>
    %10 = vector.shape_cast %9 : vector<48xf32> to vector<48x1xf32>
    %cst_12 = arith.constant 3.200000e+01 : f32
    %11 = vector.broadcast %cst_12 : f32 to vector<48x1xf32>
    %12 = arith.divf %10, %11 : vector<48x1xf32>
    %13 = vector.broadcast %12 : vector<48x1xf32> to vector<48x32xf32>
    %14 = arith.subf %5, %13 : vector<48x32xf32>
    %15 = arith.mulf %14, %14 : vector<48x32xf32>
    %cst_13 = arith.constant dense<0.000000e+00> : vector<48xf32>
    %16 = vector.multi_reduction <add>, %15, %cst_13 [1] : vector<48x32xf32> to vector<48xf32>
    %17 = vector.shape_cast %16 : vector<48xf32> to vector<48x1xf32>
    %cst_14 = arith.constant 3.200000e+01 : f32
    %18 = vector.broadcast %cst_14 : f32 to vector<48x1xf32>
    %19 = arith.divf %17, %18 : vector<48x1xf32>
    %20 = vector.broadcast %12 : vector<48x1xf32> to vector<48x32xf32>
    %21 = arith.subf %5, %20 : vector<48x32xf32>
    %cst_15 = arith.constant 9.99999974E-6 : f32
    %22 = vector.broadcast %cst_15 : f32 to vector<48x1xf32>
    %23 = arith.addf %19, %22 : vector<48x1xf32>
    %24 = math.rsqrt %23 : vector<48x1xf32>
    %25 = vector.broadcast %24 : vector<48x1xf32> to vector<48x32xf32>
    %26 = arith.mulf %21, %25 : vector<48x32xf32>
    %c0_16 = arith.constant 0 : index
    %c0_17 = arith.constant 0 : index
    %c0_18 = arith.constant 0 : index
    %27 = vector.load %arg5[%c0_16, %c0_17, %c0_18] : memref<2x32x96xf32, #tpu.memory_space<vmem>>, vector<1x32x96xf32>
    %28 = vector.shape_cast %27 : vector<1x32x96xf32> to vector<32x96xf32>
    %cst_19 = arith.constant dense<0.000000e+00> : vector<48x96xf32>
    %29 = tpu.matmul %26, %28, %cst_19 {dimension_numbers = #tpu.dot_dimension_numbers<[1], [0], [0], [1], [0, 0, 1, 1], [], []>} : vector<48x32xf32>, vector<32x96xf32>, vector<48x96xf32> -> vector<48x96xf32>
    %30 = vector.extract_strided_slice %8 {offsets = [0, 0], sizes = [1, 96], strides = [1, 1]} : vector<4x128xf32> to vector<1x96xf32>
    %31 = vector.broadcast %30 : vector<1x96xf32> to vector<48x96xf32>
    %32 = arith.addf %29, %31 : vector<48x96xf32>
    %33 = vector.extract_strided_slice %32 {offsets = [0, 0], sizes = [48, 8], strides = [1, 1]} : vector<48x96xf32> to vector<48x8xf32>
    %34 = vector.extract_strided_slice %32 {offsets = [0, 32], sizes = [48, 8], strides = [1, 1]} : vector<48x96xf32> to vector<48x8xf32>
    %35 = vector.extract_strided_slice %32 {offsets = [0, 64], sizes = [48, 8], strides = [1, 1]} : vector<48x96xf32> to vector<48x8xf32>
    %cst_20 = arith.constant dense<0.000000e+00> : vector<48x48xf32>
    %36 = tpu.matmul %33, %34, %cst_20 {dimension_numbers = #tpu.dot_dimension_numbers<[1], [1], [0], [0], [0, 0, 1, 0], [], []>} : vector<48x8xf32>, vector<48x8xf32>, vector<48x48xf32> -> vector<48x48xf32>
    %37 = arith.addf %36, %6 : vector<48x48xf32>
    %cst_21 = arith.constant dense<0xFF800000> : vector<48xf32>
    %38 = vector.multi_reduction <maximumf>, %37, %cst_21 [1] : vector<48x48xf32> to vector<48xf32>
    %39 = vector.shape_cast %38 : vector<48xf32> to vector<48x1xf32>
    %40 = vector.broadcast %39 : vector<48x1xf32> to vector<48x48xf32>
    %41 = arith.subf %37, %40 : vector<48x48xf32>
    %42 = math.exp %41 : vector<48x48xf32>
    %cst_22 = arith.constant dense<0.000000e+00> : vector<48xf32>
    %43 = vector.multi_reduction <add>, %42, %cst_22 [1] : vector<48x48xf32> to vector<48xf32>
    %44 = vector.shape_cast %43 : vector<48xf32> to vector<48x1xf32>
    %45 = tpu.reciprocal %44 {approx = true} : vector<48x1xf32> -> vector<48x1xf32>
    %46 = vector.broadcast %45 : vector<48x1xf32> to vector<48x48xf32>
    %47 = arith.mulf %42, %46 : vector<48x48xf32>
    %cst_23 = arith.constant dense<0.000000e+00> : vector<48x8xf32>
    %48 = tpu.matmul %47, %35, %cst_23 {dimension_numbers = #tpu.dot_dimension_numbers<[1], [0], [0], [1], [0, 0, 1, 1], [], []>} : vector<48x48xf32>, vector<48x8xf32>, vector<48x8xf32> -> vector<48x8xf32>
    %49 = vector.extract_strided_slice %32 {offsets = [0, 8], sizes = [48, 8], strides = [1, 1]} : vector<48x96xf32> to vector<48x8xf32>
    %50 = vector.extract_strided_slice %32 {offsets = [0, 40], sizes = [48, 8], strides = [1, 1]} : vector<48x96xf32> to vector<48x8xf32>
    %51 = vector.extract_strided_slice %32 {offsets = [0, 72], sizes = [48, 8], strides = [1, 1]} : vector<48x96xf32> to vector<48x8xf32>
    %cst_24 = arith.constant dense<0.000000e+00> : vector<48x48xf32>
    %52 = tpu.matmul %49, %50, %cst_24 {dimension_numbers = #tpu.dot_dimension_numbers<[1], [1], [0], [0], [0, 0, 1, 0], [], []>} : vector<48x8xf32>, vector<48x8xf32>, vector<48x48xf32> -> vector<48x48xf32>
    %53 = arith.addf %52, %6 : vector<48x48xf32>
    %cst_25 = arith.constant dense<0xFF800000> : vector<48xf32>
    %54 = vector.multi_reduction <maximumf>, %53, %cst_25 [1] : vector<48x48xf32> to vector<48xf32>
    %55 = vector.shape_cast %54 : vector<48xf32> to vector<48x1xf32>
    %56 = vector.broadcast %55 : vector<48x1xf32> to vector<48x48xf32>
    %57 = arith.subf %53, %56 : vector<48x48xf32>
    %58 = math.exp %57 : vector<48x48xf32>
    %cst_26 = arith.constant dense<0.000000e+00> : vector<48xf32>
    %59 = vector.multi_reduction <add>, %58, %cst_26 [1] : vector<48x48xf32> to vector<48xf32>
    %60 = vector.shape_cast %59 : vector<48xf32> to vector<48x1xf32>
    %61 = tpu.reciprocal %60 {approx = true} : vector<48x1xf32> -> vector<48x1xf32>
    %62 = vector.broadcast %61 : vector<48x1xf32> to vector<48x48xf32>
    %63 = arith.mulf %58, %62 : vector<48x48xf32>
    %cst_27 = arith.constant dense<0.000000e+00> : vector<48x8xf32>
    %64 = tpu.matmul %63, %51, %cst_27 {dimension_numbers = #tpu.dot_dimension_numbers<[1], [0], [0], [1], [0, 0, 1, 1], [], []>} : vector<48x48xf32>, vector<48x8xf32>, vector<48x8xf32> -> vector<48x8xf32>
    %65 = vector.extract_strided_slice %32 {offsets = [0, 16], sizes = [48, 8], strides = [1, 1]} : vector<48x96xf32> to vector<48x8xf32>
    %66 = vector.extract_strided_slice %32 {offsets = [0, 48], sizes = [48, 8], strides = [1, 1]} : vector<48x96xf32> to vector<48x8xf32>
    %67 = vector.extract_strided_slice %32 {offsets = [0, 80], sizes = [48, 8], strides = [1, 1]} : vector<48x96xf32> to vector<48x8xf32>
    %cst_28 = arith.constant dense<0.000000e+00> : vector<48x48xf32>
    %68 = tpu.matmul %65, %66, %cst_28 {dimension_numbers = #tpu.dot_dimension_numbers<[1], [1], [0], [0], [0, 0, 1, 0], [], []>} : vector<48x8xf32>, vector<48x8xf32>, vector<48x48xf32> -> vector<48x48xf32>
    %69 = arith.addf %68, %6 : vector<48x48xf32>
    %cst_29 = arith.constant dense<0xFF800000> : vector<48xf32>
    %70 = vector.multi_reduction <maximumf>, %69, %cst_29 [1] : vector<48x48xf32> to vector<48xf32>
    %71 = vector.shape_cast %70 : vector<48xf32> to vector<48x1xf32>
    %72 = vector.broadcast %71 : vector<48x1xf32> to vector<48x48xf32>
    %73 = arith.subf %69, %72 : vector<48x48xf32>
    %74 = math.exp %73 : vector<48x48xf32>
    %cst_30 = arith.constant dense<0.000000e+00> : vector<48xf32>
    %75 = vector.multi_reduction <add>, %74, %cst_30 [1] : vector<48x48xf32> to vector<48xf32>
    %76 = vector.shape_cast %75 : vector<48xf32> to vector<48x1xf32>
    %77 = tpu.reciprocal %76 {approx = true} : vector<48x1xf32> -> vector<48x1xf32>
    %78 = vector.broadcast %77 : vector<48x1xf32> to vector<48x48xf32>
    %79 = arith.mulf %74, %78 : vector<48x48xf32>
    %cst_31 = arith.constant dense<0.000000e+00> : vector<48x8xf32>
    %80 = tpu.matmul %79, %67, %cst_31 {dimension_numbers = #tpu.dot_dimension_numbers<[1], [0], [0], [1], [0, 0, 1, 1], [], []>} : vector<48x48xf32>, vector<48x8xf32>, vector<48x8xf32> -> vector<48x8xf32>
    %81 = vector.extract_strided_slice %32 {offsets = [0, 24], sizes = [48, 8], strides = [1, 1]} : vector<48x96xf32> to vector<48x8xf32>
    %82 = vector.extract_strided_slice %32 {offsets = [0, 56], sizes = [48, 8], strides = [1, 1]} : vector<48x96xf32> to vector<48x8xf32>
    %83 = vector.extract_strided_slice %32 {offsets = [0, 88], sizes = [48, 8], strides = [1, 1]} : vector<48x96xf32> to vector<48x8xf32>
    %cst_32 = arith.constant dense<0.000000e+00> : vector<48x48xf32>
    %84 = tpu.matmul %81, %82, %cst_32 {dimension_numbers = #tpu.dot_dimension_numbers<[1], [1], [0], [0], [0, 0, 1, 0], [], []>} : vector<48x8xf32>, vector<48x8xf32>, vector<48x48xf32> -> vector<48x48xf32>
    %85 = arith.addf %84, %6 : vector<48x48xf32>
    %cst_33 = arith.constant dense<0xFF800000> : vector<48xf32>
    %86 = vector.multi_reduction <maximumf>, %85, %cst_33 [1] : vector<48x48xf32> to vector<48xf32>
    %87 = vector.shape_cast %86 : vector<48xf32> to vector<48x1xf32>
    %88 = vector.broadcast %87 : vector<48x1xf32> to vector<48x48xf32>
    %89 = arith.subf %85, %88 : vector<48x48xf32>
    %90 = math.exp %89 : vector<48x48xf32>
    %cst_34 = arith.constant dense<0.000000e+00> : vector<48xf32>
    %91 = vector.multi_reduction <add>, %90, %cst_34 [1] : vector<48x48xf32> to vector<48xf32>
    %92 = vector.shape_cast %91 : vector<48xf32> to vector<48x1xf32>
    %93 = tpu.reciprocal %92 {approx = true} : vector<48x1xf32> -> vector<48x1xf32>
    %94 = vector.broadcast %93 : vector<48x1xf32> to vector<48x48xf32>
    %95 = arith.mulf %90, %94 : vector<48x48xf32>
    %cst_35 = arith.constant dense<0.000000e+00> : vector<48x8xf32>
    %96 = tpu.matmul %95, %83, %cst_35 {dimension_numbers = #tpu.dot_dimension_numbers<[1], [0], [0], [1], [0, 0, 1, 1], [], []>} : vector<48x48xf32>, vector<48x8xf32>, vector<48x8xf32> -> vector<48x8xf32>
    %97 = tpu.concatenate %48, %64, %80, %96 in 1 : vector<48x8xf32>, vector<48x8xf32>, vector<48x8xf32>, vector<48x8xf32> -> vector<48x32xf32>
    %c0_36 = arith.constant 0 : index
    %c0_37 = arith.constant 0 : index
    %c0_38 = arith.constant 0 : index
    %98 = vector.load %arg6[%c0_36, %c0_37, %c0_38] : memref<2x32x32xf32, #tpu.memory_space<vmem>>, vector<1x32x32xf32>
    %99 = vector.shape_cast %98 : vector<1x32x32xf32> to vector<32x32xf32>
    %cst_39 = arith.constant dense<0.000000e+00> : vector<48x32xf32>
    %100 = tpu.matmul %97, %99, %cst_39 {dimension_numbers = #tpu.dot_dimension_numbers<[1], [0], [0], [1], [0, 0, 1, 1], [], []>} : vector<48x32xf32>, vector<32x32xf32>, vector<48x32xf32> -> vector<48x32xf32>
    %101 = vector.extract_strided_slice %8 {offsets = [1, 0], sizes = [1, 32], strides = [1, 1]} : vector<4x128xf32> to vector<1x32xf32>
    %102 = vector.broadcast %101 : vector<1x32xf32> to vector<48x32xf32>
    %103 = arith.addf %100, %102 : vector<48x32xf32>
    %104 = arith.addf %5, %103 : vector<48x32xf32>
    %cst_40 = arith.constant dense<0.000000e+00> : vector<48xf32>
    %105 = vector.multi_reduction <add>, %104, %cst_40 [1] : vector<48x32xf32> to vector<48xf32>
    %106 = vector.shape_cast %105 : vector<48xf32> to vector<48x1xf32>
    %cst_41 = arith.constant 3.200000e+01 : f32
    %107 = vector.broadcast %cst_41 : f32 to vector<48x1xf32>
    %108 = arith.divf %106, %107 : vector<48x1xf32>
    %109 = vector.broadcast %108 : vector<48x1xf32> to vector<48x32xf32>
    %110 = arith.subf %104, %109 : vector<48x32xf32>
    %111 = arith.mulf %110, %110 : vector<48x32xf32>
    %cst_42 = arith.constant dense<0.000000e+00> : vector<48xf32>
    %112 = vector.multi_reduction <add>, %111, %cst_42 [1] : vector<48x32xf32> to vector<48xf32>
    %113 = vector.shape_cast %112 : vector<48xf32> to vector<48x1xf32>
    %cst_43 = arith.constant 3.200000e+01 : f32
    %114 = vector.broadcast %cst_43 : f32 to vector<48x1xf32>
    %115 = arith.divf %113, %114 : vector<48x1xf32>
    %116 = vector.broadcast %108 : vector<48x1xf32> to vector<48x32xf32>
    %117 = arith.subf %104, %116 : vector<48x32xf32>
    %cst_44 = arith.constant 9.99999974E-6 : f32
    %118 = vector.broadcast %cst_44 : f32 to vector<48x1xf32>
    %119 = arith.addf %115, %118 : vector<48x1xf32>
    %120 = math.rsqrt %119 : vector<48x1xf32>
    %121 = vector.broadcast %120 : vector<48x1xf32> to vector<48x32xf32>
    %122 = arith.mulf %117, %121 : vector<48x32xf32>
    %c0_45 = arith.constant 0 : index
    %c0_46 = arith.constant 0 : index
    %c0_47 = arith.constant 0 : index
    %123 = vector.load %arg7[%c0_45, %c0_46, %c0_47] : memref<2x32x128xf32, #tpu.memory_space<vmem>>, vector<1x32x128xf32>
    %124 = vector.shape_cast %123 : vector<1x32x128xf32> to vector<32x128xf32>
    %cst_48 = arith.constant dense<0.000000e+00> : vector<48x128xf32>
    %125 = tpu.matmul %122, %124, %cst_48 {dimension_numbers = #tpu.dot_dimension_numbers<[1], [0], [0], [1], [0, 0, 1, 1], [], []>} : vector<48x32xf32>, vector<32x128xf32>, vector<48x128xf32> -> vector<48x128xf32>
    %126 = vector.extract_strided_slice %8 {offsets = [2, 0], sizes = [1, 128], strides = [1, 1]} : vector<4x128xf32> to vector<1x128xf32>
    %127 = vector.broadcast %126 : vector<1x128xf32> to vector<48x128xf32>
    %128 = arith.addf %125, %127 : vector<48x128xf32>
    %cst_49 = arith.constant 5.000000e-01 : f32
    %129 = vector.broadcast %cst_49 : f32 to vector<48x128xf32>
    %130 = arith.mulf %129, %128 : vector<48x128xf32>
    %cst_50 = arith.constant 0.707106769 : f32
    %131 = vector.broadcast %cst_50 : f32 to vector<48x128xf32>
    %132 = arith.mulf %128, %131 : vector<48x128xf32>
    %133 = math.absf %132 : vector<48x128xf32>
    %cst_51 = arith.constant 0.327591091 : f32
    %134 = vector.broadcast %cst_51 : f32 to vector<48x128xf32>
    %135 = arith.mulf %134, %133 : vector<48x128xf32>
    %cst_52 = arith.constant 1.000000e+00 : f32
    %136 = vector.broadcast %cst_52 : f32 to vector<48x128xf32>
    %137 = arith.addf %136, %135 : vector<48x128xf32>
    %138 = tpu.reciprocal %137 {approx = true} : vector<48x128xf32> -> vector<48x128xf32>
    %cst_53 = arith.constant 1.06140542 : f32
    %139 = vector.broadcast %cst_53 : f32 to vector<48x128xf32>
    %140 = arith.mulf %139, %138 : vector<48x128xf32>
    %cst_54 = arith.constant 1.45315206 : f32
    %141 = vector.broadcast %cst_54 : f32 to vector<48x128xf32>
    %142 = arith.subf %140, %141 : vector<48x128xf32>
    %143 = arith.mulf %142, %138 : vector<48x128xf32>
    %cst_55 = arith.constant 1.42141378 : f32
    %144 = vector.broadcast %cst_55 : f32 to vector<48x128xf32>
    %145 = arith.addf %143, %144 : vector<48x128xf32>
    %146 = arith.mulf %145, %138 : vector<48x128xf32>
    %cst_56 = arith.constant 0.284496725 : f32
    %147 = vector.broadcast %cst_56 : f32 to vector<48x128xf32>
    %148 = arith.subf %146, %147 : vector<48x128xf32>
    %149 = arith.mulf %148, %138 : vector<48x128xf32>
    %cst_57 = arith.constant 0.254829586 : f32
    %150 = vector.broadcast %cst_57 : f32 to vector<48x128xf32>
    %151 = arith.addf %149, %150 : vector<48x128xf32>
    %152 = arith.mulf %151, %138 : vector<48x128xf32>
    %cst_58 = arith.constant 0.000000e+00 : f32
    %153 = vector.broadcast %cst_58 : f32 to vector<48x128xf32>
    %154 = arith.subf %153, %133 : vector<48x128xf32>
    %155 = arith.mulf %154, %133 : vector<48x128xf32>
    %156 = math.exp %155 : vector<48x128xf32>
    %157 = arith.mulf %152, %156 : vector<48x128xf32>
    %cst_59 = arith.constant 1.000000e+00 : f32
    %158 = vector.broadcast %cst_59 : f32 to vector<48x128xf32>
    %159 = arith.subf %158, %157 : vector<48x128xf32>
    %cst_60 = arith.constant 0.000000e+00 : f32
    %160 = vector.broadcast %cst_60 : f32 to vector<48x128xf32>
    %161 = arith.cmpf olt, %132, %160 : vector<48x128xf32>
    %cst_61 = arith.constant 0.000000e+00 : f32
    %162 = vector.broadcast %cst_61 : f32 to vector<48x128xf32>
    %163 = arith.subf %162, %159 : vector<48x128xf32>
    %164 = arith.select %161, %163, %159 : vector<48x128xi1>, vector<48x128xf32>
    %cst_62 = arith.constant 1.000000e+00 : f32
    %165 = vector.broadcast %cst_62 : f32 to vector<48x128xf32>
    %166 = arith.addf %165, %164 : vector<48x128xf32>
    %167 = arith.mulf %130, %166 : vector<48x128xf32>
    %c0_63 = arith.constant 0 : index
    %c0_64 = arith.constant 0 : index
    %c0_65 = arith.constant 0 : index
    %168 = vector.load %arg8[%c0_63, %c0_64, %c0_65] : memref<2x128x32xf32, #tpu.memory_space<vmem>>, vector<1x128x32xf32>
    %169 = vector.shape_cast %168 : vector<1x128x32xf32> to vector<128x32xf32>
    %cst_66 = arith.constant dense<0.000000e+00> : vector<48x32xf32>
    %170 = tpu.matmul %167, %169, %cst_66 {dimension_numbers = #tpu.dot_dimension_numbers<[1], [0], [0], [1], [0, 0, 1, 1], [], []>} : vector<48x128xf32>, vector<128x32xf32>, vector<48x32xf32> -> vector<48x32xf32>
    %171 = vector.extract_strided_slice %8 {offsets = [3, 0], sizes = [1, 32], strides = [1, 1]} : vector<4x128xf32> to vector<1x32xf32>
    %172 = vector.broadcast %171 : vector<1x32xf32> to vector<48x32xf32>
    %173 = arith.addf %170, %172 : vector<48x32xf32>
    %174 = arith.addf %104, %173 : vector<48x32xf32>
    %c1 = arith.constant 1 : index
    %c0_67 = arith.constant 0 : index
    %c0_68 = arith.constant 0 : index
    %175 = vector.load %arg10[%c1, %c0_67, %c0_68] : memref<3x4x128xf32, #tpu.memory_space<vmem>>, vector<1x4x128xf32>
    %176 = vector.shape_cast %175 : vector<1x4x128xf32> to vector<4x128xf32>
    %cst_69 = arith.constant dense<0.000000e+00> : vector<48xf32>
    %177 = vector.multi_reduction <add>, %174, %cst_69 [1] : vector<48x32xf32> to vector<48xf32>
    %178 = vector.shape_cast %177 : vector<48xf32> to vector<48x1xf32>
    %cst_70 = arith.constant 3.200000e+01 : f32
    %179 = vector.broadcast %cst_70 : f32 to vector<48x1xf32>
    %180 = arith.divf %178, %179 : vector<48x1xf32>
    %181 = vector.broadcast %180 : vector<48x1xf32> to vector<48x32xf32>
    %182 = arith.subf %174, %181 : vector<48x32xf32>
    %183 = arith.mulf %182, %182 : vector<48x32xf32>
    %cst_71 = arith.constant dense<0.000000e+00> : vector<48xf32>
    %184 = vector.multi_reduction <add>, %183, %cst_71 [1] : vector<48x32xf32> to vector<48xf32>
    %185 = vector.shape_cast %184 : vector<48xf32> to vector<48x1xf32>
    %cst_72 = arith.constant 3.200000e+01 : f32
    %186 = vector.broadcast %cst_72 : f32 to vector<48x1xf32>
    %187 = arith.divf %185, %186 : vector<48x1xf32>
    %188 = vector.broadcast %180 : vector<48x1xf32> to vector<48x32xf32>
    %189 = arith.subf %174, %188 : vector<48x32xf32>
    %cst_73 = arith.constant 9.99999974E-6 : f32
    %190 = vector.broadcast %cst_73 : f32 to vector<48x1xf32>
    %191 = arith.addf %187, %190 : vector<48x1xf32>
    %192 = math.rsqrt %191 : vector<48x1xf32>
    %193 = vector.broadcast %192 : vector<48x1xf32> to vector<48x32xf32>
    %194 = arith.mulf %189, %193 : vector<48x32xf32>
    %c1_74 = arith.constant 1 : index
    %c0_75 = arith.constant 0 : index
    %c0_76 = arith.constant 0 : index
    %195 = vector.load %arg5[%c1_74, %c0_75, %c0_76] : memref<2x32x96xf32, #tpu.memory_space<vmem>>, vector<1x32x96xf32>
    %196 = vector.shape_cast %195 : vector<1x32x96xf32> to vector<32x96xf32>
    %cst_77 = arith.constant dense<0.000000e+00> : vector<48x96xf32>
    %197 = tpu.matmul %194, %196, %cst_77 {dimension_numbers = #tpu.dot_dimension_numbers<[1], [0], [0], [1], [0, 0, 1, 1], [], []>} : vector<48x32xf32>, vector<32x96xf32>, vector<48x96xf32> -> vector<48x96xf32>
    %198 = vector.extract_strided_slice %176 {offsets = [0, 0], sizes = [1, 96], strides = [1, 1]} : vector<4x128xf32> to vector<1x96xf32>
    %199 = vector.broadcast %198 : vector<1x96xf32> to vector<48x96xf32>
    %200 = arith.addf %197, %199 : vector<48x96xf32>
    %201 = vector.extract_strided_slice %200 {offsets = [0, 0], sizes = [48, 8], strides = [1, 1]} : vector<48x96xf32> to vector<48x8xf32>
    %202 = vector.extract_strided_slice %200 {offsets = [0, 32], sizes = [48, 8], strides = [1, 1]} : vector<48x96xf32> to vector<48x8xf32>
    %203 = vector.extract_strided_slice %200 {offsets = [0, 64], sizes = [48, 8], strides = [1, 1]} : vector<48x96xf32> to vector<48x8xf32>
    %cst_78 = arith.constant dense<0.000000e+00> : vector<48x48xf32>
    %204 = tpu.matmul %201, %202, %cst_78 {dimension_numbers = #tpu.dot_dimension_numbers<[1], [1], [0], [0], [0, 0, 1, 0], [], []>} : vector<48x8xf32>, vector<48x8xf32>, vector<48x48xf32> -> vector<48x48xf32>
    %205 = arith.addf %204, %6 : vector<48x48xf32>
    %cst_79 = arith.constant dense<0xFF800000> : vector<48xf32>
    %206 = vector.multi_reduction <maximumf>, %205, %cst_79 [1] : vector<48x48xf32> to vector<48xf32>
    %207 = vector.shape_cast %206 : vector<48xf32> to vector<48x1xf32>
    %208 = vector.broadcast %207 : vector<48x1xf32> to vector<48x48xf32>
    %209 = arith.subf %205, %208 : vector<48x48xf32>
    %210 = math.exp %209 : vector<48x48xf32>
    %cst_80 = arith.constant dense<0.000000e+00> : vector<48xf32>
    %211 = vector.multi_reduction <add>, %210, %cst_80 [1] : vector<48x48xf32> to vector<48xf32>
    %212 = vector.shape_cast %211 : vector<48xf32> to vector<48x1xf32>
    %213 = tpu.reciprocal %212 {approx = true} : vector<48x1xf32> -> vector<48x1xf32>
    %214 = vector.broadcast %213 : vector<48x1xf32> to vector<48x48xf32>
    %215 = arith.mulf %210, %214 : vector<48x48xf32>
    %cst_81 = arith.constant dense<0.000000e+00> : vector<48x8xf32>
    %216 = tpu.matmul %215, %203, %cst_81 {dimension_numbers = #tpu.dot_dimension_numbers<[1], [0], [0], [1], [0, 0, 1, 1], [], []>} : vector<48x48xf32>, vector<48x8xf32>, vector<48x8xf32> -> vector<48x8xf32>
    %217 = vector.extract_strided_slice %200 {offsets = [0, 8], sizes = [48, 8], strides = [1, 1]} : vector<48x96xf32> to vector<48x8xf32>
    %218 = vector.extract_strided_slice %200 {offsets = [0, 40], sizes = [48, 8], strides = [1, 1]} : vector<48x96xf32> to vector<48x8xf32>
    %219 = vector.extract_strided_slice %200 {offsets = [0, 72], sizes = [48, 8], strides = [1, 1]} : vector<48x96xf32> to vector<48x8xf32>
    %cst_82 = arith.constant dense<0.000000e+00> : vector<48x48xf32>
    %220 = tpu.matmul %217, %218, %cst_82 {dimension_numbers = #tpu.dot_dimension_numbers<[1], [1], [0], [0], [0, 0, 1, 0], [], []>} : vector<48x8xf32>, vector<48x8xf32>, vector<48x48xf32> -> vector<48x48xf32>
    %221 = arith.addf %220, %6 : vector<48x48xf32>
    %cst_83 = arith.constant dense<0xFF800000> : vector<48xf32>
    %222 = vector.multi_reduction <maximumf>, %221, %cst_83 [1] : vector<48x48xf32> to vector<48xf32>
    %223 = vector.shape_cast %222 : vector<48xf32> to vector<48x1xf32>
    %224 = vector.broadcast %223 : vector<48x1xf32> to vector<48x48xf32>
    %225 = arith.subf %221, %224 : vector<48x48xf32>
    %226 = math.exp %225 : vector<48x48xf32>
    %cst_84 = arith.constant dense<0.000000e+00> : vector<48xf32>
    %227 = vector.multi_reduction <add>, %226, %cst_84 [1] : vector<48x48xf32> to vector<48xf32>
    %228 = vector.shape_cast %227 : vector<48xf32> to vector<48x1xf32>
    %229 = tpu.reciprocal %228 {approx = true} : vector<48x1xf32> -> vector<48x1xf32>
    %230 = vector.broadcast %229 : vector<48x1xf32> to vector<48x48xf32>
    %231 = arith.mulf %226, %230 : vector<48x48xf32>
    %cst_85 = arith.constant dense<0.000000e+00> : vector<48x8xf32>
    %232 = tpu.matmul %231, %219, %cst_85 {dimension_numbers = #tpu.dot_dimension_numbers<[1], [0], [0], [1], [0, 0, 1, 1], [], []>} : vector<48x48xf32>, vector<48x8xf32>, vector<48x8xf32> -> vector<48x8xf32>
    %233 = vector.extract_strided_slice %200 {offsets = [0, 16], sizes = [48, 8], strides = [1, 1]} : vector<48x96xf32> to vector<48x8xf32>
    %234 = vector.extract_strided_slice %200 {offsets = [0, 48], sizes = [48, 8], strides = [1, 1]} : vector<48x96xf32> to vector<48x8xf32>
    %235 = vector.extract_strided_slice %200 {offsets = [0, 80], sizes = [48, 8], strides = [1, 1]} : vector<48x96xf32> to vector<48x8xf32>
    %cst_86 = arith.constant dense<0.000000e+00> : vector<48x48xf32>
    %236 = tpu.matmul %233, %234, %cst_86 {dimension_numbers = #tpu.dot_dimension_numbers<[1], [1], [0], [0], [0, 0, 1, 0], [], []>} : vector<48x8xf32>, vector<48x8xf32>, vector<48x48xf32> -> vector<48x48xf32>
    %237 = arith.addf %236, %6 : vector<48x48xf32>
    %cst_87 = arith.constant dense<0xFF800000> : vector<48xf32>
    %238 = vector.multi_reduction <maximumf>, %237, %cst_87 [1] : vector<48x48xf32> to vector<48xf32>
    %239 = vector.shape_cast %238 : vector<48xf32> to vector<48x1xf32>
    %240 = vector.broadcast %239 : vector<48x1xf32> to vector<48x48xf32>
    %241 = arith.subf %237, %240 : vector<48x48xf32>
    %242 = math.exp %241 : vector<48x48xf32>
    %cst_88 = arith.constant dense<0.000000e+00> : vector<48xf32>
    %243 = vector.multi_reduction <add>, %242, %cst_88 [1] : vector<48x48xf32> to vector<48xf32>
    %244 = vector.shape_cast %243 : vector<48xf32> to vector<48x1xf32>
    %245 = tpu.reciprocal %244 {approx = true} : vector<48x1xf32> -> vector<48x1xf32>
    %246 = vector.broadcast %245 : vector<48x1xf32> to vector<48x48xf32>
    %247 = arith.mulf %242, %246 : vector<48x48xf32>
    %cst_89 = arith.constant dense<0.000000e+00> : vector<48x8xf32>
    %248 = tpu.matmul %247, %235, %cst_89 {dimension_numbers = #tpu.dot_dimension_numbers<[1], [0], [0], [1], [0, 0, 1, 1], [], []>} : vector<48x48xf32>, vector<48x8xf32>, vector<48x8xf32> -> vector<48x8xf32>
    %249 = vector.extract_strided_slice %200 {offsets = [0, 24], sizes = [48, 8], strides = [1, 1]} : vector<48x96xf32> to vector<48x8xf32>
    %250 = vector.extract_strided_slice %200 {offsets = [0, 56], sizes = [48, 8], strides = [1, 1]} : vector<48x96xf32> to vector<48x8xf32>
    %251 = vector.extract_strided_slice %200 {offsets = [0, 88], sizes = [48, 8], strides = [1, 1]} : vector<48x96xf32> to vector<48x8xf32>
    %cst_90 = arith.constant dense<0.000000e+00> : vector<48x48xf32>
    %252 = tpu.matmul %249, %250, %cst_90 {dimension_numbers = #tpu.dot_dimension_numbers<[1], [1], [0], [0], [0, 0, 1, 0], [], []>} : vector<48x8xf32>, vector<48x8xf32>, vector<48x48xf32> -> vector<48x48xf32>
    %253 = arith.addf %252, %6 : vector<48x48xf32>
    %cst_91 = arith.constant dense<0xFF800000> : vector<48xf32>
    %254 = vector.multi_reduction <maximumf>, %253, %cst_91 [1] : vector<48x48xf32> to vector<48xf32>
    %255 = vector.shape_cast %254 : vector<48xf32> to vector<48x1xf32>
    %256 = vector.broadcast %255 : vector<48x1xf32> to vector<48x48xf32>
    %257 = arith.subf %253, %256 : vector<48x48xf32>
    %258 = math.exp %257 : vector<48x48xf32>
    %cst_92 = arith.constant dense<0.000000e+00> : vector<48xf32>
    %259 = vector.multi_reduction <add>, %258, %cst_92 [1] : vector<48x48xf32> to vector<48xf32>
    %260 = vector.shape_cast %259 : vector<48xf32> to vector<48x1xf32>
    %261 = tpu.reciprocal %260 {approx = true} : vector<48x1xf32> -> vector<48x1xf32>
    %262 = vector.broadcast %261 : vector<48x1xf32> to vector<48x48xf32>
    %263 = arith.mulf %258, %262 : vector<48x48xf32>
    %cst_93 = arith.constant dense<0.000000e+00> : vector<48x8xf32>
    %264 = tpu.matmul %263, %251, %cst_93 {dimension_numbers = #tpu.dot_dimension_numbers<[1], [0], [0], [1], [0, 0, 1, 1], [], []>} : vector<48x48xf32>, vector<48x8xf32>, vector<48x8xf32> -> vector<48x8xf32>
    %265 = tpu.concatenate %216, %232, %248, %264 in 1 : vector<48x8xf32>, vector<48x8xf32>, vector<48x8xf32>, vector<48x8xf32> -> vector<48x32xf32>
    %c1_94 = arith.constant 1 : index
    %c0_95 = arith.constant 0 : index
    %c0_96 = arith.constant 0 : index
    %266 = vector.load %arg6[%c1_94, %c0_95, %c0_96] : memref<2x32x32xf32, #tpu.memory_space<vmem>>, vector<1x32x32xf32>
    %267 = vector.shape_cast %266 : vector<1x32x32xf32> to vector<32x32xf32>
    %cst_97 = arith.constant dense<0.000000e+00> : vector<48x32xf32>
    %268 = tpu.matmul %265, %267, %cst_97 {dimension_numbers = #tpu.dot_dimension_numbers<[1], [0], [0], [1], [0, 0, 1, 1], [], []>} : vector<48x32xf32>, vector<32x32xf32>, vector<48x32xf32> -> vector<48x32xf32>
    %269 = vector.extract_strided_slice %176 {offsets = [1, 0], sizes = [1, 32], strides = [1, 1]} : vector<4x128xf32> to vector<1x32xf32>
    %270 = vector.broadcast %269 : vector<1x32xf32> to vector<48x32xf32>
    %271 = arith.addf %268, %270 : vector<48x32xf32>
    %272 = arith.addf %174, %271 : vector<48x32xf32>
    %cst_98 = arith.constant dense<0.000000e+00> : vector<48xf32>
    %273 = vector.multi_reduction <add>, %272, %cst_98 [1] : vector<48x32xf32> to vector<48xf32>
    %274 = vector.shape_cast %273 : vector<48xf32> to vector<48x1xf32>
    %cst_99 = arith.constant 3.200000e+01 : f32
    %275 = vector.broadcast %cst_99 : f32 to vector<48x1xf32>
    %276 = arith.divf %274, %275 : vector<48x1xf32>
    %277 = vector.broadcast %276 : vector<48x1xf32> to vector<48x32xf32>
    %278 = arith.subf %272, %277 : vector<48x32xf32>
    %279 = arith.mulf %278, %278 : vector<48x32xf32>
    %cst_100 = arith.constant dense<0.000000e+00> : vector<48xf32>
    %280 = vector.multi_reduction <add>, %279, %cst_100 [1] : vector<48x32xf32> to vector<48xf32>
    %281 = vector.shape_cast %280 : vector<48xf32> to vector<48x1xf32>
    %cst_101 = arith.constant 3.200000e+01 : f32
    %282 = vector.broadcast %cst_101 : f32 to vector<48x1xf32>
    %283 = arith.divf %281, %282 : vector<48x1xf32>
    %284 = vector.broadcast %276 : vector<48x1xf32> to vector<48x32xf32>
    %285 = arith.subf %272, %284 : vector<48x32xf32>
    %cst_102 = arith.constant 9.99999974E-6 : f32
    %286 = vector.broadcast %cst_102 : f32 to vector<48x1xf32>
    %287 = arith.addf %283, %286 : vector<48x1xf32>
    %288 = math.rsqrt %287 : vector<48x1xf32>
    %289 = vector.broadcast %288 : vector<48x1xf32> to vector<48x32xf32>
    %290 = arith.mulf %285, %289 : vector<48x32xf32>
    %c1_103 = arith.constant 1 : index
    %c0_104 = arith.constant 0 : index
    %c0_105 = arith.constant 0 : index
    %291 = vector.load %arg7[%c1_103, %c0_104, %c0_105] : memref<2x32x128xf32, #tpu.memory_space<vmem>>, vector<1x32x128xf32>
    %292 = vector.shape_cast %291 : vector<1x32x128xf32> to vector<32x128xf32>
    %cst_106 = arith.constant dense<0.000000e+00> : vector<48x128xf32>
    %293 = tpu.matmul %290, %292, %cst_106 {dimension_numbers = #tpu.dot_dimension_numbers<[1], [0], [0], [1], [0, 0, 1, 1], [], []>} : vector<48x32xf32>, vector<32x128xf32>, vector<48x128xf32> -> vector<48x128xf32>
    %294 = vector.extract_strided_slice %176 {offsets = [2, 0], sizes = [1, 128], strides = [1, 1]} : vector<4x128xf32> to vector<1x128xf32>
    %295 = vector.broadcast %294 : vector<1x128xf32> to vector<48x128xf32>
    %296 = arith.addf %293, %295 : vector<48x128xf32>
    %cst_107 = arith.constant 5.000000e-01 : f32
    %297 = vector.broadcast %cst_107 : f32 to vector<48x128xf32>
    %298 = arith.mulf %297, %296 : vector<48x128xf32>
    %cst_108 = arith.constant 0.707106769 : f32
    %299 = vector.broadcast %cst_108 : f32 to vector<48x128xf32>
    %300 = arith.mulf %296, %299 : vector<48x128xf32>
    %301 = math.absf %300 : vector<48x128xf32>
    %cst_109 = arith.constant 0.327591091 : f32
    %302 = vector.broadcast %cst_109 : f32 to vector<48x128xf32>
    %303 = arith.mulf %302, %301 : vector<48x128xf32>
    %cst_110 = arith.constant 1.000000e+00 : f32
    %304 = vector.broadcast %cst_110 : f32 to vector<48x128xf32>
    %305 = arith.addf %304, %303 : vector<48x128xf32>
    %306 = tpu.reciprocal %305 {approx = true} : vector<48x128xf32> -> vector<48x128xf32>
    %cst_111 = arith.constant 1.06140542 : f32
    %307 = vector.broadcast %cst_111 : f32 to vector<48x128xf32>
    %308 = arith.mulf %307, %306 : vector<48x128xf32>
    %cst_112 = arith.constant 1.45315206 : f32
    %309 = vector.broadcast %cst_112 : f32 to vector<48x128xf32>
    %310 = arith.subf %308, %309 : vector<48x128xf32>
    %311 = arith.mulf %310, %306 : vector<48x128xf32>
    %cst_113 = arith.constant 1.42141378 : f32
    %312 = vector.broadcast %cst_113 : f32 to vector<48x128xf32>
    %313 = arith.addf %311, %312 : vector<48x128xf32>
    %314 = arith.mulf %313, %306 : vector<48x128xf32>
    %cst_114 = arith.constant 0.284496725 : f32
    %315 = vector.broadcast %cst_114 : f32 to vector<48x128xf32>
    %316 = arith.subf %314, %315 : vector<48x128xf32>
    %317 = arith.mulf %316, %306 : vector<48x128xf32>
    %cst_115 = arith.constant 0.254829586 : f32
    %318 = vector.broadcast %cst_115 : f32 to vector<48x128xf32>
    %319 = arith.addf %317, %318 : vector<48x128xf32>
    %320 = arith.mulf %319, %306 : vector<48x128xf32>
    %cst_116 = arith.constant 0.000000e+00 : f32
    %321 = vector.broadcast %cst_116 : f32 to vector<48x128xf32>
    %322 = arith.subf %321, %301 : vector<48x128xf32>
    %323 = arith.mulf %322, %301 : vector<48x128xf32>
    %324 = math.exp %323 : vector<48x128xf32>
    %325 = arith.mulf %320, %324 : vector<48x128xf32>
    %cst_117 = arith.constant 1.000000e+00 : f32
    %326 = vector.broadcast %cst_117 : f32 to vector<48x128xf32>
    %327 = arith.subf %326, %325 : vector<48x128xf32>
    %cst_118 = arith.constant 0.000000e+00 : f32
    %328 = vector.broadcast %cst_118 : f32 to vector<48x128xf32>
    %329 = arith.cmpf olt, %300, %328 : vector<48x128xf32>
    %cst_119 = arith.constant 0.000000e+00 : f32
    %330 = vector.broadcast %cst_119 : f32 to vector<48x128xf32>
    %331 = arith.subf %330, %327 : vector<48x128xf32>
    %332 = arith.select %329, %331, %327 : vector<48x128xi1>, vector<48x128xf32>
    %cst_120 = arith.constant 1.000000e+00 : f32
    %333 = vector.broadcast %cst_120 : f32 to vector<48x128xf32>
    %334 = arith.addf %333, %332 : vector<48x128xf32>
    %335 = arith.mulf %298, %334 : vector<48x128xf32>
    %c1_121 = arith.constant 1 : index
    %c0_122 = arith.constant 0 : index
    %c0_123 = arith.constant 0 : index
    %336 = vector.load %arg8[%c1_121, %c0_122, %c0_123] : memref<2x128x32xf32, #tpu.memory_space<vmem>>, vector<1x128x32xf32>
    %337 = vector.shape_cast %336 : vector<1x128x32xf32> to vector<128x32xf32>
    %cst_124 = arith.constant dense<0.000000e+00> : vector<48x32xf32>
    %338 = tpu.matmul %335, %337, %cst_124 {dimension_numbers = #tpu.dot_dimension_numbers<[1], [0], [0], [1], [0, 0, 1, 1], [], []>} : vector<48x128xf32>, vector<128x32xf32>, vector<48x32xf32> -> vector<48x32xf32>
    %339 = vector.extract_strided_slice %176 {offsets = [3, 0], sizes = [1, 32], strides = [1, 1]} : vector<4x128xf32> to vector<1x32xf32>
    %340 = vector.broadcast %339 : vector<1x32xf32> to vector<48x32xf32>
    %341 = arith.addf %338, %340 : vector<48x32xf32>
    %342 = arith.addf %272, %341 : vector<48x32xf32>
    %343 = vector.extract_strided_slice %342 {offsets = [16, 0], sizes = [8, 32], strides = [1, 1]} : vector<48x32xf32> to vector<8x32xf32>
    %344 = vector.extract_strided_slice %342 {offsets = [40, 0], sizes = [8, 32], strides = [1, 1]} : vector<48x32xf32> to vector<8x32xf32>
    %345 = tpu.concatenate %343, %344 in 0 : vector<8x32xf32>, vector<8x32xf32> -> vector<16x32xf32>
    %cst_125 = arith.constant dense<0.000000e+00> : vector<16xf32>
    %346 = vector.multi_reduction <add>, %345, %cst_125 [1] : vector<16x32xf32> to vector<16xf32>
    %347 = vector.shape_cast %346 : vector<16xf32> to vector<16x1xf32>
    %cst_126 = arith.constant 3.200000e+01 : f32
    %348 = vector.broadcast %cst_126 : f32 to vector<16x1xf32>
    %349 = arith.divf %347, %348 : vector<16x1xf32>
    %350 = vector.broadcast %349 : vector<16x1xf32> to vector<16x32xf32>
    %351 = arith.subf %345, %350 : vector<16x32xf32>
    %352 = arith.mulf %351, %351 : vector<16x32xf32>
    %cst_127 = arith.constant dense<0.000000e+00> : vector<16xf32>
    %353 = vector.multi_reduction <add>, %352, %cst_127 [1] : vector<16x32xf32> to vector<16xf32>
    %354 = vector.shape_cast %353 : vector<16xf32> to vector<16x1xf32>
    %cst_128 = arith.constant 3.200000e+01 : f32
    %355 = vector.broadcast %cst_128 : f32 to vector<16x1xf32>
    %356 = arith.divf %354, %355 : vector<16x1xf32>
    %357 = vector.broadcast %349 : vector<16x1xf32> to vector<16x32xf32>
    %358 = arith.subf %345, %357 : vector<16x32xf32>
    %cst_129 = arith.constant 9.99999974E-6 : f32
    %359 = vector.broadcast %cst_129 : f32 to vector<16x1xf32>
    %360 = arith.addf %356, %359 : vector<16x1xf32>
    %361 = math.rsqrt %360 : vector<16x1xf32>
    %362 = vector.broadcast %361 : vector<16x1xf32> to vector<16x32xf32>
    %363 = arith.mulf %358, %362 : vector<16x32xf32>
    %c2 = arith.constant 2 : index
    %c0_130 = arith.constant 0 : index
    %c0_131 = arith.constant 0 : index
    %364 = vector.load %arg10[%c2, %c0_130, %c0_131] : memref<3x4x128xf32, #tpu.memory_space<vmem>>, vector<1x4x128xf32>
    %365 = vector.shape_cast %364 : vector<1x4x128xf32> to vector<4x128xf32>
    %366 = vector.extract_strided_slice %365 {offsets = [0, 0], sizes = [1, 128], strides = [1, 1]} : vector<4x128xf32> to vector<1x128xf32>
    %c0_132 = arith.constant 0 : index
    %c0_133 = arith.constant 0 : index
    %367 = vector.load %arg9[%c0_132, %c0_133] : memref<32x128xf32, #tpu.memory_space<vmem>>, vector<32x128xf32>
    %cst_134 = arith.constant dense<0.000000e+00> : vector<16x128xf32>
    %368 = tpu.matmul %363, %367, %cst_134 {dimension_numbers = #tpu.dot_dimension_numbers<[1], [0], [0], [1], [0, 0, 1, 1], [], []>} : vector<16x32xf32>, vector<32x128xf32>, vector<16x128xf32> -> vector<16x128xf32>
    %369 = vector.broadcast %366 : vector<1x128xf32> to vector<16x128xf32>
    %370 = arith.addf %368, %369 : vector<16x128xf32>
    %c0_135 = arith.constant 0 : index
    %c0_136 = arith.constant 0 : index
    %c0_137 = arith.constant 0 : index
    %371 = vector.load %arg11[%c0_135, %c0_136, %c0_137] : memref<1x16x128xf32, #tpu.memory_space<vmem>>, vector<1x16x128xf32>
    %372 = vector.shape_cast %371 : vector<1x16x128xf32> to vector<16x128xf32>
    %373 = vector.shape_cast %370 : vector<16x128xf32> to vector<1x16x128xf32>
    tpu.vector_store %arg11[%c0_135, %c0_136, %c0_137], %373 {strides = array<i32>} : memref<1x16x128xf32, #tpu.memory_space<vmem>>, vector<1x16x128xf32>,
    return
  }
  func.func @transform_0(%arg0: i32) -> (i32, i32, i32) {
    %c0_i32 = arith.constant 0 : i32
    %c0_i32_0 = arith.constant 0 : i32
    %c0_i32_1 = arith.constant 0 : i32
    return %arg0, %c0_i32, %c0_i32_0 : i32, i32, i32
  }
  func.func @transform_1(%arg0: i32) -> (i32, i32) {
    %c0_i32 = arith.constant 0 : i32
    %c0_i32_0 = arith.constant 0 : i32
    %c0_i32_1 = arith.constant 0 : i32
    return %c0_i32, %c0_i32_0 : i32, i32
  }
  func.func @transform_2(%arg0: i32) -> (i32, i32) {
    %c0_i32 = arith.constant 0 : i32
    %c0_i32_0 = arith.constant 0 : i32
    %c0_i32_1 = arith.constant 0 : i32
    return %c0_i32, %c0_i32_0 : i32, i32
  }
  func.func @transform_3(%arg0: i32) -> (i32, i32) {
    %c0_i32 = arith.constant 0 : i32
    %c0_i32_0 = arith.constant 0 : i32
    %c0_i32_1 = arith.constant 0 : i32
    return %c0_i32, %c0_i32_0 : i32, i32
  }
  func.func @transform_4(%arg0: i32) -> (i32, i32, i32) {
    %c0_i32 = arith.constant 0 : i32
    %c0_i32_0 = arith.constant 0 : i32
    %c0_i32_1 = arith.constant 0 : i32
    %c0_i32_2 = arith.constant 0 : i32
    return %c0_i32, %c0_i32_0, %c0_i32_1 : i32, i32, i32
  }
  func.func @transform_5(%arg0: i32) -> (i32, i32, i32) {
    %c0_i32 = arith.constant 0 : i32
    %c0_i32_0 = arith.constant 0 : i32
    %c0_i32_1 = arith.constant 0 : i32
    %c0_i32_2 = arith.constant 0 : i32
    return %c0_i32, %c0_i32_0, %c0_i32_1 : i32, i32, i32
  }
  func.func @transform_6(%arg0: i32) -> (i32, i32, i32) {
    %c0_i32 = arith.constant 0 : i32
    %c0_i32_0 = arith.constant 0 : i32
    %c0_i32_1 = arith.constant 0 : i32
    %c0_i32_2 = arith.constant 0 : i32
    return %c0_i32, %c0_i32_0, %c0_i32_1 : i32, i32, i32
  }
  func.func @transform_7(%arg0: i32) -> (i32, i32, i32) {
    %c0_i32 = arith.constant 0 : i32
    %c0_i32_0 = arith.constant 0 : i32
    %c0_i32_1 = arith.constant 0 : i32
    %c0_i32_2 = arith.constant 0 : i32
    return %c0_i32, %c0_i32_0, %c0_i32_1 : i32, i32, i32
  }
  func.func @transform_8(%arg0: i32) -> (i32, i32) {
    %c0_i32 = arith.constant 0 : i32
    %c0_i32_0 = arith.constant 0 : i32
    %c0_i32_1 = arith.constant 0 : i32
    return %c0_i32, %c0_i32_0 : i32, i32
  }
  func.func @transform_9(%arg0: i32) -> (i32, i32, i32) {
    %c0_i32 = arith.constant 0 : i32
    %c0_i32_0 = arith.constant 0 : i32
    %c0_i32_1 = arith.constant 0 : i32
    %c0_i32_2 = arith.constant 0 : i32
    return %c0_i32, %c0_i32_0, %c0_i32_1 : i32, i32, i32
  }
  func.func @transform_10(%arg0: i32) -> (i32, i32, i32) {
    %c0_i32 = arith.constant 0 : i32
    %c0_i32_0 = arith.constant 0 : i32
    %c0_i32_1 = arith.constant 0 : i32
    return %arg0, %c0_i32, %c0_i32_0 : i32, i32, i32
  }
}

</mosaic_0001>

<bundles_post_ra>
// kernel: tile.18
= control target key start
LH: loop header
LB: loop body
LE: loop exit
PB: predicated region body
PF: predicated region fallthrough
CT: control target
= control target key end

     0   :  { %v14_v2 = vmov 0   ;;  %s31_s0 = inlined_call_operand.vmem [shape: pred[24], index: 0, kind: input, shape index: {}]   ;;  %s32_s1 = inlined_call_operand.vmem [shape: pred[2,24], index: 1, kind: output, shape index: {}]  }
   0x1   :  { %v4_v0 = vld [vmem:[%s31_s0] ss:$0 sm:$0xff] }
   0x2   :  { %v7_v1 = vand.u32 255, %v4_v0 }
   0x4   :  { %v8_v3 = vpack.c.b16 %v14_v2, %v7_v1 }
   0x6   :  { %v9_v4 = vpack.c.b8 %v14_v2, %v8_v3 }
   0x8   :  { %12 = vst [vmem:[%s32_s1] sm:$0x1] %v9_v4 }

// kernel: eq.8
= control target key start
LH: loop header
LB: loop body
LE: loop exit
PB: predicated region body
PF: predicated region fallthrough
CT: control target
= control target key end

     0   :  { %vm8_vm0 = vcmask 195584   ;;  %vm14_vm1 = vcmask 392384   ;;  %s42_s0 = inlined_call_operand.vmem [shape: s32[2,24], index: 0, kind: input, shape index: {}]   ;;  %s43_s1 = inlined_call_operand.vmem [shape: s32[48], index: 1, kind: output, shape index: {}]  }
   0x1   :  { %v5_v0 = vld [vmem:[%s42_s0] sm:$0x3]  ;;  %s25_s0 = smov 24  }
   0x2   :  { %6 = vst [vmem:[#allocation1] sm:$0x3] %v5_v0 }
   0x9   :  { %v11_v1 = vld [vmem:[#allocation1 + $0x1] sm:$0x1]   ;;  %v7_v2 = vld [vmem:[#allocation1] sm:$0x1]  }
   0xa   :  { %12 = vrot.lane.b32.xlu0 %v11_v1, %s25_s0  ;;  %9 = vst.msk [vmem:[#allocation0] sm:$0x1] %vm8_vm0, %v7_v2  }
  0x7c   :  { %v13_v3 = vpop.permute.xlu0 %12  }
  0x7d   :  { %15 = vst.msk [vmem:[#allocation0] sm:$0x1] %vm14_vm1, %v13_v3  }
  0x84   :  { %v20_v4 = vld [vmem:[#allocation0] sm:$0x1] }
  0x85   :  { %23 = vst [vmem:[%s43_s1] sm:$0x1] %v20_v4 }

// kernel: _vit_forward_impl.1
= control target key start
LH: loop header
LB: loop body
LE: loop exit
PB: predicated region body
PF: predicated region fallthrough
CT: control target
= control target key end

     0   :  { %vm55_vm0 = vcmask 523264   ;;  %vm176_vm1 = vcmask 261120   ;;  %vm395_vm2 = vcmask 64512   ;;  %s6223_s19 = smov 96   ;;  %s6224_s20 = smov 64   ;;  %vm515_vm3 = vcmask 392192   ;;  %s8047_s3 = inlined_call_operand.vmem [shape: f32[64,32], index: 3, kind: input, shape index: {}]   ;;  %s8048_s0 = inlined_call_operand.vmem [shape: f32[1,48,64], index: 0, kind: input, shape index: {}]   ;;  %s8049_s1 = inlined_call_operand.vmem [shape: f32[48,32], index: 1, kind: input, shape index: {}]   ;;  %s8050_s4 = inlined_call_operand.vmem [shape: f32[2,32,96], index: 4, kind: input, shape index: {}]   ;;  %s8051_s9 = inlined_call_operand.vmem [shape: f32[3,4,128], index: 9, kind: input, shape index: {}]   ;;  %s8052_s2 = inlined_call_operand.vmem [shape: f32[48,48], index: 2, kind: input, shape index: {}]   ;;  %s8053_s5 = inlined_call_operand.vmem [shape: f32[2,32,32], index: 5, kind: input, shape index: {}]   ;;  %s8054_s6 = inlined_call_operand.vmem [shape: f32[2,32,128], index: 6, kind: input, shape index: {}]   ;;  %s8055_s7 = inlined_call_operand.vmem [shape: f32[2,128,32], index: 7, kind: input, shape index: {}]   ;;  %s8056_s8 = inlined_call_operand.vmem [shape: f32[32,128], index: 8, kind: input, shape index: {}]   ;;  %s8057_s10 = inlined_call_operand.vmem [shape: f32[1,16,128], index: 10, kind: output, shape index: {}]  }
   0x1   :  { %v48_v0 = vld [vmem:[%s8047_s3 + $0x38] sm:$0xff]  ;;  %v47_v1 = vld [vmem:[%s8047_s3 + $0x30] sm:$0xff]  ;;  %v46_v2 = vld [vmem:[%s8047_s3 + $0x28] sm:$0xff]  ;;  %s6225_s21 = smov 88   ;;  %s6226_s12 = smov 120   ;;  %vm1811_vm4 = vcmask 130048  }
   0x2   :  { %5353 = vmatprep.subr.mxu0 %v48_v0  ;;  %v35_v3 = vld [vmem:[%s8048_s0] sm:$0xff]  ;;  %v44_v5 = vld [vmem:[%s8047_s3 + $0x18] sm:$0xff]  ;;  %v43_v6 = vld [vmem:[%s8047_s3 + $0x10] sm:$0xff]  ;;  %s6227_s13 = smov 56   ;;  %s6228_s14 = smov 80   ;;  %vm1818_vm5 = vcmask 195584  }
   0x3   :  { %5354 = vmatpush3.msra.mxu0 %v48_v0  ;;  %5369 = vmatprep.mubr.msk.f32.mxu0 %vm55_vm0, %v35_v3  ;;  %v45_v4 = vld [vmem:[%s8047_s3 + $0x20] sm:$0xff]  ;;  %v42_v7 = vld [vmem:[%s8047_s3 + $0x8] sm:$0xff]  ;;  %v37_v10 = vld [vmem:[%s8048_s0 + $0x10] sm:$0xff]  ;;  %s6229_s15 = smov 112   ;;  %s6230_s16 = smov 48  }
   0x4   :  { %5355 = vmatprep.subr.mxu0 %v47_v1  ;;  %v41_v8 = vld [vmem:[%s8047_s3] sm:$0xff]  ;;  %v36_v9 = vld [vmem:[%s8048_s0 + $0x8] sm:$0xff]  ;;  %v38_v11 = vld [vmem:[%s8048_s0 + $0x18] sm:$0xff]  ;;  %s6231_s3 = smov 72   ;;  %s6232_s17 = smov 104  }
   0x5   :  { %5356 = vmatpush3.msra.mxu0 %v47_v1  ;;  %v39_v12 = vld [vmem:[%s8048_s0 + $0x20] sm:$0xff]  ;;  %v40_v13 = vld [vmem:[%s8048_s0 + $0x28] sm:$0xff]  ;;  %v51_v20 = vld [vmem:[%s8049_s1 + $0x10] sm:$0xff]  ;;  %s6233_s18 = smov 40   ;;  %s6234_s22 = smov 8  }
   0x6   :  { %5357 = vmatprep.subr.mxu0 %v46_v2  ;;  %v49_v15 = vld [vmem:[%s8049_s1] sm:$0xff]  ;;  %v50_v16 = vld [vmem:[%s8049_s1 + $0x8] sm:$0xff]  ;;  %v52_v23 = vld [vmem:[%s8049_s1 + $0x18] sm:$0xff]  ;;  %s6235_s23 = smov 16  }
   0x7   :  { %5358 = vmatpush3.msra.mxu0 %v46_v2  ;;  %v53_v27 = vld [vmem:[%s8049_s1 + $0x20] sm:$0xff]  ;;  %v54_v31 = vld [vmem:[%s8049_s1 + $0x28] sm:$0xff]  ;;  %s6236_s1 = smov 24  }
   0x8   :  { %5359 = vmatprep.subr.mxu0 %v45_v4 }
   0x9   :  { %5360 = vmatpush3.msra.mxu0 %v45_v4  ;;  %v259_v4 = vld [vmem:[%s8050_s4 + $0x18] sm:$0xff] }
   0xa   :  { %5361 = vmatprep.subr.mxu0 %v44_v5 }
   0xb   :  { %5362 = vmatpush3.msra.mxu0 %v44_v5  ;;  %v258_v5 = vld [vmem:[%s8050_s4 + $0x10] sm:$0xff] }
   0xc   :  { %5363 = vmatprep.subr.mxu0 %v43_v6 }
   0xd   :  { %5364 = vmatpush3.msra.mxu0 %v43_v6  ;;  %v257_v6 = vld [vmem:[%s8050_s4 + $0x8] sm:$0xff] }
   0xe   :  { %5365 = vmatprep.subr.mxu0 %v42_v7 }
   0xf   :  { %5366 = vmatpush3.msra.mxu0 %v42_v7  ;;  %v256_v7 = vld [vmem:[%s8050_s4] sm:$0xff] }
  0x10   :  { %5367 = vmatprep.subr.mxu0 %v41_v8 }
  0x11   :  { %5368 = vmatpush3.msra.mxu0 %v41_v8 }
  0x12   :  { %5370 = vmatmul.mubr.msk.f32.vlgmr.msra.gmra.mxu0 %vm55_vm0, %v36_v9  ;;  %5378 = vmatprep.subr.mxu0 %v259_v4 }
  0x13   :  { %5372 = vmatprep.mubr.msk.f32.mxu0 %vm55_vm0, %v37_v10  ;;  %5379 = vmatpush3.msra.mxu0 %v259_v4 }
  0x14   :  { %5380 = vmatprep.subr.mxu0 %v258_v5 }
  0x15   :  { %5381 = vmatpush3.msra.mxu0 %v258_v5 }
  0x16   :  { %5373 = vmatmul.mubr.msk.f32.gmra.mxu0 %vm55_vm0, %v38_v11  ;;  %5382 = vmatprep.subr.mxu0 %v257_v6 }
  0x17   :  { %5375 = vmatprep.mubr.msk.f32.mxu0 %vm55_vm0, %v39_v12  ;;  %5383 = vmatpush3.msra.mxu0 %v257_v6 }
  0x18   :  { %5384 = vmatprep.subr.mxu0 %v256_v7 }
  0x19   :  { %5385 = vmatpush3.msra.mxu0 %v256_v7 }
  0x1a   :  { %5376 = vmatmul.mubr.msk.f32.gmra.mxu0 %vm55_vm0, %v40_v13 }
  0xd2   :  { %v5371_v14 = vpop.f32.mrf.mxu0 }
  0xd3   :  { %v6351_v21 = vadd.f32 %v5371_v14, %v50_v16 }
  0xd4   :  { %v140_v17 = vpop.f32.mrf.mxu0 }
  0xd5   :  { %v6346_v18 = vadd.f32 %v140_v17, %v49_v15  ;;  %v180_v30 = vsel %vm176_vm1, %v6351_v21, 0.0 }
  0xd6   :  { %v5374_v19 = vpop.f32.mrf.mxu0 }
  0xd7   :  { %v177_v22 = vsel %vm176_vm1, %v6346_v18, 0.0  ;;  %v6363_v28 = vadd.f32 %v5374_v19, %v52_v23 }
  0xd8   :  { %v150_v24 = vpop.f32.mrf.mxu0  ;;  %178 = vadd.xlane.f32.xlu0 %v177_v22 }
  0xd9   :  { %v6358_v25 = vadd.f32 %v150_v24, %v51_v20  ;;  %v186_v35 = vsel %vm176_vm1, %v6363_v28, 0.0 }
  0xda   :  { %v5377_v26 = vpop.f32.mrf.mxu0 }
  0xdb   :  { %v183_v29 = vsel %vm176_vm1, %v6358_v25, 0.0  ;;  %v6374_v34 = vadd.f32 %v5377_v26, %v54_v31 }
  0xdc   :  { %v160_v32 = vpop.f32.mrf.mxu0  ;;  %184 = vadd.xlane.f32.xlu1 %v183_v29  ;;  %181 = vadd.xlane.f32.xlu0 %v180_v30 }
  0xdd   :  { %v6372_v33 = vadd.f32 %v160_v32, %v53_v27  ;;  %v192_v37 = vsel %vm176_vm1, %v6374_v34, 0.0 }
  0xdf   :  { %v189_v36 = vsel %vm176_vm1, %v6372_v33, 0.0 }
  0xe0   :  { %187 = vadd.xlane.f32.xlu1 %v186_v35  ;;  %190 = vadd.xlane.f32.xlu0 %v189_v36 }
  0xe4   :  { %193 = vadd.xlane.f32.xlu1 %v192_v37 }
 0x161   :  { %v179_v38 = vpop.xlane.xlu0 %178 }
 0x162   :  { %v196_v39 = vmul.f32 0.03125, %v179_v38 }
 0x164   :  { %v6383_v40 = vsub.f32 %v6346_v18, %v196_v39 }
 0x165   :  { %v185_v41 = vpop.xlane.xlu1 %184  ;;  %v182_v42 = vpop.xlane.xlu0 %181 }
 0x166   :  { %v198_v43 = vmul.f32 0.03125, %v185_v41  ;;  %v197_v44 = vmul.f32 0.03125, %v182_v42  ;;  %v208_v45 = vmul.f32 %v6383_v40, %v6383_v40 }
 0x168   :  { %v6388_v46 = vsub.f32 %v6358_v25, %v198_v43  ;;  %v6391_v47 = vsub.f32 %v6351_v21, %v197_v44  ;;  %v214_v48 = vsel %vm176_vm1, %v208_v45, 0.0  ;;  %v260_v44 = vlaneseq }
 0x169   :  { %v188_v49 = vpop.xlane.xlu1 %187  ;;  %215 = vadd.xlane.f32.xlu0 %v214_v48  ;;  %v191_v50 = vpop.xlane.xlu0 %190 }
 0x16a   :  { %v199_v51 = vmul.f32 0.03125, %v188_v49  ;;  %v200_v52 = vmul.f32 0.03125, %v191_v50  ;;  %v210_v53 = vmul.f32 %v6388_v46, %v6388_v46  ;;  %v209_v54 = vmul.f32 %v6391_v47, %v6391_v47 }
 0x16b   :  { %v6437_v45 = vshrl.u32 %v260_v44, 7 }
 0x16c   :  { %v6399_v55 = vsub.f32 %v6363_v28, %v199_v51  ;;  %v6402_v56 = vsub.f32 %v6372_v33, %v200_v52  ;;  %v220_v57 = vsel %vm176_vm1, %v210_v53, 0.0  ;;  %v217_v58 = vsel %vm176_vm1, %v209_v54, 0.0 }
 0x16d   :  { %v194_v59 = vpop.xlane.xlu1 %193  ;;  %221 = vadd.xlane.f32.xlu0 %v220_v57  ;;  %218 = vadd.xlane.f32.xlu1 %v217_v58 }
 0x16e   :  { %v201_v60 = vmul.f32 0.03125, %v194_v59  ;;  %v211_v61 = vmul.f32 %v6399_v55, %v6399_v55  ;;  %v212_v62 = vmul.f32 %v6402_v56, %v6402_v56 }
 0x170   :  { %v207_v63 = vsub.f32 %v6374_v34, %v201_v60  ;;  %v223_v0 = vsel %vm176_vm1, %v211_v61, 0.0  ;;  %v226_v1 = vsel %vm176_vm1, %v212_v62, 0.0 }
 0x171   :  { %224 = vadd.xlane.f32.xlu1 %v223_v0  ;;  %227 = vadd.xlane.f32.xlu0 %v226_v1 }
 0x172   :  { %v213_v2 = vmul.f32 %v207_v63, %v207_v63 }
 0x174   :  { %v229_v3 = vsel %vm176_vm1, %v213_v2, 0.0 }
 0x175   :  { %230 = vadd.xlane.f32.xlu1 %v229_v3 }
 0x1f2   :  { %v216_v8 = vpop.xlane.xlu0 %215 }
 0x1f3   :  { %v232_v9 = vmul.f32 0.03125, %v216_v8 }
 0x1f5   :  { %v238_v10 = vadd.f32 1e-05, %v232_v9 }
 0x1f6   :  { %v219_v11 = vpop.xlane.xlu1 %218  ;;  %v222_v12 = vpop.xlane.xlu0 %221 }
 0x1f7   :  { %5923 = vrsqrt.f32 %v238_v10  ;;  %v233_v13 = vmul.f32 0.03125, %v219_v11  ;;  %v234_v14 = vmul.f32 0.03125, %v222_v12  ;;  %v6517_v10 = vld [vmem:[%s8052_s2 + $0x8] sm:$0xff]  ;;  %v6522_v12 = vld [vmem:[%s8052_s2] sm:$0xff] }
 0x1f9   :  { %v239_v15 = vadd.f32 1e-05, %v233_v13  ;;  %v240_v16 = vadd.f32 1e-05, %v234_v14 }
 0x1fa   :  { %v225_v17 = vpop.xlane.xlu1 %224  ;;  %v228_v19 = vpop.xlane.xlu0 %227 }
 0x1fb   :  { %5925 = vrsqrt.f32 %v239_v15  ;;  %v235_v20 = vmul.f32 0.03125, %v225_v17  ;;  %v236_v22 = vmul.f32 0.03125, %v228_v19  ;;  %v6528_v15 = vld [vmem:[%s8052_s2 + $0x18] sm:$0xff] }
 0x1fc   :  { %5927 = vrsqrt.f32 %v240_v16 }
 0x1fd   :  { %v241_v23 = vadd.f32 1e-05, %v235_v20  ;;  %v242_v24 = vadd.f32 1e-05, %v236_v22 }
 0x1fe   :  { %v231_v26 = vpop.xlane.xlu1 %230 }
 0x1ff   :  { %5929 = vrsqrt.f32 %v241_v23  ;;  %v237_v27 = vmul.f32 0.03125, %v231_v26  ;;  %v6542_v26 = vld [vmem:[%s8052_s2 + $0x28] sm:$0xff] }
 0x200   :  { %5931 = vrsqrt.f32 %v242_v24  ;;  %v6537_v24 = vld [vmem:[%s8052_s2 + $0x10] sm:$0xff] }
 0x201   :  { %v243_v29 = vadd.f32 1e-05, %v237_v27 }
 0x203   :  { %5933 = vrsqrt.f32 %v243_v29 }
 0x204   :  { %v5924_v30 = vpop.eup %5923 }
 0x205   :  { %v250_v31 = vmul.f32 %v5924_v30, %v6383_v40 }
 0x207   :  { %5386 = vmatprep.mubr.msk.f32.mxu0 %vm176_vm1, %v250_v31 }
 0x208   :  { %v5926_v32 = vpop.eup %5925 }
 0x209   :  { %v5928_v35 = vpop.eup %5927  ;;  %v251_v36 = vmul.f32 %v5926_v32, %v6391_v47  ;;  %v175_v47 = vld [vmem:[%s8051_s9] sm:$0xf] }
 0x20a   :  { %v252_v37 = vmul.f32 %v5928_v35, %v6388_v46  ;;  %v6440_v46 = vsub.s32 0, %v6437_v45  ;;  %v6550_v35 = vld [vmem:[%s8052_s2 + $0x20] sm:$0xff] }
 0x20b   :  { %5387 = vmatmul.mubr.msk.f32.vlgmr.msra.gmra.mxu0 %vm176_vm1, %v251_v36 }
 0x20c   :  { %v5930_v38 = vpop.eup %5929  ;;  %5389 = vmatprep.mubr.msk.f32.mxu0 %vm176_vm1, %v252_v37  ;;  %v263_v49 = vrot.slane %v175_v47, %v6440_v46 }
 0x20d   :  { %v5932_v39 = vpop.eup %5931  ;;  %v253_v41 = vmul.f32 %v5930_v38, %v6399_v55 }
 0x20e   :  { %v254_v42 = vmul.f32 %v5932_v39, %v6402_v56 }
 0x20f   :  { %5390 = vmatmul.mubr.msk.f32.gmra.mxu0 %vm176_vm1, %v253_v41 }
 0x210   :  { %v5934_v40 = vpop.eup %5933  ;;  %5392 = vmatprep.mubr.msk.f32.mxu0 %vm176_vm1, %v254_v42 }
 0x211   :  { %v255_v43 = vmul.f32 %v5934_v40, %v207_v63 }
 0x213   :  { %5393 = vmatmul.mubr.msk.f32.gmra.mxu0 %vm176_vm1, %v255_v43 }
 0x2cb   :  { %v5388_v48 = vpop.f32.mrf.mxu0 }
 0x2cc   :  { %v6456_v58 = vadd.f32 %v5388_v48, %v263_v49 }
 0x2cd   :  { %v348_v50 = vpop.f32.mrf.mxu0 }
 0x2ce   :  { %v6446_v51 = vadd.f32 %v348_v50, %v263_v49 }
 0x2cf   :  { %v5391_v52 = vpop.f32.mrf.mxu0 }
 0x2d0   :  { %5407 = vmatprep.mubr.msk.f32.mxu1 %vm395_vm2, %v6446_v51  ;;  %v6460_v59 = vadd.f32 %v5391_v52, %v263_v49 }
 0x2d1   :  { %v358_v53 = vpop.f32.mrf.mxu0 }
 0x2d2   :  { %v6466_v60 = vadd.f32 %v358_v53, %v263_v49 }
 0x2d3   :  { %v5394_v54 = vpop.f32.mrf.mxu0 }
 0x2d4   :  { %v6450_v55 = vadd.f32 %v5394_v54, %v263_v49 }
 0x2d5   :  { %v368_v56 = vpop.f32.mrf.mxu0 }
 0x2d6   :  { %v6452_v57 = vadd.f32 %v368_v56, %v263_v49  ;;  %393 = vrot.lane.b32.xlu0 %v6450_v55, %s6223_s19 }
 0x2d8   :  { %391 = vrot.lane.b32.xlu1 %v6452_v57, %s6223_s19 }
 0x2da   :  { %385 = vrot.lane.b32.xlu0 %v6456_v58, %s6223_s19 }
 0x2dc   :  { %389 = vrot.lane.b32.xlu1 %v6460_v59, %s6223_s19 }
 0x2de   :  { %592 = vrot.lane.b32.xlu0 %v6450_v55, %s6224_s20 }
 0x2e0   :  { %387 = vrot.lane.b32.xlu1 %v6466_v60, %s6223_s19 }
 0x2e2   :  { %588 = vrot.lane.b32.xlu0 %v6460_v59, %s6224_s20 }
 0x2e4   :  { %383 = vrot.lane.b32.xlu1 %v6446_v51, %s6223_s19 }
 0x2e6   :  { %735 = vrot.lane.b32.xlu0 %v6450_v55, %s6225_s21 }
 0x2e8   :  { %586 = vrot.lane.b32.xlu1 %v6466_v60, %s6224_s20 }
 0x2ec   :  { %584 = vrot.lane.b32.xlu1 %v6456_v58, %s6224_s20 }
 0x2f0   :  { %582 = vrot.lane.b32.xlu1 %v6446_v51, %s6224_s20 }
 0x2f4   :  { %590 = vrot.lane.b32.xlu1 %v6452_v57, %s6224_s20 }
 0x2f8   :  { %733 = vrot.lane.b32.xlu1 %v6452_v57, %s6225_s21 }
 0x348   :  { %v394_v61 = vpop.permute.xlu0 %393 }
 0x349   :  { %5395 = vmatprep.subr.msk.mxu1 %vm395_vm2, %v394_v61 }
 0x34a   :  { %5396 = vmatpush3.xpose.msk.msra.mxu1 %vm395_vm2, %v394_v61  ;;  %v392_v62 = vpop.permute.xlu1 %391 }
 0x34b   :  { %5397 = vmatprep.subr.msk.mxu1 %vm395_vm2, %v392_v62 }
 0x34c   :  { %v386_v63 = vpop.permute.xlu0 %385 }
 0x34e   :  { %5398 = vmatpush3.xpose.msk.msra.mxu1 %vm395_vm2, %v392_v62  ;;  %v390_v0 = vpop.permute.xlu1 %389 }
 0x34f   :  { %5399 = vmatprep.subr.msk.mxu1 %vm395_vm2, %v390_v0 }
 0x350   :  { %v593_v1 = vpop.permute.xlu0 %592 }
 0x351   :  { %5416 = vmatprep.subr.mxu0 %v593_v1 }
 0x352   :  { %5400 = vmatpush3.xpose.msk.msra.mxu1 %vm395_vm2, %v390_v0  ;;  %5417 = vmatpush3.msra.mxu0 %v593_v1  ;;  %v388_v2 = vpop.permute.xlu1 %387 }
 0x353   :  { %5401 = vmatprep.subr.msk.mxu1 %vm395_vm2, %v388_v2 }
 0x354   :  { %v589_v8 = vpop.permute.xlu0 %588 }
 0x356   :  { %5402 = vmatpush3.xpose.msk.msra.mxu1 %vm395_vm2, %v388_v2  ;;  %v384_v3 = vpop.permute.xlu1 %383 }
 0x357   :  { %5403 = vmatprep.subr.msk.mxu1 %vm395_vm2, %v386_v63 }
 0x358   :  { %v6510_v9 = vpop.permute.xlu0 %735 }
 0x35a   :  { %5404 = vmatpush3.xpose.msk.msra.mxu1 %vm395_vm2, %v386_v63  ;;  %v587_v4 = vpop.permute.xlu1 %586 }
 0x35b   :  { %5405 = vmatprep.subr.msk.mxu1 %vm395_vm2, %v384_v3 }
 0x35e   :  { %5406 = vmatpush3.xpose.msk.msra.mxu1 %vm395_vm2, %v384_v3  ;;  %v585_v5 = vpop.permute.xlu1 %584 }
 0x361   :  { %5408 = vmatmul.mubr.msk.f32.vlgmr.msra.gmra.mxu1 %vm395_vm2, %v6456_v58 }
 0x362   :  { %5410 = vmatprep.mubr.msk.f32.mxu1 %vm395_vm2, %v6466_v60  ;;  %v583_v6 = vpop.permute.xlu1 %582 }
 0x365   :  { %5411 = vmatmul.mubr.msk.f32.gmra.mxu1 %vm395_vm2, %v6460_v59 }
 0x366   :  { %5413 = vmatprep.mubr.msk.f32.mxu1 %vm395_vm2, %v6452_v57  ;;  %v591_v7 = vpop.permute.xlu1 %590 }
 0x367   :  { %5418 = vmatprep.subr.mxu0 %v591_v7 }
 0x368   :  { %5419 = vmatpush3.msra.mxu0 %v591_v7 }
 0x369   :  { %5414 = vmatmul.mubr.msk.f32.gmra.mxu1 %vm395_vm2, %v6450_v55  ;;  %5420 = vmatprep.subr.mxu0 %v589_v8 }
 0x36a   :  { %5421 = vmatpush3.msra.mxu0 %v589_v8  ;;  %v6560_v41 = vpop.permute.xlu1 %733 }
 0x36b   :  { %5422 = vmatprep.subr.mxu0 %v587_v4 }
 0x36c   :  { %5423 = vmatpush3.msra.mxu0 %v587_v4 }
 0x36d   :  { %5424 = vmatprep.subr.mxu0 %v585_v5 }
 0x36e   :  { %5425 = vmatpush3.msra.mxu0 %v585_v5 }
 0x36f   :  { %5426 = vmatprep.subr.mxu0 %v583_v6 }
 0x370   :  { %5427 = vmatpush3.msra.mxu0 %v583_v6 }
 0x371   :  { %5437 = vmatprep.subr.msk.mxu0 %vm395_vm2, %v6510_v9 }
 0x421   :  { %v5409_v11 = vpop.f32.mrf.mxu1 }
 0x422   :  { %v492_v13 = vadd.f32 %v5409_v11, %v6517_v10 }
 0x423   :  { %v486_v14 = vpop.f32.mrf.mxu1 }
 0x424   :  { %v487_v16 = vadd.f32 %v486_v14, %v6522_v12  ;;  %v519_v17 = vsel %vm515_vm3, %v492_v13, -inf }
 0x425   :  { %520 = vmax.xlane.f32.xlu1 %v519_v17  ;;  %v5412_v19 = vpop.f32.mrf.mxu1 }
 0x426   :  { %v502_v20 = vadd.f32 %v5412_v19, %v6528_v15  ;;  %v516_v22 = vsel %vm515_vm3, %v487_v16, -inf }
 0x427   :  { %v496_v23 = vpop.f32.mrf.mxu1  ;;  %517 = vmax.xlane.f32.xlu0 %v516_v22 }
 0x428   :  { %v497_v29 = vadd.f32 %v496_v23, %v6537_v24  ;;  %v525_v31 = vsel %vm515_vm3, %v502_v20, -inf }
 0x429   :  { %v5415_v27 = vpop.f32.mrf.mxu1 }
 0x42a   :  { %v512_v30 = vadd.f32 %v5415_v27, %v6542_v26  ;;  %v522_v38 = vsel %vm515_vm3, %v497_v29, -inf }
 0x42b   :  { %v506_v32 = vpop.f32.mrf.mxu1  ;;  %526 = vmax.xlane.f32.xlu0 %v525_v31 }
 0x42c   :  { %v531_v36 = vsel %vm515_vm3, %v512_v30, -inf  ;;  %v507_v37 = vadd.f32 %v506_v32, %v6550_v35 }
 0x42d   :  { %532 = vmax.xlane.f32.xlu1 %v531_v36 }
 0x42e   :  { %v528_v39 = vsel %vm515_vm3, %v507_v37, -inf }
 0x42f   :  { %523 = vmax.xlane.f32.xlu0 %v522_v38 }
 0x433   :  { %529 = vmax.xlane.f32.xlu0 %v528_v39 }
 0x43e   :  { %729 = vrot.lane.b32.xlu1 %v6466_v60, %s6225_s21 }
 0x449   :  { %731 = vrot.lane.b32.xlu0 %v6460_v59, %s6225_s21 }
 0x4ae   :  { %v521_v42 = vpop.xlane.xlu1 %520 }
 0x4af   :  { %v535_v40 = vsub.f32 %v492_v13, %v521_v42 }
 0x4b0   :  { %v518_v43 = vpop.xlane.xlu0 %517 }
 0x4b1   :  { %v542_v44 = vmul.f32 1.442695, %v535_v40  ;;  %v534_v47 = vsub.f32 %v487_v16, %v518_v43 }
 0x4b3   :  { %5935 = vpow2.f32 %v542_v44  ;;  %v540_v48 = vmul.f32 1.442695, %v534_v47 }
 0x4b4   :  { %v527_v49 = vpop.xlane.xlu0 %526 }
 0x4b5   :  { %5937 = vpow2.f32 %v540_v48  ;;  %v537_v50 = vsub.f32 %v502_v20, %v527_v49 }
 0x4b6   :  { %v533_v7 = vpop.xlane.xlu1 %532 }
 0x4b7   :  { %v546_v52 = vmul.f32 1.442695, %v537_v50  ;;  %v539_v8 = vsub.f32 %v512_v30, %v533_v7 }
 0x4b8   :  { %v524_v53 = vpop.xlane.xlu0 %523 }
 0x4b9   :  { %5939 = vpow2.f32 %v546_v52  ;;  %v536_v54 = vsub.f32 %v497_v29, %v524_v53  ;;  %v550_v13 = vmul.f32 1.442695, %v539_v8 }
 0x4ba   :  { %v730_v20 = vpop.permute.xlu1 %729 }
 0x4bb   :  { %v544_v56 = vmul.f32 1.442695, %v536_v54 }
 0x4bc   :  { %v530_v5 = vpop.xlane.xlu0 %529 }
 0x4bd   :  { %5941 = vpow2.f32 %v544_v56  ;;  %v538_v6 = vsub.f32 %v507_v37, %v530_v5 }
 0x4bf   :  { %v548_v11 = vmul.f32 1.442695, %v538_v6 }
 0x4c0   :  { %v5936_v61 = vpop.eup %5935  ;;  %v732_v22 = vpop.permute.xlu0 %731 }
 0x4c1   :  { %v555_v62 = vsel %vm515_vm3, %v5936_v61, 0.0  ;;  %5943 = vpow2.f32 %v548_v11 }
 0x4c2   :  { %v5938_v63 = vpop.eup %5937  ;;  %556 = vadd.xlane.f32.xlu1 %v555_v62  ;;  %5945 = vpow2.f32 %v550_v13 }
 0x4c3   :  { %v552_v0 = vsel %vm515_vm3, %v5938_v63, 0.0 }
 0x4c4   :  { %553 = vadd.xlane.f32.xlu0 %v552_v0 }
 0x4c6   :  { %v5940_v1 = vpop.eup %5939 }
 0x4c7   :  { %v561_v2 = vsel %vm515_vm3, %v5940_v1, 0.0 }
 0x4c8   :  { %562 = vadd.xlane.f32.xlu1 %v561_v2 }
 0x4ca   :  { %v5942_v3 = vpop.eup %5941 }
 0x4cb   :  { %v558_v4 = vsel %vm515_vm3, %v5942_v3, 0.0 }
 0x4cc   :  { %559 = vadd.xlane.f32.xlu0 %v558_v4 }
 0x4ce   :  { %v6570_v14 = vpop.eup %5943 }
 0x4cf   :  { %v564_v16 = vsel %vm515_vm3, %v6570_v14, 0.0  ;;  %v6574_v17 = vpop.eup %5945 }
 0x4d0   :  { %v567_v19 = vsel %vm515_vm3, %v6574_v17, 0.0 }
 0x4d9   :  { %725 = vrot.lane.b32.xlu1 %v6446_v51, %s6225_s21 }
 0x4e2   :  { %727 = vrot.lane.b32.xlu0 %v6456_v58, %s6225_s21 }
 0x4fd   :  { %565 = vadd.xlane.f32.xlu1 %v564_v16 }
 0x501   :  { %568 = vadd.xlane.f32.xlu0 %v567_v19 }
 0x50e   :  { %715 = vrot.lane.b32.xlu1 %v6456_v58, %s6226_s12 }
 0x512   :  { %719 = vrot.lane.b32.xlu1 %v6460_v59, %s6226_s12 }
 0x516   :  { %723 = vrot.lane.b32.xlu1 %v6450_v55, %s6226_s12 }
 0x517   :  { %713 = vrot.lane.b32.xlu0 %v6446_v51, %s6226_s12 }
 0x51a   :  { %930 = vrot.lane.b32.xlu1 %v6452_v57, %s6227_s13 }
 0x51b   :  { %717 = vrot.lane.b32.xlu0 %v6466_v60, %s6226_s12 }
 0x51e   :  { %926 = vrot.lane.b32.xlu1 %v6466_v60, %s6227_s13 }
 0x51f   :  { %721 = vrot.lane.b32.xlu0 %v6452_v57, %s6226_s12 }
 0x522   :  { %924 = vrot.lane.b32.xlu1 %v6456_v58, %s6227_s13 }
 0x523   :  { %932 = vrot.lane.b32.xlu0 %v6450_v55, %s6227_s13 }
 0x526   :  { %922 = vrot.lane.b32.xlu1 %v6446_v51, %s6227_s13 }
 0x527   :  { %928 = vrot.lane.b32.xlu0 %v6460_v59, %s6227_s13 }
 0x52a   :  { %1073 = vrot.lane.b32.xlu1 %v6452_v57, %s6228_s14 }
 0x52b   :  { %1075 = vrot.lane.b32.xlu0 %v6450_v55, %s6228_s14 }
 0x54b   :  { %v557_v23 = vpop.xlane.xlu1 %556 }
 0x54c   :  { %5947 = vrcp.f32 %v557_v23 }
 0x54d   :  { %v554_v27 = vpop.xlane.xlu0 %553 }
 0x54e   :  { %5949 = vrcp.f32 %v554_v27 }
 0x551   :  { %v563_v29 = vpop.xlane.xlu1 %562 }
 0x552   :  { %5951 = vrcp.f32 %v563_v29 }
 0x555   :  { %v560_v30 = vpop.xlane.xlu0 %559  ;;  %v726_v43 = vpop.permute.xlu1 %725 }
 0x556   :  { %5953 = vrcp.f32 %v560_v30 }
 0x559   :  { %v5948_v31 = vpop.eup %5947 }
 0x55a   :  { %v577_v37 = vmul.f32 %v5948_v31, %v5936_v61 }
 0x55b   :  { %v5950_v32 = vpop.eup %5949 }
 0x55c   :  { %v576_v36 = vmul.f32 %v5950_v32, %v5938_v63 }
 0x55e   :  { %5428 = vmatprep.mubr.msk.f32.mxu0 %vm515_vm3, %v576_v36 }
 0x55f   :  { %5429 = vmatmul.mubr.msk.f32.vlgmr.msra.gmra.mxu0 %vm515_vm3, %v577_v37  ;;  %v5952_v38 = vpop.eup %5951 }
 0x560   :  { %5438 = vmatpush3.xpose.msk.msra.mxu0 %vm395_vm2, %v6510_v9  ;;  %v579_v40 = vmul.f32 %v5952_v38, %v5940_v1  ;;  %v728_v9 = vpop.permute.xlu0 %727 }
 0x561   :  { %5439 = vmatprep.subr.msk.mxu0 %vm395_vm2, %v6560_v41 }
 0x563   :  { %v5954_v39 = vpop.eup %5953 }
 0x564   :  { %5440 = vmatpush3.xpose.msk.msra.mxu0 %vm395_vm2, %v6560_v41  ;;  %v578_v42 = vmul.f32 %v5954_v39, %v5942_v3 }
 0x565   :  { %5441 = vmatprep.subr.msk.mxu0 %vm395_vm2, %v732_v22 }
 0x566   :  { %5431 = vmatprep.mubr.msk.f32.mxu0 %vm515_vm3, %v578_v42 }
 0x567   :  { %5432 = vmatmul.mubr.msk.f32.gmra.mxu0 %vm515_vm3, %v579_v40 }
 0x568   :  { %5442 = vmatpush3.xpose.msk.msra.mxu0 %vm395_vm2, %v732_v22 }
 0x569   :  { %5443 = vmatprep.subr.msk.mxu0 %vm395_vm2, %v730_v20 }
 0x56c   :  { %5444 = vmatpush3.xpose.msk.msra.mxu0 %vm395_vm2, %v730_v20 }
 0x56d   :  { %5445 = vmatprep.subr.msk.mxu0 %vm395_vm2, %v728_v9 }
 0x570   :  { %5446 = vmatpush3.xpose.msk.msra.mxu0 %vm395_vm2, %v728_v9 }
 0x571   :  { %5447 = vmatprep.subr.msk.mxu0 %vm395_vm2, %v726_v43 }
 0x574   :  { %5448 = vmatpush3.xpose.msk.msra.mxu0 %vm395_vm2, %v726_v43 }
 0x586   :  { %v566_v41 = vpop.xlane.xlu1 %565 }
 0x587   :  { %5955 = vrcp.f32 %v566_v41 }
 0x58a   :  { %v569_v44 = vpop.xlane.xlu0 %568  ;;  %v716_v47 = vpop.permute.xlu1 %715 }
 0x58b   :  { %5957 = vrcp.f32 %v569_v44 }
 0x58e   :  { %v714_v48 = vpop.permute.xlu0 %713  ;;  %v720_v49 = vpop.permute.xlu1 %719 }
 0x592   :  { %v718_v50 = vpop.permute.xlu0 %717  ;;  %v724_v52 = vpop.permute.xlu1 %723 }
 0x594   :  { %v5956_v53 = vpop.eup %5955 }
 0x595   :  { %v580_v54 = vmul.f32 %v5956_v53, %v6570_v14 }
 0x596   :  { %v722_v56 = vpop.permute.xlu0 %721  ;;  %v931_v61 = vpop.permute.xlu1 %930 }
 0x597   :  { %5434 = vmatprep.mubr.msk.f32.mxu0 %vm515_vm3, %v580_v54 }
 0x598   :  { %v5958_v62 = vpop.eup %5957 }
 0x599   :  { %v581_v63 = vmul.f32 %v5958_v62, %v6574_v17 }
 0x59a   :  { %v933_v0 = vpop.permute.xlu0 %932  ;;  %v927_v1 = vpop.permute.xlu1 %926 }
 0x59b   :  { %5435 = vmatmul.mubr.msk.f32.gmra.mxu0 %vm515_vm3, %v581_v63  ;;  %5458 = vmatprep.subr.mxu1 %v933_v0 }
 0x59c   :  { %5449 = vmatprep.mubr.msk.f32.mxu0 %vm395_vm2, %v714_v48  ;;  %5459 = vmatpush3.msra.mxu1 %v933_v0 }
 0x59d   :  { %5460 = vmatprep.subr.mxu1 %v931_v61 }
 0x59e   :  { %v929_v2 = vpop.permute.xlu0 %928  ;;  %5461 = vmatpush3.msra.mxu1 %v931_v61  ;;  %v925_v3 = vpop.permute.xlu1 %924 }
 0x59f   :  { %5450 = vmatmul.mubr.msk.f32.vlgmr.msra.gmra.mxu0 %vm395_vm2, %v716_v47  ;;  %5462 = vmatprep.subr.mxu1 %v929_v2 }
 0x5a0   :  { %5452 = vmatprep.mubr.msk.f32.mxu0 %vm395_vm2, %v718_v50  ;;  %5463 = vmatpush3.msra.mxu1 %v929_v2 }
 0x5a1   :  { %5464 = vmatprep.subr.mxu1 %v927_v1 }
 0x5a2   :  { %5465 = vmatpush3.msra.mxu1 %v927_v1  ;;  %v923_v4 = vpop.permute.xlu1 %922  ;;  %v6633_v5 = vpop.permute.xlu0 %1075 }
 0x5a3   :  { %5453 = vmatmul.mubr.msk.f32.gmra.mxu0 %vm395_vm2, %v720_v49  ;;  %5466 = vmatprep.subr.mxu1 %v925_v3 }
 0x5a4   :  { %5455 = vmatprep.mubr.msk.f32.mxu0 %vm395_vm2, %v722_v56  ;;  %5467 = vmatpush3.msra.mxu1 %v925_v3 }
 0x5a5   :  { %5468 = vmatprep.subr.mxu1 %v923_v4 }
 0x5a6   :  { %5469 = vmatpush3.msra.mxu1 %v923_v4  ;;  %v6666_v43 = vpop.permute.xlu1 %1073 }
 0x5a7   :  { %5456 = vmatmul.mubr.msk.f32.gmra.mxu0 %vm395_vm2, %v724_v52  ;;  %5479 = vmatprep.subr.msk.mxu1 %vm395_vm2, %v6633_v5 }
 0x61f   :  { %v6638_v6 = vpop.f32.mrf.mxu0 }
 0x621   :  { %v6640_v7 = vpop.f32.mrf.mxu0 }
 0x627   :  { %v6642_v8 = vpop.f32.mrf.mxu0 }
 0x629   :  { %v6644_v11 = vpop.f32.mrf.mxu0 }
 0x65b   :  { %v6646_v13 = vpop.f32.mrf.mxu0 }
 0x65d   :  { %v6648_v14 = vpop.f32.mrf.mxu0 }
 0x65f   :  { %v5451_v16 = vpop.f32.mrf.mxu0 }
 0x660   :  { %v833_v17 = vadd.f32 %v5451_v16, %v6517_v10 }
 0x661   :  { %v827_v19 = vpop.f32.mrf.mxu0 }
 0x662   :  { %v828_v20 = vadd.f32 %v827_v19, %v6522_v12  ;;  %v859_v22 = vsel %vm515_vm3, %v833_v17, -inf }
 0x663   :  { %860 = vmax.xlane.f32.xlu1 %v859_v22  ;;  %v5454_v23 = vpop.f32.mrf.mxu0 }
 0x664   :  { %v843_v27 = vadd.f32 %v5454_v23, %v6528_v15  ;;  %v856_v29 = vsel %vm515_vm3, %v828_v20, -inf }
 0x665   :  { %857 = vmax.xlane.f32.xlu0 %v856_v29  ;;  %v837_v30 = vpop.f32.mrf.mxu0 }
 0x666   :  { %v838_v32 = vadd.f32 %v837_v30, %v6537_v24  ;;  %v865_v37 = vsel %vm515_vm3, %v843_v27, -inf }
 0x667   :  { %v5457_v31 = vpop.f32.mrf.mxu0 }
 0x668   :  { %v853_v36 = vadd.f32 %v5457_v31, %v6542_v26  ;;  %v862_v40 = vsel %vm515_vm3, %v838_v32, -inf }
 0x669   :  { %866 = vmax.xlane.f32.xlu0 %v865_v37  ;;  %v847_v38 = vpop.f32.mrf.mxu0 }
 0x66a   :  { %v871_v39 = vsel %vm515_vm3, %v853_v36, -inf  ;;  %v848_v42 = vadd.f32 %v847_v38, %v6550_v35 }
 0x66b   :  { %872 = vmax.xlane.f32.xlu1 %v871_v39 }
 0x66c   :  { %v868_v9 = vsel %vm515_vm3, %v848_v42, -inf }
 0x66d   :  { %863 = vmax.xlane.f32.xlu0 %v862_v40 }
 0x671   :  { %869 = vmax.xlane.f32.xlu0 %v868_v9 }
 0x67c   :  { %1069 = vrot.lane.b32.xlu1 %v6466_v60, %s6228_s14 }
 0x687   :  { %1071 = vrot.lane.b32.xlu0 %v6460_v59, %s6228_s14 }
 0x6ec   :  { %v861_v41 = vpop.xlane.xlu1 %860 }
 0x6ed   :  { %v875_v44 = vsub.f32 %v833_v17, %v861_v41 }
 0x6ee   :  { %v858_v47 = vpop.xlane.xlu0 %857 }
 0x6ef   :  { %v882_v48 = vmul.f32 1.442695, %v875_v44  ;;  %v874_v49 = vsub.f32 %v828_v20, %v858_v47 }
 0x6f1   :  { %5959 = vpow2.f32 %v882_v48  ;;  %v880_v50 = vmul.f32 1.442695, %v874_v49 }
 0x6f2   :  { %v867_v52 = vpop.xlane.xlu0 %866 }
 0x6f3   :  { %5961 = vpow2.f32 %v880_v50  ;;  %v877_v53 = vsub.f32 %v843_v27, %v867_v52 }
 0x6f4   :  { %v873_v22 = vpop.xlane.xlu1 %872 }
 0x6f5   :  { %v886_v54 = vmul.f32 1.442695, %v877_v53  ;;  %v879_v23 = vsub.f32 %v853_v36, %v873_v22 }
 0x6f6   :  { %v864_v56 = vpop.xlane.xlu0 %863 }
 0x6f7   :  { %5963 = vpow2.f32 %v886_v54  ;;  %v876_v61 = vsub.f32 %v838_v32, %v864_v56  ;;  %v890_v29 = vmul.f32 1.442695, %v879_v23 }
 0x6f8   :  { %v1070_v36 = vpop.permute.xlu1 %1069 }
 0x6f9   :  { %v884_v62 = vmul.f32 1.442695, %v876_v61 }
 0x6fa   :  { %v870_v19 = vpop.xlane.xlu0 %869 }
 0x6fb   :  { %5965 = vpow2.f32 %v884_v62  ;;  %v878_v20 = vsub.f32 %v848_v42, %v870_v19 }
 0x6fd   :  { %v888_v27 = vmul.f32 1.442695, %v878_v20 }
 0x6fe   :  { %v5960_v63 = vpop.eup %5959  ;;  %v1072_v38 = vpop.permute.xlu0 %1071 }
 0x6ff   :  { %v895_v0 = vsel %vm515_vm3, %v5960_v63, 0.0  ;;  %5967 = vpow2.f32 %v888_v27 }
 0x700   :  { %v5962_v1 = vpop.eup %5961  ;;  %896 = vadd.xlane.f32.xlu1 %v895_v0  ;;  %5969 = vpow2.f32 %v890_v29 }
 0x701   :  { %v892_v2 = vsel %vm515_vm3, %v5962_v1, 0.0 }
 0x702   :  { %893 = vadd.xlane.f32.xlu0 %v892_v2 }
 0x704   :  { %v5964_v3 = vpop.eup %5963 }
 0x705   :  { %v901_v4 = vsel %vm515_vm3, %v5964_v3, 0.0 }
 0x706   :  { %902 = vadd.xlane.f32.xlu1 %v901_v4 }
 0x708   :  { %v5966_v16 = vpop.eup %5965 }
 0x709   :  { %v898_v17 = vsel %vm515_vm3, %v5966_v16, 0.0 }
 0x70a   :  { %899 = vadd.xlane.f32.xlu0 %v898_v17 }
 0x70c   :  { %v6676_v30 = vpop.eup %5967 }
 0x70d   :  { %v904_v31 = vsel %vm515_vm3, %v6676_v30, 0.0  ;;  %v6680_v32 = vpop.eup %5969 }
 0x70e   :  { %v907_v37 = vsel %vm515_vm3, %v6680_v32, 0.0 }
 0x717   :  { %1065 = vrot.lane.b32.xlu1 %v6446_v51, %s6228_s14 }
 0x720   :  { %1067 = vrot.lane.b32.xlu0 %v6456_v58, %s6228_s14 }
 0x73b   :  { %905 = vadd.xlane.f32.xlu1 %v904_v31 }
 0x73f   :  { %908 = vadd.xlane.f32.xlu0 %v907_v37 }
 0x74c   :  { %1055 = vrot.lane.b32.xlu1 %v6456_v58, %s6229_s15 }
 0x750   :  { %1059 = vrot.lane.b32.xlu1 %v6460_v59, %s6229_s15 }
 0x754   :  { %1063 = vrot.lane.b32.xlu1 %v6450_v55, %s6229_s15 }
 0x755   :  { %1053 = vrot.lane.b32.xlu0 %v6446_v51, %s6229_s15 }
 0x758   :  { %1270 = vrot.lane.b32.xlu1 %v6452_v57, %s6230_s16 }
 0x759   :  { %1057 = vrot.lane.b32.xlu0 %v6466_v60, %s6229_s15 }
 0x75c   :  { %1266 = vrot.lane.b32.xlu1 %v6466_v60, %s6230_s16 }
 0x75d   :  { %1061 = vrot.lane.b32.xlu0 %v6452_v57, %s6229_s15 }
 0x760   :  { %1264 = vrot.lane.b32.xlu1 %v6456_v58, %s6230_s16 }
 0x761   :  { %1272 = vrot.lane.b32.xlu0 %v6450_v55, %s6230_s16 }
 0x764   :  { %1262 = vrot.lane.b32.xlu1 %v6446_v51, %s6230_s16 }
 0x765   :  { %1268 = vrot.lane.b32.xlu0 %v6460_v59, %s6230_s16 }
 0x768   :  { %1413 = vrot.lane.b32.xlu1 %v6452_v57, %s6231_s3 }
 0x769   :  { %1415 = vrot.lane.b32.xlu0 %v6450_v55, %s6231_s3 }
 0x789   :  { %v897_v39 = vpop.xlane.xlu1 %896 }
 0x78a   :  { %5971 = vrcp.f32 %v897_v39 }
 0x78b   :  { %v894_v42 = vpop.xlane.xlu0 %893 }
 0x78c   :  { %5973 = vrcp.f32 %v894_v42 }
 0x78f   :  { %v903_v40 = vpop.xlane.xlu1 %902 }
 0x790   :  { %5975 = vrcp.f32 %v903_v40 }
 0x793   :  { %v900_v9 = vpop.xlane.xlu0 %899  ;;  %v1066_v54 = vpop.permute.xlu1 %1065 }
 0x794   :  { %5977 = vrcp.f32 %v900_v9 }
 0x797   :  { %v5972_v41 = vpop.eup %5971 }
 0x798   :  { %v917_v48 = vmul.f32 %v5972_v41, %v5960_v63 }
 0x799   :  { %v5974_v44 = vpop.eup %5973 }
 0x79a   :  { %v916_v47 = vmul.f32 %v5974_v44, %v5962_v1 }
 0x79c   :  { %5470 = vmatprep.mubr.msk.f32.mxu1 %vm515_vm3, %v916_v47 }
 0x79d   :  { %5471 = vmatmul.mubr.msk.f32.vlgmr.msra.gmra.mxu1 %vm515_vm3, %v917_v48  ;;  %v5976_v49 = vpop.eup %5975 }
 0x79e   :  { %5480 = vmatpush3.xpose.msk.msra.mxu1 %vm395_vm2, %v6633_v5  ;;  %v919_v53 = vmul.f32 %v5976_v49, %v5964_v3  ;;  %v1068_v5 = vpop.permute.xlu0 %1067 }
 0x79f   :  { %5481 = vmatprep.subr.msk.mxu1 %vm395_vm2, %v6666_v43 }
 0x7a1   :  { %v5978_v50 = vpop.eup %5977 }
 0x7a2   :  { %5482 = vmatpush3.xpose.msk.msra.mxu1 %vm395_vm2, %v6666_v43  ;;  %v918_v52 = vmul.f32 %v5978_v50, %v5966_v16 }
 0x7a3   :  { %5483 = vmatprep.subr.msk.mxu1 %vm395_vm2, %v1072_v38 }
 0x7a4   :  { %5473 = vmatprep.mubr.msk.f32.mxu1 %vm515_vm3, %v918_v52 }
 0x7a5   :  { %5474 = vmatmul.mubr.msk.f32.gmra.mxu1 %vm515_vm3, %v919_v53 }
 0x7a6   :  { %5484 = vmatpush3.xpose.msk.msra.mxu1 %vm395_vm2, %v1072_v38 }
 0x7a7   :  { %5485 = vmatprep.subr.msk.mxu1 %vm395_vm2, %v1070_v36 }
 0x7aa   :  { %5486 = vmatpush3.xpose.msk.msra.mxu1 %vm395_vm2, %v1070_v36 }
 0x7ab   :  { %5487 = vmatprep.subr.msk.mxu1 %vm395_vm2, %v1068_v5 }
 0x7ae   :  { %5488 = vmatpush3.xpose.msk.msra.mxu1 %vm395_vm2, %v1068_v5 }
 0x7af   :  { %5489 = vmatprep.subr.msk.mxu1 %vm395_vm2, %v1066_v54 }
 0x7b2   :  { %5490 = vmatpush3.xpose.msk.msra.mxu1 %vm395_vm2, %v1066_v54 }
 0x7c4   :  { %v906_v43 = vpop.xlane.xlu1 %905 }
 0x7c5   :  { %5979 = vrcp.f32 %v906_v43 }
 0x7c8   :  { %v909_v56 = vpop.xlane.xlu0 %908  ;;  %v1056_v61 = vpop.permute.xlu1 %1055 }
 0x7c9   :  { %5981 = vrcp.f32 %v909_v56 }
 0x7cc   :  { %v1054_v62 = vpop.permute.xlu0 %1053  ;;  %v1060_v63 = vpop.permute.xlu1 %1059 }
 0x7d0   :  { %v1058_v0 = vpop.permute.xlu0 %1057  ;;  %v1064_v1 = vpop.permute.xlu1 %1063 }
 0x7d2   :  { %v5980_v2 = vpop.eup %5979 }
 0x7d3   :  { %v920_v3 = vmul.f32 %v5980_v2, %v6676_v30 }
 0x7d4   :  { %v1062_v4 = vpop.permute.xlu0 %1061  ;;  %v1271_v16 = vpop.permute.xlu1 %1270 }
 0x7d5   :  { %5476 = vmatprep.mubr.msk.f32.mxu1 %vm515_vm3, %v920_v3 }
 0x7d6   :  { %v5982_v17 = vpop.eup %5981 }
 0x7d7   :  { %v921_v19 = vmul.f32 %v5982_v17, %v6680_v32 }
 0x7d8   :  { %v1273_v20 = vpop.permute.xlu0 %1272  ;;  %v1267_v22 = vpop.permute.xlu1 %1266 }
 0x7d9   :  { %5477 = vmatmul.mubr.msk.f32.gmra.mxu1 %vm515_vm3, %v921_v19  ;;  %5500 = vmatprep.subr.mxu0 %v1273_v20 }
 0x7da   :  { %5491 = vmatprep.mubr.msk.f32.mxu1 %vm395_vm2, %v1054_v62  ;;  %5501 = vmatpush3.msra.mxu0 %v1273_v20 }
 0x7db   :  { %5502 = vmatprep.subr.mxu0 %v1271_v16 }
 0x7dc   :  { %v1269_v23 = vpop.permute.xlu0 %1268  ;;  %5503 = vmatpush3.msra.mxu0 %v1271_v16  ;;  %v1265_v27 = vpop.permute.xlu1 %1264 }
 0x7dd   :  { %5492 = vmatmul.mubr.msk.f32.vlgmr.msra.gmra.mxu1 %vm395_vm2, %v1056_v61  ;;  %5504 = vmatprep.subr.mxu0 %v1269_v23 }
 0x7de   :  { %5494 = vmatprep.mubr.msk.f32.mxu1 %vm395_vm2, %v1058_v0  ;;  %5505 = vmatpush3.msra.mxu0 %v1269_v23 }
 0x7df   :  { %5506 = vmatprep.subr.mxu0 %v1267_v22 }
 0x7e0   :  { %5507 = vmatpush3.msra.mxu0 %v1267_v22  ;;  %v1263_v29 = vpop.permute.xlu1 %1262  ;;  %v6739_v30 = vpop.permute.xlu0 %1415 }
 0x7e1   :  { %5495 = vmatmul.mubr.msk.f32.gmra.mxu1 %vm395_vm2, %v1060_v63  ;;  %5508 = vmatprep.subr.mxu0 %v1265_v27 }
 0x7e2   :  { %5497 = vmatprep.mubr.msk.f32.mxu1 %vm395_vm2, %v1062_v4  ;;  %5509 = vmatpush3.msra.mxu0 %v1265_v27 }
 0x7e3   :  { %5510 = vmatprep.subr.mxu0 %v1263_v29 }
 0x7e4   :  { %5511 = vmatpush3.msra.mxu0 %v1263_v29  ;;  %v6772_v0 = vpop.permute.xlu1 %1413 }
 0x7e5   :  { %5498 = vmatmul.mubr.msk.f32.gmra.mxu1 %vm395_vm2, %v1064_v1  ;;  %5521 = vmatprep.subr.msk.mxu0 %vm395_vm2, %v6739_v30 }
 0x85d   :  { %v6744_v31 = vpop.f32.mrf.mxu1 }
 0x85f   :  { %v6746_v32 = vpop.f32.mrf.mxu1 }
 0x865   :  { %v6748_v37 = vpop.f32.mrf.mxu1 }
 0x867   :  { %v6750_v36 = vpop.f32.mrf.mxu1 }
 0x899   :  { %v6752_v38 = vpop.f32.mrf.mxu1 }
 0x89b   :  { %v6754_v39 = vpop.f32.mrf.mxu1 }
 0x89d   :  { %v5493_v42 = vpop.f32.mrf.mxu1 }
 0x89e   :  { %v1173_v40 = vadd.f32 %v5493_v42, %v6517_v10 }
 0x89f   :  { %v1167_v9 = vpop.f32.mrf.mxu1 }
 0x8a0   :  { %v1168_v41 = vadd.f32 %v1167_v9, %v6522_v12  ;;  %v1199_v44 = vsel %vm515_vm3, %v1173_v40, -inf }
 0x8a1   :  { %1200 = vmax.xlane.f32.xlu1 %v1199_v44  ;;  %v5496_v47 = vpop.f32.mrf.mxu1 }
 0x8a2   :  { %v1183_v48 = vadd.f32 %v5496_v47, %v6528_v15  ;;  %v1196_v49 = vsel %vm515_vm3, %v1168_v41, -inf }
 0x8a3   :  { %1197 = vmax.xlane.f32.xlu0 %v1196_v49  ;;  %v1177_v50 = vpop.f32.mrf.mxu1 }
 0x8a4   :  { %v1178_v53 = vadd.f32 %v1177_v50, %v6537_v24  ;;  %v1205_v54 = vsel %vm515_vm3, %v1183_v48, -inf }
 0x8a5   :  { %v5499_v52 = vpop.f32.mrf.mxu1 }
 0x8a6   :  { %v1193_v5 = vadd.f32 %v5499_v52, %v6542_v26  ;;  %v1202_v62 = vsel %vm515_vm3, %v1178_v53, -inf }
 0x8a7   :  { %1206 = vmax.xlane.f32.xlu0 %v1205_v54  ;;  %v1187_v43 = vpop.f32.mrf.mxu1 }
 0x8a8   :  { %v1211_v56 = vsel %vm515_vm3, %v1193_v5, -inf  ;;  %v1188_v61 = vadd.f32 %v1187_v43, %v6550_v35 }
 0x8a9   :  { %1212 = vmax.xlane.f32.xlu1 %v1211_v56 }
 0x8aa   :  { %v1208_v63 = vsel %vm515_vm3, %v1188_v61, -inf }
 0x8ab   :  { %1203 = vmax.xlane.f32.xlu0 %v1202_v62 }
 0x8af   :  { %1209 = vmax.xlane.f32.xlu0 %v1208_v63 }
 0x8ba   :  { %1409 = vrot.lane.b32.xlu1 %v6466_v60, %s6231_s3 }
 0x8c5   :  { %1411 = vrot.lane.b32.xlu0 %v6460_v59, %s6231_s3 }
 0x92a   :  { %v1201_v1 = vpop.xlane.xlu1 %1200 }
 0x92b   :  { %v1215_v2 = vsub.f32 %v1173_v40, %v1201_v1 }
 0x92c   :  { %v1198_v3 = vpop.xlane.xlu0 %1197 }
 0x92d   :  { %v1222_v4 = vmul.f32 1.442695, %v1215_v2  ;;  %v1214_v16 = vsub.f32 %v1168_v41, %v1198_v3 }
 0x92f   :  { %5983 = vpow2.f32 %v1222_v4  ;;  %v1220_v17 = vmul.f32 1.442695, %v1214_v16 }
 0x930   :  { %v1207_v19 = vpop.xlane.xlu0 %1206 }
 0x931   :  { %5985 = vpow2.f32 %v1220_v17  ;;  %v1217_v20 = vsub.f32 %v1183_v48, %v1207_v19 }
 0x933   :  { %v1226_v22 = vmul.f32 1.442695, %v1217_v20 }
 0x934   :  { %v1204_v23 = vpop.xlane.xlu0 %1203 }
 0x935   :  { %5987 = vpow2.f32 %v1226_v22  ;;  %v1216_v27 = vsub.f32 %v1178_v53, %v1204_v23  ;;  %v1213_v53 = vpop.xlane.xlu1 %1212 }
 0x936   :  { %v1219_v54 = vsub.f32 %v1193_v5, %v1213_v53 }
 0x937   :  { %v1224_v29 = vmul.f32 1.442695, %v1216_v27 }
 0x938   :  { %v1210_v50 = vpop.xlane.xlu0 %1209  ;;  %v1230_v56 = vmul.f32 1.442695, %v1219_v54 }
 0x939   :  { %5989 = vpow2.f32 %v1224_v29  ;;  %v1218_v52 = vsub.f32 %v1188_v61, %v1210_v50  ;;  %v1410_v5 = vpop.permute.xlu1 %1409 }
 0x93b   :  { %v1228_v43 = vmul.f32 1.442695, %v1218_v52 }
 0x93c   :  { %v5984_v42 = vpop.eup %5983  ;;  %v1412_v61 = vpop.permute.xlu0 %1411 }
 0x93d   :  { %v1235_v9 = vsel %vm515_vm3, %v5984_v42, 0.0  ;;  %5991 = vpow2.f32 %v1228_v43 }
 0x93e   :  { %v5986_v44 = vpop.eup %5985  ;;  %1236 = vadd.xlane.f32.xlu1 %v1235_v9  ;;  %5993 = vpow2.f32 %v1230_v56 }
 0x93f   :  { %v1232_v40 = vsel %vm515_vm3, %v5986_v44, 0.0 }
 0x940   :  { %1233 = vadd.xlane.f32.xlu0 %v1232_v40 }
 0x942   :  { %v5988_v41 = vpop.eup %5987 }
 0x943   :  { %v1241_v47 = vsel %vm515_vm3, %v5988_v41, 0.0 }
 0x944   :  { %1242 = vadd.xlane.f32.xlu1 %v1241_v47 }
 0x946   :  { %v5990_v49 = vpop.eup %5989 }
 0x947   :  { %v1238_v48 = vsel %vm515_vm3, %v5990_v49, 0.0 }
 0x948   :  { %1239 = vadd.xlane.f32.xlu0 %v1238_v48 }
 0x94a   :  { %v5992_v62 = vpop.eup %5991 }
 0x94b   :  { %v1244_v63 = vsel %vm515_vm3, %v5992_v62, 0.0  ;;  %v5994_v1 = vpop.eup %5993 }
 0x94c   :  { %v1247_v2 = vsel %vm515_vm3, %v5994_v1, 0.0 }
 0x955   :  { %1405 = vrot.lane.b32.xlu1 %v6446_v51, %s6231_s3 }
 0x95e   :  { %1407 = vrot.lane.b32.xlu0 %v6456_v58, %s6231_s3 }
 0x979   :  { %1245 = vadd.xlane.f32.xlu1 %v1244_v63 }
 0x97d   :  { %1248 = vadd.xlane.f32.xlu0 %v1247_v2 }
 0x98a   :  { %1395 = vrot.lane.b32.xlu1 %v6456_v58, %s6232_s17 }
 0x98e   :  { %1399 = vrot.lane.b32.xlu1 %v6460_v59, %s6232_s17 }
 0x992   :  { %1403 = vrot.lane.b32.xlu1 %v6450_v55, %s6232_s17 }
 0x993   :  { %1393 = vrot.lane.b32.xlu0 %v6446_v51, %s6232_s17 }
 0x997   :  { %1397 = vrot.lane.b32.xlu0 %v6466_v60, %s6232_s17 }
 0x99b   :  { %1401 = vrot.lane.b32.xlu0 %v6452_v57, %s6232_s17 }
 0x9c7   :  { %v1237_v3 = vpop.xlane.xlu1 %1236 }
 0x9c8   :  { %5995 = vrcp.f32 %v1237_v3 }
 0x9c9   :  { %v1234_v4 = vpop.xlane.xlu0 %1233 }
 0x9ca   :  { %5997 = vrcp.f32 %v1234_v4 }
 0x9cd   :  { %v1243_v16 = vpop.xlane.xlu1 %1242 }
 0x9ce   :  { %5999 = vrcp.f32 %v1243_v16 }
 0x9d1   :  { %v1240_v17 = vpop.xlane.xlu0 %1239 }
 0x9d2   :  { %6001 = vrcp.f32 %v1240_v17 }
 0x9d5   :  { %v5996_v19 = vpop.eup %5995 }
 0x9d6   :  { %v1257_v23 = vmul.f32 %v5996_v19, %v5984_v42  ;;  %v1406_v42 = vpop.permute.xlu1 %1405 }
 0x9d7   :  { %v5998_v20 = vpop.eup %5997 }
 0x9d8   :  { %v1256_v22 = vmul.f32 %v5998_v20, %v5986_v44 }
 0x9da   :  { %5512 = vmatprep.mubr.msk.f32.mxu0 %vm515_vm3, %v1256_v22 }
 0x9db   :  { %5513 = vmatmul.mubr.msk.f32.vlgmr.msra.gmra.mxu0 %vm515_vm3, %v1257_v23  ;;  %v6000_v27 = vpop.eup %5999 }
 0x9dc   :  { %5522 = vmatpush3.xpose.msk.msra.mxu0 %vm395_vm2, %v6739_v30  ;;  %v1259_v44 = vmul.f32 %v6000_v27, %v5988_v41  ;;  %v1408_v30 = vpop.permute.xlu0 %1407 }
 0x9dd   :  { %5523 = vmatprep.subr.msk.mxu0 %vm395_vm2, %v6772_v0 }
 0x9df   :  { %v6002_v29 = vpop.eup %6001 }
 0x9e0   :  { %5524 = vmatpush3.xpose.msk.msra.mxu0 %vm395_vm2, %v6772_v0  ;;  %v1258_v9 = vmul.f32 %v6002_v29, %v5990_v49 }
 0x9e1   :  { %5525 = vmatprep.subr.msk.mxu0 %vm395_vm2, %v1412_v61 }
 0x9e2   :  { %5515 = vmatprep.mubr.msk.f32.mxu0 %vm515_vm3, %v1258_v9 }
 0x9e3   :  { %5516 = vmatmul.mubr.msk.f32.gmra.mxu0 %vm515_vm3, %v1259_v44 }
 0x9e4   :  { %5526 = vmatpush3.xpose.msk.msra.mxu0 %vm395_vm2, %v1412_v61 }
 0x9e5   :  { %5527 = vmatprep.subr.msk.mxu0 %vm395_vm2, %v1410_v5 }
 0x9e8   :  { %5528 = vmatpush3.xpose.msk.msra.mxu0 %vm395_vm2, %v1410_v5 }
 0x9e9   :  { %5529 = vmatprep.subr.msk.mxu0 %vm395_vm2, %v1408_v30 }
 0x9ec   :  { %5530 = vmatpush3.xpose.msk.msra.mxu0 %vm395_vm2, %v1408_v30 }
 0x9ed   :  { %5531 = vmatprep.subr.msk.mxu0 %vm395_vm2, %v1406_v42 }
 0x9f0   :  { %5532 = vmatpush3.xpose.msk.msra.mxu0 %vm395_vm2, %v1406_v42 }
 0xa02   :  { %v1246_v0 = vpop.xlane.xlu1 %1245 }
 0xa03   :  { %6003 = vrcp.f32 %v1246_v0 }
 0xa06   :  { %v1249_v40 = vpop.xlane.xlu0 %1248  ;;  %v1396_v52 = vpop.permute.xlu1 %1395 }
 0xa07   :  { %6005 = vrcp.f32 %v1249_v40 }
 0xa0a   :  { %v1394_v49 = vpop.permute.xlu0 %1393  ;;  %v1400_v54 = vpop.permute.xlu1 %1399 }
 0xa0e   :  { %v1398_v53 = vpop.permute.xlu0 %1397  ;;  %v1404_v56 = vpop.permute.xlu1 %1403 }
 0xa10   :  { %v6004_v41 = vpop.eup %6003 }
 0xa11   :  { %v1260_v47 = vmul.f32 %v6004_v41, %v5992_v62 }
 0xa12   :  { %v1402_v43 = vpop.permute.xlu0 %1401 }
 0xa13   :  { %5518 = vmatprep.mubr.msk.f32.mxu0 %vm515_vm3, %v1260_v47 }
 0xa14   :  { %v6006_v48 = vpop.eup %6005 }
 0xa15   :  { %v1261_v50 = vmul.f32 %v6006_v48, %v5994_v1 }
 0xa17   :  { %5519 = vmatmul.mubr.msk.f32.gmra.mxu0 %vm515_vm3, %v1261_v50 }
 0xa18   :  { %5533 = vmatprep.mubr.msk.f32.mxu0 %vm395_vm2, %v1394_v49 }
 0xa1b   :  { %5534 = vmatmul.mubr.msk.f32.vlgmr.msra.gmra.mxu0 %vm395_vm2, %v1396_v52 }
 0xa1c   :  { %5536 = vmatprep.mubr.msk.f32.mxu0 %vm395_vm2, %v1398_v53 }
 0xa1f   :  { %5537 = vmatmul.mubr.msk.f32.gmra.mxu0 %vm395_vm2, %v1400_v54 }
 0xa20   :  { %5539 = vmatprep.mubr.msk.f32.mxu0 %vm395_vm2, %v1402_v43 }
 0xa23   :  { %5540 = vmatmul.mubr.msk.f32.gmra.mxu0 %vm395_vm2, %v1404_v56 }
 0xa9b   :  { %v6822_v62 = vpop.f32.mrf.mxu0 }
 0xa9d   :  { %v6824_v63 = vpop.f32.mrf.mxu0 }
 0xaa3   :  { %v6826_v1 = vpop.f32.mrf.mxu0 }
 0xaa5   :  { %v6828_v2 = vpop.f32.mrf.mxu0 }
 0xad7   :  { %v6830_v5 = vpop.f32.mrf.mxu0 }
 0xad9   :  { %v6832_v61 = vpop.f32.mrf.mxu0 }
 0xadb   :  { %v5535_v3 = vpop.f32.mrf.mxu0 }
 0xadc   :  { %v1513_v4 = vadd.f32 %v5535_v3, %v6517_v10 }
 0xadd   :  { %v1507_v16 = vpop.f32.mrf.mxu0 }
 0xade   :  { %v1508_v17 = vadd.f32 %v1507_v16, %v6522_v12  ;;  %v1539_v19 = vsel %vm515_vm3, %v1513_v4, -inf }
 0xadf   :  { %1540 = vmax.xlane.f32.xlu1 %v1539_v19  ;;  %v5538_v20 = vpop.f32.mrf.mxu0 }
 0xae0   :  { %v1523_v22 = vadd.f32 %v5538_v20, %v6528_v15  ;;  %v1536_v23 = vsel %vm515_vm3, %v1508_v17, -inf }
 0xae1   :  { %1537 = vmax.xlane.f32.xlu0 %v1536_v23  ;;  %v1517_v27 = vpop.f32.mrf.mxu0 }
 0xae2   :  { %v1518_v9 = vadd.f32 %v1517_v27, %v6537_v24  ;;  %v1545_v10 = vsel %vm515_vm3, %v1523_v22, -inf }
 0xae3   :  { %v5541_v29 = vpop.f32.mrf.mxu0 }
 0xae4   :  { %v1533_v44 = vadd.f32 %v5541_v29, %v6542_v26  ;;  %v1542_v15 = vsel %vm515_vm3, %v1518_v9, -inf }
 0xae5   :  { %1546 = vmax.xlane.f32.xlu0 %v1545_v10  ;;  %v1527_v30 = vpop.f32.mrf.mxu0 }
 0xae6   :  { %v1551_v12 = vsel %vm515_vm3, %v1533_v44, -inf  ;;  %v1528_v42 = vadd.f32 %v1527_v30, %v6550_v35 }
 0xae7   :  { %1552 = vmax.xlane.f32.xlu1 %v1551_v12 }
 0xae8   :  { %v1548_v0 = vsel %vm515_vm3, %v1528_v42, -inf }
 0xae9   :  { %1543 = vmax.xlane.f32.xlu0 %v1542_v15 }
 0xaed   :  { %1549 = vmax.xlane.f32.xlu0 %v1548_v0 }
 0xaf8   :  { %1610 = vrot.lane.b32.xlu1 %v6452_v57, %s6233_s18 }
 0xafc   :  { %1608 = vrot.lane.b32.xlu1 %v6460_v59, %s6233_s18 }
 0xb00   :  { %1606 = vrot.lane.b32.xlu1 %v6466_v60, %s6233_s18 }
 0xb03   :  { %1612 = vrot.lane.b32.xlu0 %v6450_v55, %s6233_s18 }
 0xb68   :  { %v1541_v24 = vpop.xlane.xlu1 %1540 }
 0xb69   :  { %v1555_v26 = vsub.f32 %v1513_v4, %v1541_v24 }
 0xb6a   :  { %v1538_v35 = vpop.xlane.xlu0 %1537 }
 0xb6b   :  { %v1562_v40 = vmul.f32 1.442695, %v1555_v26  ;;  %v1554_v41 = vsub.f32 %v1508_v17, %v1538_v35 }
 0xb6d   :  { %6007 = vpow2.f32 %v1562_v40  ;;  %v1560_v47 = vmul.f32 1.442695, %v1554_v41  ;;  %v1828_v41 = vld [vmem:[%s8053_s5 + $0x18] sm:$0xff] }
 0xb6e   :  { %v1547_v49 = vpop.xlane.xlu0 %1546 }
 0xb6f   :  { %6009 = vpow2.f32 %v1560_v47  ;;  %v1557_v48 = vsub.f32 %v1523_v22, %v1547_v49  ;;  %v1827_v47 = vld [vmem:[%s8053_s5 + $0x10] sm:$0xff]  ;;  %v1826_v49 = vld [vmem:[%s8053_s5 + $0x8] sm:$0xff] }
 0xb70   :  { %v1553_v57 = vpop.xlane.xlu1 %1552 }
 0xb71   :  { %v1566_v50 = vmul.f32 1.442695, %v1557_v48  ;;  %v1559_v52 = vsub.f32 %v1533_v44, %v1553_v57  ;;  %v1825_v48 = vld [vmem:[%s8053_s5] sm:$0xff] }
 0xb72   :  { %v1544_v59 = vpop.xlane.xlu0 %1543 }
 0xb73   :  { %6011 = vpow2.f32 %v1566_v50  ;;  %v1570_v53 = vmul.f32 1.442695, %v1559_v52  ;;  %v1556_v60 = vsub.f32 %v1518_v9, %v1544_v59 }
 0xb74   :  { %v1611_v54 = vpop.permute.xlu1 %1610 }
 0xb75   :  { %6013 = vpow2.f32 %v1570_v53  ;;  %v1564_v55 = vmul.f32 1.442695, %v1556_v60 }
 0xb76   :  { %v1550_v43 = vpop.xlane.xlu0 %1549 }
 0xb77   :  { %6015 = vpow2.f32 %v1564_v55  ;;  %v1558_v56 = vsub.f32 %v1528_v42, %v1550_v43 }
 0xb78   :  { %v1609_v16 = vpop.permute.xlu1 %1608 }
 0xb79   :  { %v1568_v3 = vmul.f32 1.442695, %v1558_v56 }
 0xb7a   :  { %v6854_v4 = vpop.eup %6007  ;;  %v1613_v17 = vpop.permute.xlu0 %1612 }
 0xb7b   :  { %6017 = vpow2.f32 %v1568_v3  ;;  %5542 = vmatprep.subr.mxu1 %v1613_v17  ;;  %v1575_v19 = vsel %vm515_vm3, %v6854_v4, 0.0 }
 0xb7c   :  { %v6010_v20 = vpop.eup %6009  ;;  %5543 = vmatpush3.msra.mxu1 %v1613_v17  ;;  %1576 = vadd.xlane.f32.xlu1 %v1575_v19  ;;  %v1607_v27 = vpop.permute.xlu1 %1606 }
 0xb7d   :  { %5544 = vmatprep.subr.mxu1 %v1611_v54  ;;  %v1572_v22 = vsel %vm515_vm3, %v6010_v20, 0.0 }
 0xb7e   :  { %1573 = vadd.xlane.f32.xlu0 %v1572_v22  ;;  %5545 = vmatpush3.msra.mxu1 %v1611_v54 }
 0xb7f   :  { %5546 = vmatprep.subr.mxu1 %v1609_v16 }
 0xb80   :  { %v6012_v23 = vpop.eup %6011  ;;  %5547 = vmatpush3.msra.mxu1 %v1609_v16 }
 0xb81   :  { %5548 = vmatprep.subr.mxu1 %v1607_v27  ;;  %v1581_v29 = vsel %vm515_vm3, %v6012_v23, 0.0 }
 0xb82   :  { %v6014_v9 = vpop.eup %6013  ;;  %1582 = vadd.xlane.f32.xlu1 %v1581_v29  ;;  %5549 = vmatpush3.msra.mxu1 %v1607_v27 }
 0xb83   :  { %v1587_v30 = vsel %vm515_vm3, %v6014_v9, 0.0 }
 0xb84   :  { %v6016_v44 = vpop.eup %6015 }
 0xb85   :  { %v1578_v10 = vsel %vm515_vm3, %v6016_v44, 0.0 }
 0xb86   :  { %1579 = vadd.xlane.f32.xlu0 %v1578_v10  ;;  %1588 = vadd.xlane.f32.xlu1 %v1587_v30 }
 0xb88   :  { %v6018_v12 = vpop.eup %6017 }
 0xb89   :  { %v1584_v42 = vsel %vm515_vm3, %v6018_v12, 0.0 }
 0xb8a   :  { %1585 = vadd.xlane.f32.xlu0 %v1584_v42 }
 0xb97   :  { %1602 = vrot.lane.b32.xlu1 %v6446_v51, %s6233_s18 }
 0xb9b   :  { %1741 = vrot.lane.b32.xlu1 %v6744_v31, %s6234_s22 }
 0xb9f   :  { %1765 = vrot.lane.b32.xlu1 %v6822_v62, %s6235_s23 }
 0xba0   :  { %1604 = vrot.lane.b32.xlu0 %v6456_v58, %s6233_s18 }
 0xba3   :  { %1745 = vrot.lane.b32.xlu1 %v6748_v37, %s6234_s22 }
 0xba4   :  { %1739 = vrot.lane.b32.xlu0 %v6746_v32, %s6234_s22 }
 0xba7   :  { %1769 = vrot.lane.b32.xlu1 %v6826_v1, %s6235_s23 }
 0xba8   :  { %1763 = vrot.lane.b32.xlu0 %v6824_v63, %s6235_s23 }
 0xbab   :  { %1749 = vrot.lane.b32.xlu1 %v6752_v38, %s6234_s22 }
 0xbac   :  { %1743 = vrot.lane.b32.xlu0 %v6750_v36, %s6234_s22 }
 0xbaf   :  { %1773 = vrot.lane.b32.xlu1 %v6830_v5, %s6235_s23 }
 0xbb0   :  { %1767 = vrot.lane.b32.xlu0 %v6828_v2, %s6235_s23 }
 0xbb4   :  { %1747 = vrot.lane.b32.xlu0 %v6754_v39, %s6234_s22 }
 0xbb8   :  { %1771 = vrot.lane.b32.xlu0 %v6832_v61, %s6235_s23 }
 0xc05   :  { %v1577_v51 = vpop.xlane.xlu1 %1576 }
 0xc07   :  { %v1574_v58 = vpop.xlane.xlu0 %1573 }
 0xc08   :  { %6019 = vrcp.f32 %v1574_v58 }
 0xc09   :  { %6021 = vrcp.f32 %v1577_v51 }
 0xc0b   :  { %v1583_v31 = vpop.xlane.xlu1 %1582 }
 0xc0c   :  { %6023 = vrcp.f32 %v1583_v31 }
 0xc0f   :  { %v1580_v32 = vpop.xlane.xlu0 %1579  ;;  %v1589_v37 = vpop.xlane.xlu1 %1588 }
 0xc10   :  { %6025 = vrcp.f32 %v1580_v32 }
 0xc11   :  { %6027 = vrcp.f32 %v1589_v37 }
 0xc13   :  { %v1586_v36 = vpop.xlane.xlu0 %1585  ;;  %v1603_v39 = vpop.permute.xlu1 %1602 }
 0xc14   :  { %6029 = vrcp.f32 %v1586_v36 }
 0xc15   :  { %v6020_v38 = vpop.eup %6019 }
 0xc16   :  { %v1596_v62 = vmul.f32 %v6020_v38, %v6010_v20  ;;  %v6022_v63 = vpop.eup %6021 }
 0xc17   :  { %v1605_v1 = vpop.permute.xlu0 %1604  ;;  %v1597_v2 = vmul.f32 %v6022_v63, %v6854_v4  ;;  %v1742_v54 = vpop.permute.xlu1 %1741 }
 0xc18   :  { %5550 = vmatprep.subr.mxu1 %v1605_v1  ;;  %5554 = vmatprep.mubr.msk.f32.mxu1 %vm515_vm3, %v1596_v62 }
 0xc19   :  { %5551 = vmatpush3.msra.mxu1 %v1605_v1  ;;  %v6024_v5 = vpop.eup %6023 }
 0xc1a   :  { %5552 = vmatprep.subr.mxu1 %v1603_v39  ;;  %v1599_v0 = vmul.f32 %v6024_v5, %v6012_v23  ;;  %v6950_v5 = vld [vmem:[%s8051_s9] sm:$0xf] }
 0xc1b   :  { %5553 = vmatpush3.msra.mxu1 %v1603_v39  ;;  %v1740_v55 = vpop.permute.xlu0 %1739  ;;  %v1766_v43 = vpop.permute.xlu1 %1765 }
 0xc1c   :  { %5555 = vmatmul.mubr.msk.f32.vlgmr.msra.gmra.mxu1 %vm515_vm3, %v1597_v2  ;;  %5563 = vmatprep.subr.mxu1 %v1828_v41  ;;  %v1805_v29 = vsel %vm395_vm2, %v6640_v7, %v1740_v55 }
 0xc1d   :  { %v6026_v61 = vpop.eup %6025  ;;  %5564 = vmatpush3.msra.mxu1 %v1828_v41 }
 0xc1e   :  { %v1598_v15 = vmul.f32 %v6026_v61, %v6016_v44  ;;  %v6028_v24 = vpop.eup %6027  ;;  %5565 = vmatprep.subr.mxu1 %v1827_v47 }
 0xc1f   :  { %v1601_v40 = vmul.f32 %v6028_v24, %v6014_v9  ;;  %5566 = vmatpush3.msra.mxu1 %v1827_v47  ;;  %v1764_v56 = vpop.permute.xlu0 %1763  ;;  %v1746_v3 = vpop.permute.xlu1 %1745  ;;  %v1806_v9 = vsel %vm395_vm2, %v6638_v6, %v1742_v54 }
 0xc20   :  { %5557 = vmatprep.mubr.msk.f32.mxu1 %vm515_vm3, %v1598_v15  ;;  %5567 = vmatprep.subr.mxu1 %v1826_v49  ;;  %v1812_v44 = vsel %vm1811_vm4, %v1805_v29, %v1764_v56  ;;  %v1813_v30 = vsel %vm1811_vm4, %v1806_v9, %v1766_v43  ;;  %v1808_v6 = vsel %vm395_vm2, %v6642_v8, %v1746_v3 }
 0xc21   :  { %v6030_v26 = vpop.eup %6029  ;;  %5558 = vmatmul.mubr.msk.f32.gmra.mxu1 %vm515_vm3, %v1599_v0 }
 0xc22   :  { %v1600_v35 = vmul.f32 %v6030_v26, %v6018_v12  ;;  %5568 = vmatpush3.msra.mxu1 %v1826_v49 }
 0xc23   :  { %5569 = vmatprep.subr.mxu1 %v1825_v48  ;;  %v1744_v4 = vpop.permute.xlu0 %1743  ;;  %v1770_v16 = vpop.permute.xlu1 %1769 }
 0xc24   :  { %5560 = vmatprep.mubr.msk.f32.mxu1 %vm515_vm3, %v1600_v35  ;;  %5570 = vmatpush3.msra.mxu1 %v1825_v48  ;;  %v1807_v7 = vsel %vm395_vm2, %v6644_v11, %v1744_v4  ;;  %v1815_v32 = vsel %vm1811_vm4, %v1808_v6, %v1770_v16 }
 0xc25   :  { %5561 = vmatmul.mubr.msk.f32.gmra.mxu1 %vm515_vm3, %v1601_v40 }
 0xc27   :  { %v1768_v17 = vpop.permute.xlu0 %1767  ;;  %v1750_v19 = vpop.permute.xlu1 %1749 }
 0xc28   :  { %v1814_v58 = vsel %vm1811_vm4, %v1807_v7, %v1768_v17  ;;  %v1810_v8 = vsel %vm395_vm2, %v6646_v13, %v1750_v19 }
 0xc2b   :  { %v1748_v20 = vpop.permute.xlu0 %1747  ;;  %v1774_v22 = vpop.permute.xlu1 %1773 }
 0xc2c   :  { %v1809_v38 = vsel %vm395_vm2, %v6648_v14, %v1748_v20  ;;  %v1817_v1 = vsel %vm1811_vm4, %v1810_v8, %v1774_v22  ;;  %v1831_v14 = vsub.s32 1, %v6437_v45 }
 0xc2e   :  { %v1832_v13 = vrot.slane %v6950_v5, %v1831_v14 }
 0xc2f   :  { %v1772_v23 = vpop.permute.xlu0 %1771 }
 0xc30   :  { %v1816_v11 = vsel %vm1811_vm4, %v1809_v38, %v1772_v23 }
 0xcdc   :  { %v5556_v57 = vpop.f32.mrf.mxu1 }
 0xcdd   :  { %1789 = vrot.lane.b32.xlu1 %v5556_v57, %s6236_s1 }
 0xcde   :  { %v1704_v50 = vpop.f32.mrf.mxu1 }
 0xcdf   :  { %1787 = vrot.lane.b32.xlu0 %v1704_v50, %s6236_s1 }
 0xce1   :  { %v5559_v52 = vpop.f32.mrf.mxu1 }
 0xce2   :  { %1793 = vrot.lane.b32.xlu1 %v5559_v52, %s6236_s1 }
 0xce3   :  { %v1714_v59 = vpop.f32.mrf.mxu1 }
 0xce4   :  { %1791 = vrot.lane.b32.xlu0 %v1714_v59, %s6236_s1 }
 0xce5   :  { %v5562_v53 = vpop.f32.mrf.mxu1 }
 0xce6   :  { %1797 = vrot.lane.b32.xlu1 %v5562_v53, %s6236_s1 }
 0xce7   :  { %v1724_v60 = vpop.f32.mrf.mxu1 }
 0xce8   :  { %1795 = vrot.lane.b32.xlu0 %v1724_v60, %s6236_s1 }
 0xd4f   :  { %v1790_v27 = vpop.permute.xlu1 %1789 }
 0xd50   :  { %v1820_v42 = vsel %vm1818_vm5, %v1813_v30, %v1790_v27 }
 0xd51   :  { %v1788_v10 = vpop.permute.xlu0 %1787 }
 0xd52   :  { %v1819_v12 = vsel %vm1818_vm5, %v1812_v44, %v1788_v10 }
 0xd53   :  { %5571 = vmatprep.mubr.msk.f32.mxu1 %vm176_vm1, %v1819_v12 }
 0xd54   :  { %5572 = vmatmul.mubr.msk.f32.vlgmr.msra.gmra.mxu1 %vm176_vm1, %v1820_v42  ;;  %v1794_v51 = vpop.permute.xlu1 %1793 }
 0xd55   :  { %v1822_v36 = vsel %vm1818_vm5, %v1815_v32, %v1794_v51 }
 0xd56   :  { %v1792_v31 = vpop.permute.xlu0 %1791 }
 0xd57   :  { %v1821_v37 = vsel %vm1818_vm5, %v1814_v58, %v1792_v31 }
 0xd58   :  { %5574 = vmatprep.mubr.msk.f32.mxu1 %vm176_vm1, %v1821_v37  ;;  %v1798_v62 = vpop.permute.xlu1 %1797 }
 0xd59   :  { %5575 = vmatmul.mubr.msk.f32.gmra.mxu1 %vm176_vm1, %v1822_v36  ;;  %v1824_v2 = vsel %vm1818_vm5, %v1817_v1, %v1798_v62  ;;  %v2031_v1 = vld [vmem:[%s8054_s6 + $0x8] sm:$0xff] }
 0xd5a   :  { %v1796_v63 = vpop.permute.xlu0 %1795 }
 0xd5b   :  { %v1823_v39 = vsel %vm1818_vm5, %v1816_v11, %v1796_v63  ;;  %v2033_v11 = vld [vmem:[%s8054_s6 + $0x18] sm:$0xff]  ;;  %v2032_v63 = vld [vmem:[%s8054_s6 + $0x10] sm:$0xff] }
 0xd5c   :  { %5577 = vmatprep.mubr.msk.f32.mxu1 %vm176_vm1, %v1823_v39  ;;  %5580 = vmatprep.subr.mxu0 %v2033_v11  ;;  %v2030_v39 = vld [vmem:[%s8054_s6] sm:$0xff] }
 0xd5d   :  { %5578 = vmatmul.mubr.msk.f32.gmra.mxu1 %vm176_vm1, %v1824_v2  ;;  %5581 = vmatpush3.msra.mxu0 %v2033_v11 }
 0xd5e   :  { %5582 = vmatprep.subr.mxu0 %v2032_v63 }
 0xd5f   :  { %5583 = vmatpush3.msra.mxu0 %v2032_v63 }
 0xd60   :  { %5584 = vmatprep.subr.mxu0 %v2031_v1 }
 0xd61   :  { %5585 = vmatpush3.msra.mxu0 %v2031_v1 }
 0xd62   :  { %5586 = vmatprep.subr.mxu0 %v2030_v39 }
 0xd63   :  { %5587 = vmatpush3.msra.mxu0 %v2030_v39 }
 0xe14   :  { %v5573_v61 = vpop.f32.mrf.mxu1 }
 0xe15   :  { %v1923_v15 = vadd.f32 %v5573_v61, %v1832_v13 }
 0xe16   :  { %v1917_v0 = vpop.f32.mrf.mxu1 }
 0xe17   :  { %v6956_v24 = vadd.f32 %v1923_v15, %v6351_v21  ;;  %v1918_v26 = vadd.f32 %v1917_v0, %v1832_v13 }
 0xe19   :  { %v6959_v35 = vadd.f32 %v1918_v26, %v6346_v18  ;;  %v5576_v40 = vpop.f32.mrf.mxu1  ;;  %v1955_v41 = vsel %vm176_vm1, %v6956_v24, 0.0 }
 0xe1a   :  { %v1933_v47 = vadd.f32 %v5576_v40, %v1832_v13  ;;  %1956 = vadd.xlane.f32.xlu1 %v1955_v41 }
 0xe1b   :  { %v1927_v49 = vpop.f32.mrf.mxu1  ;;  %v1952_v48 = vsel %vm176_vm1, %v6959_v35, 0.0 }
 0xe1c   :  { %v6966_v57 = vadd.f32 %v1933_v47, %v6363_v28  ;;  %v1928_v50 = vadd.f32 %v1927_v49, %v1832_v13  ;;  %1953 = vadd.xlane.f32.xlu0 %v1952_v48 }
 0xe1d   :  { %v5579_v21 = vpop.f32.mrf.mxu1 }
 0xe1e   :  { %v1943_v52 = vadd.f32 %v5579_v21, %v1832_v13  ;;  %v1961_v18 = vsel %vm176_vm1, %v6966_v57, 0.0  ;;  %v6971_v59 = vadd.f32 %v1928_v50, %v6358_v25 }
 0xe1f   :  { %v1937_v53 = vpop.f32.mrf.mxu1 }
 0xe20   :  { %v6974_v60 = vadd.f32 %v1943_v52, %v6374_v34  ;;  %v1938_v54 = vadd.f32 %v1937_v53, %v1832_v13  ;;  %1962 = vadd.xlane.f32.xlu0 %v1961_v18  ;;  %v1958_v43 = vsel %vm176_vm1, %v6971_v59, 0.0 }
 0xe22   :  { %v1967_v28 = vsel %vm176_vm1, %v6974_v60, 0.0  ;;  %v6979_v55 = vadd.f32 %v1938_v54, %v6372_v33 }
 0xe23   :  { %1968 = vadd.xlane.f32.xlu1 %v1967_v28 }
 0xe24   :  { %1959 = vadd.xlane.f32.xlu0 %v1958_v43  ;;  %v1964_v25 = vsel %vm176_vm1, %v6979_v55, 0.0 }
 0xe28   :  { %1965 = vadd.xlane.f32.xlu0 %v1964_v25 }
 0xea3   :  { %v1957_v56 = vpop.xlane.xlu1 %1956 }
 0xea4   :  { %v1971_v34 = vmul.f32 0.03125, %v1957_v56 }
 0xea5   :  { %v1954_v3 = vpop.xlane.xlu0 %1953 }
 0xea6   :  { %v6986_v4 = vsub.f32 %v6956_v24, %v1971_v34  ;;  %v1970_v16 = vmul.f32 0.03125, %v1954_v3 }
 0xea8   :  { %v6989_v17 = vsub.f32 %v6959_v35, %v1970_v16  ;;  %v1983_v33 = vmul.f32 %v6986_v4, %v6986_v4 }
 0xea9   :  { %v1963_v19 = vpop.xlane.xlu0 %1962 }
 0xeaa   :  { %v1973_v20 = vmul.f32 0.03125, %v1963_v19  ;;  %v1991_v22 = vsel %vm176_vm1, %v1983_v33, 0.0  ;;  %v1982_v23 = vmul.f32 %v6989_v17, %v6989_v17 }
 0xeab   :  { %1992 = vadd.xlane.f32.xlu1 %v1991_v22 }
 0xeac   :  { %v6997_v27 = vsub.f32 %v6966_v57, %v1973_v20  ;;  %v1969_v29 = vpop.xlane.xlu1 %1968  ;;  %v1988_v9 = vsel %vm176_vm1, %v1982_v23, 0.0 }
 0xead   :  { %v1975_v44 = vmul.f32 0.03125, %v1969_v29  ;;  %v1960_v10 = vpop.xlane.xlu0 %1959  ;;  %1989 = vadd.xlane.f32.xlu0 %v1988_v9  ;;  %v2320_v29 = vld [vmem:[%s8055_s7 + $0x68] sm:$0xff]  ;;  %v2319_v9 = vld [vmem:[%s8055_s7 + $0x60] sm:$0xff] }
 0xeae   :  { %v1972_v30 = vmul.f32 0.03125, %v1960_v10  ;;  %v1985_v12 = vmul.f32 %v6997_v27, %v6997_v27  ;;  %v2317_v10 = vld [vmem:[%s8055_s7 + $0x50] sm:$0xff] }
 0xeaf   :  { %v7003_v42 = vsub.f32 %v6974_v60, %v1975_v44  ;;  %v2318_v44 = vld [vmem:[%s8055_s7 + $0x58] sm:$0xff] }
 0xeb0   :  { %v1978_v51 = vsub.f32 %v6971_v59, %v1972_v30  ;;  %v1997_v7 = vsel %vm176_vm1, %v1985_v12, 0.0  ;;  %v2316_v30 = vld [vmem:[%s8055_s7 + $0x48] sm:$0xff]  ;;  %v2315_v12 = vld [vmem:[%s8055_s7 + $0x40] sm:$0xff] }
 0xeb1   :  { %v1966_v6 = vpop.xlane.xlu0 %1965  ;;  %1998 = vadd.xlane.f32.xlu1 %v1997_v7  ;;  %v1987_v58 = vmul.f32 %v7003_v42, %v7003_v42  ;;  %v2312_v7 = vld [vmem:[%s8055_s7 + $0x28] sm:$0xff] }
 0xeb2   :  { %v1974_v31 = vmul.f32 0.03125, %v1966_v6  ;;  %v1984_v32 = vmul.f32 %v1978_v51, %v1978_v51  ;;  %v2311_v6 = vld [vmem:[%s8055_s7 + $0x20] sm:$0xff] }
 0xeb3   :  { %v2003_v37 = vsel %vm176_vm1, %v1987_v58, 0.0  ;;  %v2310_v58 = vld [vmem:[%s8055_s7 + $0x18] sm:$0xff] }
 0xeb4   :  { %v1980_v36 = vsub.f32 %v6979_v55, %v1974_v31  ;;  %v1994_v38 = vsel %vm176_vm1, %v1984_v32, 0.0  ;;  %v2309_v31 = vld [vmem:[%s8055_s7 + $0x10] sm:$0xff]  ;;  %v2308_v32 = vld [vmem:[%s8055_s7 + $0x8] sm:$0xff] }
 0xeb5   :  { %1995 = vadd.xlane.f32.xlu0 %v1994_v38  ;;  %2004 = vadd.xlane.f32.xlu1 %v2003_v37  ;;  %v2307_v37 = vld [vmem:[%s8055_s7] sm:$0xff] }
 0xeb6   :  { %v1986_v62 = vmul.f32 %v1980_v36, %v1980_v36 }
 0xeb8   :  { %v2000_v8 = vsel %vm176_vm1, %v1986_v62, 0.0 }
 0xeb9   :  { %2001 = vadd.xlane.f32.xlu0 %v2000_v8 }
 0xf34   :  { %v1993_v2 = vpop.xlane.xlu1 %1992 }
 0xf35   :  { %v2007_v13 = vmul.f32 0.03125, %v1993_v2 }
 0xf36   :  { %v1990_v61 = vpop.xlane.xlu0 %1989 }
 0xf37   :  { %v2013_v15 = vadd.f32 1e-05, %v2007_v13  ;;  %v2006_v0 = vmul.f32 0.03125, %v1990_v61 }
 0xf39   :  { %v2012_v26 = vadd.f32 1e-05, %v2006_v0  ;;  %6031 = vrsqrt.f32 %v2013_v15 }
 0xf3a   :  { %v1999_v40 = vpop.xlane.xlu1 %1998 }
 0xf3b   :  { %6033 = vrsqrt.f32 %v2012_v26  ;;  %v2009_v41 = vmul.f32 0.03125, %v1999_v40 }
 0xf3d   :  { %v2015_v47 = vadd.f32 1e-05, %v2009_v41 }
 0xf3e   :  { %v1996_v49 = vpop.xlane.xlu0 %1995  ;;  %v2005_v48 = vpop.xlane.xlu1 %2004 }
 0xf3f   :  { %v2008_v50 = vmul.f32 0.03125, %v1996_v49  ;;  %v2011_v21 = vmul.f32 0.03125, %v2005_v48  ;;  %6035 = vrsqrt.f32 %v2015_v47 }
 0xf41   :  { %v2014_v52 = vadd.f32 1e-05, %v2008_v50  ;;  %v2017_v18 = vadd.f32 1e-05, %v2011_v21 }
 0xf42   :  { %v2002_v53 = vpop.xlane.xlu0 %2001 }
 0xf43   :  { %6037 = vrsqrt.f32 %v2014_v52  ;;  %v2010_v54 = vmul.f32 0.03125, %v2002_v53 }
 0xf44   :  { %6039 = vrsqrt.f32 %v2017_v18 }
 0xf45   :  { %v2016_v28 = vadd.f32 1e-05, %v2010_v54 }
 0xf46   :  { %v6032_v43 = vpop.eup %6031 }
 0xf47   :  { %6041 = vrsqrt.f32 %v2016_v28  ;;  %v2025_v34 = vmul.f32 %v6032_v43, %v6986_v4  ;;  %v2322_v4 = vld [vmem:[%s8055_s7 + $0x78] sm:$0xff] }
 0xf48   :  { %v6034_v25 = vpop.eup %6033  ;;  %5597 = vmatprep.subr.mxu1 %v2322_v4 }
 0xf49   :  { %v2024_v56 = vmul.f32 %v6034_v25, %v6989_v17  ;;  %5598 = vmatpush3.msra.mxu1 %v2322_v4 }
 0xf4b   :  { %5588 = vmatprep.mubr.msk.f32.mxu0 %vm176_vm1, %v2024_v56 }
 0xf4c   :  { %5589 = vmatmul.mubr.msk.f32.vlgmr.msra.gmra.mxu0 %vm176_vm1, %v2025_v34  ;;  %v6036_v3 = vpop.eup %6035 }
 0xf4d   :  { %v2027_v19 = vmul.f32 %v6036_v3, %v6997_v27  ;;  %v2321_v27 = vld [vmem:[%s8055_s7 + $0x70] sm:$0xff] }
 0xf4e   :  { %5599 = vmatprep.subr.mxu1 %v2321_v27 }
 0xf4f   :  { %5600 = vmatpush3.msra.mxu1 %v2321_v27 }
 0xf50   :  { %v6038_v16 = vpop.eup %6037  ;;  %5601 = vmatprep.subr.mxu1 %v2320_v29 }
 0xf51   :  { %v2026_v33 = vmul.f32 %v6038_v16, %v1978_v51  ;;  %v6040_v20 = vpop.eup %6039  ;;  %5602 = vmatpush3.msra.mxu1 %v2320_v29  ;;  %v2313_v51 = vld [vmem:[%s8055_s7 + $0x30] sm:$0xff] }
 0xf52   :  { %v2029_v17 = vmul.f32 %v6040_v20, %v7003_v42  ;;  %5603 = vmatprep.subr.mxu1 %v2319_v9  ;;  %v2314_v42 = vld [vmem:[%s8055_s7 + $0x38] sm:$0xff] }
 0xf53   :  { %5591 = vmatprep.mubr.msk.f32.mxu0 %vm176_vm1, %v2026_v33  ;;  %5604 = vmatpush3.msra.mxu1 %v2319_v9 }
 0xf54   :  { %v6042_v22 = vpop.eup %6041  ;;  %5592 = vmatmul.mubr.msk.f32.gmra.mxu0 %vm176_vm1, %v2027_v19  ;;  %5605 = vmatprep.subr.mxu1 %v2318_v44 }
 0xf55   :  { %v2028_v23 = vmul.f32 %v6042_v22, %v1980_v36  ;;  %5606 = vmatpush3.msra.mxu1 %v2318_v44  ;;  %v2036_v36 = vsub.s32 2, %v6437_v45 }
 0xf56   :  { %5607 = vmatprep.subr.mxu1 %v2317_v10 }
 0xf57   :  { %5594 = vmatprep.mubr.msk.f32.mxu0 %vm176_vm1, %v2028_v23  ;;  %5608 = vmatpush3.msra.mxu1 %v2317_v10  ;;  %v2037_v38 = vrot.slane %v6950_v5, %v2036_v36 }
 0xf58   :  { %5595 = vmatmul.mubr.msk.f32.gmra.mxu0 %vm176_vm1, %v2029_v17  ;;  %5609 = vmatprep.subr.mxu1 %v2316_v30 }
 0xf59   :  { %5610 = vmatpush3.msra.mxu1 %v2316_v30 }
 0xf5a   :  { %5611 = vmatprep.subr.mxu1 %v2315_v12 }
 0xf5b   :  { %5612 = vmatpush3.msra.mxu1 %v2315_v12 }
 0xf5c   :  { %5613 = vmatprep.subr.mxu1 %v2314_v42 }
 0xf5d   :  { %5614 = vmatpush3.msra.mxu1 %v2314_v42 }
 0xf5e   :  { %5615 = vmatprep.subr.mxu1 %v2313_v51 }
 0xf5f   :  { %5616 = vmatpush3.msra.mxu1 %v2313_v51 }
 0xf60   :  { %5617 = vmatprep.subr.mxu1 %v2312_v7 }
 0xf61   :  { %5618 = vmatpush3.msra.mxu1 %v2312_v7 }
 0xf62   :  { %5619 = vmatprep.subr.mxu1 %v2311_v6 }
 0xf63   :  { %5620 = vmatpush3.msra.mxu1 %v2311_v6 }
 0xf64   :  { %5621 = vmatprep.subr.mxu1 %v2310_v58 }
 0xf65   :  { %5622 = vmatpush3.msra.mxu1 %v2310_v58 }
 0xf66   :  { %5623 = vmatprep.subr.mxu1 %v2309_v31 }
 0xf67   :  { %5624 = vmatpush3.msra.mxu1 %v2309_v31 }
 0xf68   :  { %5625 = vmatprep.subr.mxu1 %v2308_v32 }
 0xf69   :  { %5626 = vmatpush3.msra.mxu1 %v2308_v32 }
 0xf6a   :  { %5627 = vmatprep.subr.mxu1 %v2307_v37 }
 0xf6b   :  { %5628 = vmatpush3.msra.mxu1 %v2307_v37 }
0x100c   :  { %v5590_v62 = vpop.f32.mrf.mxu0 }
0x100d   :  { %v7087_v8 = vadd.f32 %v5590_v62, %v2037_v38 }
0x100e   :  { %v2122_v11 = vpop.f32.mrf.mxu0 }
0x100f   :  { %v7090_v63 = vmul.f32 0.70710677, %v7087_v8  ;;  %v7092_v1 = vadd.f32 %v2122_v11, %v2037_v38 }
0x1011   :  { %v2164_v39 = vand.u32 2147483647, %v7090_v63  ;;  %v7096_v2 = vmul.f32 0.70710677, %v7092_v1  ;;  %vm2278_vm6 = vcmp.lt.f32.partialorder %v7090_v63, 0.0 }
0x1013   :  { %v2170_v13 = vmul.f32 0.3275911, %v2164_v39  ;;  %v2163_v61 = vand.u32 2147483647, %v7096_v2  ;;  %v2242_v25 = vsub.f32 0.0, %v2164_v39  ;;  %vm2277_vm7 = vcmp.lt.f32.partialorder %v7096_v2, 0.0 }
0x1014   :  { %v5593_v15 = vpop.f32.mrf.mxu0 }
0x1015   :  { %v2176_v0 = vadd.f32 1.0, %v2170_v13  ;;  %v2169_v26 = vmul.f32 0.3275911, %v2163_v61  ;;  %v7099_v40 = vadd.f32 %v5593_v15, %v2037_v38  ;;  %v2241_v20 = vsub.f32 0.0, %v2163_v61 }
0x1016   :  { %v2132_v41 = vpop.f32.mrf.mxu0  ;;  %v2248_v23 = vmul.f32 %v2242_v25, %v2164_v39 }
0x1017   :  { %6043 = vrcp.f32 %v2176_v0  ;;  %v2175_v47 = vadd.f32 1.0, %v2169_v26  ;;  %v7102_v49 = vmul.f32 0.70710677, %v7099_v40  ;;  %v7104_v48 = vadd.f32 %v2132_v41, %v2037_v38 }
0x1018   :  { %v5596_v50 = vpop.f32.mrf.mxu0  ;;  %v2247_v9 = vmul.f32 %v2241_v20, %v2163_v61  ;;  %v2255_v30 = vmul.f32 1.442695, %v2248_v23 }
0x1019   :  { %v7106_v21 = vadd.f32 %v5596_v50, %v2037_v38  ;;  %6045 = vrcp.f32 %v2175_v47  ;;  %v2166_v52 = vand.u32 2147483647, %v7102_v49  ;;  %v7110_v53 = vmul.f32 0.70710677, %v7104_v48 }
0x101a   :  { %v2142_v18 = vpop.f32.mrf.mxu0  ;;  %v2253_v7 = vmul.f32 1.442695, %v2247_v9  ;;  %vm2280_vm8 = vcmp.lt.f32.partialorder %v7102_v49, 0.0  ;;  %v2153_v49 = vmul.f32 0.5, %v7104_v48 }
0x101b   :  { %v7113_v54 = vmul.f32 0.70710677, %v7106_v21  ;;  %v2172_v28 = vmul.f32 0.3275911, %v2166_v52  ;;  %v7115_v43 = vadd.f32 %v2142_v18, %v2037_v38  ;;  %v2165_v56 = vand.u32 2147483647, %v7110_v53 }
0x101c   :  { %v2244_v12 = vsub.f32 0.0, %v2166_v52  ;;  %vm2279_vm9 = vcmp.lt.f32.partialorder %v7110_v53, 0.0 }
0x101d   :  { %v2168_v34 = vand.u32 2147483647, %v7113_v54  ;;  %v2178_v3 = vadd.f32 1.0, %v2172_v28  ;;  %v7120_v16 = vmul.f32 0.70710677, %v7115_v43  ;;  %v2243_v6 = vsub.f32 0.0, %v2165_v56 }
0x101e   :  { %v2171_v33 = vmul.f32 0.3275911, %v2165_v56  ;;  %v2250_v32 = vmul.f32 %v2244_v12, %v2166_v52  ;;  %vm2282_vm10 = vcmp.lt.f32.partialorder %v7113_v54, 0.0  ;;  %v2155_v53 = vmul.f32 0.5, %v7115_v43 }
0x101f   :  { %v2174_v19 = vmul.f32 0.3275911, %v2168_v34  ;;  %6047 = vrcp.f32 %v2178_v3  ;;  %v2167_v22 = vand.u32 2147483647, %v7120_v16  ;;  %v2246_v37 = vsub.f32 0.0, %v2168_v34 }
0x1020   :  { %v2177_v17 = vadd.f32 1.0, %v2171_v33  ;;  %v2249_v11 = vmul.f32 %v2243_v6, %v2165_v56  ;;  %v2259_v15 = vmul.f32 1.442695, %v2250_v32  ;;  %vm2281_vm11 = vcmp.lt.f32.partialorder %v7120_v16, 0.0 }
0x1021   :  { %v2180_v4 = vadd.f32 1.0, %v2174_v19  ;;  %v2173_v27 = vmul.f32 0.3275911, %v2167_v22  ;;  %v2245_v0 = vsub.f32 0.0, %v2167_v22  ;;  %v2252_v26 = vmul.f32 %v2246_v37, %v2168_v34 }
0x1022   :  { %6049 = vrcp.f32 %v2177_v17  ;;  %v2257_v28 = vmul.f32 1.442695, %v2249_v11 }
0x1023   :  { %6051 = vrcp.f32 %v2180_v4  ;;  %v2179_v44 = vadd.f32 1.0, %v2173_v27  ;;  %v2251_v56 = vmul.f32 %v2245_v0, %v2167_v22  ;;  %v2263_v20 = vmul.f32 1.442695, %v2252_v26 }
0x1024   :  { %v6044_v29 = vpop.eup %6043 }
0x1025   :  { %v2188_v10 = vmul.f32 1.0614054, %v6044_v29  ;;  %6053 = vrcp.f32 %v2179_v44 }
0x1026   :  { %v6046_v42 = vpop.eup %6045  ;;  %6055 = vpow2.f32 %v2255_v30 }
0x1027   :  { %v4892_v51 = vadd.f32 -1.4531521, %v2188_v10  ;;  %v2187_v58 = vmul.f32 1.0614054, %v6046_v42  ;;  %6057 = vpow2.f32 %v2253_v7 }
0x1028   :  { %6059 = vpow2.f32 %v2259_v15 }
0x1029   :  { %v2200_v31 = vmul.f32 %v6044_v29, %v4892_v51  ;;  %v4891_v38 = vadd.f32 -1.4531521, %v2187_v58  ;;  %6061 = vpow2.f32 %v2257_v28  ;;  %v2261_v51 = vmul.f32 1.442695, %v2251_v56 }
0x102a   :  { %6063 = vpow2.f32 %v2263_v20 }
0x102b   :  { %v2206_v62 = vadd.f32 1.4214138, %v2200_v31  ;;  %v2199_v39 = vmul.f32 %v6046_v42, %v4891_v38  ;;  %6065 = vpow2.f32 %v2261_v51 }
0x102c   :  { %v7123_v13 = vpop.eup %6047 }
0x102d   :  { %v2212_v61 = vmul.f32 %v6044_v29, %v2206_v62  ;;  %v2205_v41 = vadd.f32 1.4214138, %v2199_v39  ;;  %v2190_v47 = vmul.f32 1.0614054, %v7123_v13 }
0x102f   :  { %v4898_v50 = vadd.f32 -0.28449672, %v2212_v61  ;;  %v7126_v18 = vpop.eup %6049  ;;  %v2211_v52 = vmul.f32 %v6046_v42, %v2205_v41  ;;  %v4894_v25 = vadd.f32 -1.4531521, %v2190_v47 }
0x1030   :  { %v7128_v3 = vpop.eup %6051  ;;  %v2189_v19 = vmul.f32 1.0614054, %v7126_v18 }
0x1031   :  { %v2224_v33 = vmul.f32 %v6044_v29, %v4898_v50  ;;  %v4897_v23 = vadd.f32 -0.28449672, %v2211_v52  ;;  %v2202_v34 = vmul.f32 %v7123_v13, %v4894_v25  ;;  %v2192_v17 = vmul.f32 1.0614054, %v7128_v3 }
0x1032   :  { %v4893_v27 = vadd.f32 -1.4531521, %v2189_v19  ;;  %v7133_v9 = vpop.eup %6053 }
0x1033   :  { %v2230_v4 = vadd.f32 0.2548296, %v2224_v33  ;;  %v2223_v44 = vmul.f32 %v6046_v42, %v4897_v23  ;;  %v2208_v10 = vadd.f32 1.4214138, %v2202_v34  ;;  %v4896_v30 = vadd.f32 -1.4531521, %v2192_v17  ;;  %v6056_v6 = vpop.eup %6055 }
0x1034   :  { %v2201_v22 = vmul.f32 %v7126_v18, %v4893_v27  ;;  %v2191_v7 = vmul.f32 1.0614054, %v7133_v9  ;;  %v6058_v15 = vpop.eup %6057 }
0x1035   :  { %v2236_v12 = vmul.f32 %v6044_v29, %v2230_v4  ;;  %v2229_v58 = vadd.f32 0.2548296, %v2223_v44  ;;  %v2214_v31 = vmul.f32 %v7123_v13, %v2208_v10  ;;  %v2204_v32 = vmul.f32 %v7128_v3, %v4896_v30  ;;  %v6060_v34 = vpop.eup %6059 }
0x1036   :  { %v2207_v38 = vadd.f32 1.4214138, %v2201_v22  ;;  %v4895_v62 = vadd.f32 -1.4531521, %v2191_v7  ;;  %v6062_v22 = vpop.eup %6061  ;;  %v2151_v7 = vmul.f32 0.5, %v7092_v1 }
0x1037   :  { %v2266_v37 = vmul.f32 %v6056_v6, %v2236_v12  ;;  %v2235_v11 = vmul.f32 %v6046_v42, %v2229_v58  ;;  %v4900_v39 = vadd.f32 -0.28449672, %v2214_v31  ;;  %v2210_v61 = vadd.f32 1.4214138, %v2204_v32  ;;  %v6064_v2 = vpop.eup %6063 }
0x1038   :  { %v2213_v0 = vmul.f32 %v7126_v18, %v2207_v38  ;;  %v2203_v26 = vmul.f32 %v7133_v9, %v4895_v62 }
0x1039   :  { %v2272_v29 = vsub.f32 1.0, %v2266_v37  ;;  %v2265_v41 = vmul.f32 %v6058_v15, %v2235_v11  ;;  %v2226_v47 = vmul.f32 %v7123_v13, %v4900_v39  ;;  %v2216_v50 = vmul.f32 %v7128_v3, %v2210_v61 }
0x103a   :  { %v4899_v52 = vadd.f32 -0.28449672, %v2213_v0  ;;  %v2209_v25 = vadd.f32 1.4214138, %v2203_v26 }
0x103b   :  { %v2284_v28 = vsub.f32 0.0, %v2272_v29  ;;  %v2271_v42 = vsub.f32 1.0, %v2265_v41  ;;  %v2232_v33 = vadd.f32 0.2548296, %v2226_v47  ;;  %v4902_v56 = vadd.f32 -0.28449672, %v2216_v50 }
0x103c   :  { %v2225_v20 = vmul.f32 %v7126_v18, %v4899_v52  ;;  %v2215_v23 = vmul.f32 %v7133_v9, %v2209_v25 }
0x103d   :  { %v2290_v19 = vsel %vm2278_vm6, %v2284_v28, %v2272_v29  ;;  %v2283_v17 = vsub.f32 0.0, %v2271_v42  ;;  %v2238_v4 = vmul.f32 %v7123_v13, %v2232_v33  ;;  %v2228_v27 = vmul.f32 %v7128_v3, %v4902_v56  ;;  %v6066_v29 = vpop.eup %6065 }
0x103e   :  { %v2231_v44 = vadd.f32 0.2548296, %v2225_v20  ;;  %v4901_v10 = vadd.f32 -0.28449672, %v2215_v23  ;;  %v2296_v30 = vadd.f32 1.0, %v2290_v19  ;;  %v2152_v13 = vmul.f32 0.5, %v7087_v8 }
0x103f   :  { %v2289_v63 = vsel %vm2277_vm7, %v2283_v17, %v2271_v42  ;;  %v2268_v12 = vmul.f32 %v6060_v34, %v2238_v4  ;;  %v2234_v51 = vadd.f32 0.2548296, %v2228_v27  ;;  %v2156_v23 = vmul.f32 0.5, %v7106_v21 }
0x1040   :  { %v2295_v6 = vadd.f32 1.0, %v2289_v63  ;;  %v2237_v58 = vmul.f32 %v7126_v18, %v2231_v44  ;;  %v2227_v31 = vmul.f32 %v7133_v9, %v4901_v10  ;;  %v2302_v39 = vmul.f32 %v2296_v30, %v2152_v13 }
0x1041   :  { %v2274_v32 = vsub.f32 1.0, %v2268_v12  ;;  %v2240_v37 = vmul.f32 %v7128_v3, %v2234_v51 }
0x1042   :  { %v2301_v38 = vmul.f32 %v2295_v6, %v2151_v7  ;;  %v2267_v62 = vmul.f32 %v6062_v22, %v2237_v58  ;;  %v2233_v11 = vadd.f32 0.2548296, %v2227_v31 }
0x1043   :  { %v2286_v61 = vsub.f32 0.0, %v2274_v32  ;;  %v2270_v15 = vmul.f32 %v6064_v2, %v2240_v37 }
0x1044   :  { %5629 = vmatprep.mubr.f32.mxu1 %v2301_v38  ;;  %v2273_v1 = vsub.f32 1.0, %v2267_v62  ;;  %v2239_v18 = vmul.f32 %v7133_v9, %v2233_v11  ;;  %v2154_v9 = vmul.f32 0.5, %v7099_v40  ;;  %v2325_v40 = vsub.s32 3, %v6437_v45 }
0x1045   :  { %5630 = vmatmul.mubr.f32.vlgmr.msra.gmra.mxu1 %v2302_v39  ;;  %v2292_v0 = vsel %vm2280_vm8, %v2286_v61, %v2274_v32  ;;  %v2276_v8 = vsub.f32 1.0, %v2270_v15 }
0x1046   :  { %v2285_v26 = vsub.f32 0.0, %v2273_v1  ;;  %v2269_v41 = vmul.f32 %v6066_v29, %v2239_v18  ;;  %v2298_v50 = vadd.f32 1.0, %v2292_v0  ;;  %v2326_v16 = vrot.slane %v6950_v5, %v2325_v40 }
0x1047   :  { %v2288_v3 = vsub.f32 0.0, %v2276_v8 }
0x1048   :  { %v2291_v47 = vsel %vm2279_vm9, %v2285_v26, %v2273_v1  ;;  %v2275_v28 = vsub.f32 1.0, %v2269_v41  ;;  %v2304_v56 = vmul.f32 %v2298_v50, %v2154_v9 }
0x1049   :  { %v2297_v52 = vadd.f32 1.0, %v2291_v47  ;;  %v2294_v25 = vsel %vm2282_vm10, %v2288_v3, %v2276_v8 }
0x104a   :  { %v2287_v42 = vsub.f32 0.0, %v2275_v28  ;;  %v2300_v20 = vadd.f32 1.0, %v2294_v25 }
0x104b   :  { %v2303_v33 = vmul.f32 %v2297_v52, %v2153_v49 }
0x104c   :  { %v2293_v19 = vsel %vm2281_vm11, %v2287_v42, %v2275_v28  ;;  %v2306_v48 = vmul.f32 %v2300_v20, %v2156_v23  ;;  %v4906_v23 = vld [vmem:[%s8050_s4 + $0x30] sm:$0xff] }
0x104d   :  { %5632 = vmatprep.mubr.f32.mxu1 %v2303_v33  ;;  %v2299_v54 = vadd.f32 1.0, %v2293_v19 }
0x104e   :  { %5633 = vmatmul.mubr.f32.gmra.mxu1 %v2304_v56 }
0x104f   :  { %v2305_v34 = vmul.f32 %v2299_v54, %v2155_v53  ;;  %v4907_v54 = vld [vmem:[%s8050_s4 + $0x38] sm:$0xff] }
0x1050   :  { %5638 = vmatprep.subr.mxu0 %v4907_v54 }
0x1051   :  { %5635 = vmatprep.mubr.f32.mxu1 %v2305_v34  ;;  %5639 = vmatpush3.msra.mxu0 %v4907_v54  ;;  %v4905_v34 = vld [vmem:[%s8050_s4 + $0x28] sm:$0xff] }
0x1052   :  { %5636 = vmatmul.mubr.f32.gmra.mxu1 %v2306_v48  ;;  %5640 = vmatprep.subr.mxu0 %v4906_v23  ;;  %v4904_v48 = vld [vmem:[%s8050_s4 + $0x20] sm:$0xff] }
0x1053   :  { %5641 = vmatpush3.msra.mxu0 %v4906_v23 }
0x1054   :  { %5642 = vmatprep.subr.mxu0 %v4905_v34 }
0x1055   :  { %5643 = vmatpush3.msra.mxu0 %v4905_v34 }
0x1056   :  { %5644 = vmatprep.subr.mxu0 %v4904_v48 }
0x1057   :  { %5645 = vmatpush3.msra.mxu0 %v4904_v48 }
0x1105   :  { %v5631_v17 = vpop.f32.mrf.mxu1 }
0x1106   :  { %v2399_v4 = vadd.f32 %v5631_v17, %v2326_v16 }
0x1107   :  { %v2393_v27 = vpop.f32.mrf.mxu1 }
0x1108   :  { %v7168_v43 = vadd.f32 %v2399_v4, %v6956_v24  ;;  %v2394_v44 = vadd.f32 %v2393_v27, %v2326_v16 }
0x110a   :  { %v7171_v21 = vadd.f32 %v2394_v44, %v6959_v35  ;;  %v2433_v10 = vsel %vm176_vm1, %v7168_v43, 0.0 }
0x110b   :  { %2434 = vadd.xlane.f32.xlu1 %v2433_v10 }
0x110c   :  { %v2430_v30 = vsel %vm176_vm1, %v7171_v21, 0.0 }
0x110d   :  { %2431 = vadd.xlane.f32.xlu0 %v2430_v30 }
0x110e   :  { %v5634_v63 = vpop.f32.mrf.mxu1 }
0x110f   :  { %v2409_v5 = vadd.f32 %v5634_v63, %v2326_v16 }
0x1110   :  { %v2403_v12 = vpop.f32.mrf.mxu1 }
0x1111   :  { %v7178_v51 = vadd.f32 %v2409_v5, %v6966_v57  ;;  %v2404_v24 = vadd.f32 %v2403_v12, %v2326_v16 }
0x1112   :  { %v5637_v22 = vpop.f32.mrf.mxu1 }
0x1113   :  { %v7181_v7 = vadd.f32 %v2404_v24, %v6971_v59  ;;  %v2419_v35 = vadd.f32 %v5637_v22, %v2326_v16  ;;  %v2439_v6 = vsel %vm176_vm1, %v7178_v51, 0.0 }
0x1114   :  { %2440 = vadd.xlane.f32.xlu1 %v2439_v6  ;;  %v2413_v58 = vpop.f32.mrf.mxu1 }
0x1115   :  { %v7186_v31 = vadd.f32 %v2419_v35, %v6974_v60  ;;  %v2414_v13 = vadd.f32 %v2413_v58, %v2326_v16  ;;  %v2436_v32 = vsel %vm176_vm1, %v7181_v7, 0.0 }
0x1116   :  { %2437 = vadd.xlane.f32.xlu0 %v2436_v32 }
0x1117   :  { %v7191_v57 = vadd.f32 %v2414_v13, %v6979_v55  ;;  %v2445_v59 = vsel %vm176_vm1, %v7186_v31, 0.0 }
0x1118   :  { %2446 = vadd.xlane.f32.xlu1 %v2445_v59 }
0x1119   :  { %v2442_v37 = vsel %vm176_vm1, %v7191_v57, 0.0 }
0x111a   :  { %2443 = vadd.xlane.f32.xlu0 %v2442_v37 }
0x1194   :  { %v2435_v2 = vpop.xlane.xlu1 %2434 }
0x1195   :  { %v2449_v38 = vmul.f32 0.03125, %v2435_v2 }
0x1196   :  { %v2432_v60 = vpop.xlane.xlu0 %2431 }
0x1197   :  { %v7198_v62 = vsub.f32 %v7168_v43, %v2449_v38  ;;  %v2448_v11 = vmul.f32 0.03125, %v2432_v60 }
0x1199   :  { %v7201_v39 = vsub.f32 %v7171_v21, %v2448_v11  ;;  %v2461_v55 = vmul.f32 %v7198_v62, %v7198_v62 }
0x119b   :  { %v2469_v61 = vsel %vm176_vm1, %v2461_v55, 0.0  ;;  %v2460_v15 = vmul.f32 %v7201_v39, %v7201_v39 }
0x119c   :  { %2470 = vadd.xlane.f32.xlu1 %v2469_v61 }
0x119d   :  { %v2441_v1 = vpop.xlane.xlu1 %2440  ;;  %v2466_v18 = vsel %vm176_vm1, %v2460_v15, 0.0 }
0x119e   :  { %v2451_v29 = vmul.f32 0.03125, %v2441_v1  ;;  %2467 = vadd.xlane.f32.xlu0 %v2466_v18 }
0x119f   :  { %v2438_v0 = vpop.xlane.xlu0 %2437 }
0x11a0   :  { %v7210_v8 = vsub.f32 %v7178_v51, %v2451_v29  ;;  %v2450_v26 = vmul.f32 0.03125, %v2438_v0 }
0x11a1   :  { %v2447_v41 = vpop.xlane.xlu1 %2446 }
0x11a2   :  { %v2456_v3 = vsub.f32 %v7181_v7, %v2450_v26  ;;  %v2453_v47 = vmul.f32 0.03125, %v2447_v41  ;;  %v2463_v50 = vmul.f32 %v7210_v8, %v7210_v8 }
0x11a3   :  { %v2444_v28 = vpop.xlane.xlu0 %2443 }
0x11a4   :  { %v7216_v49 = vsub.f32 %v7186_v31, %v2453_v47  ;;  %v2452_v52 = vmul.f32 0.03125, %v2444_v28  ;;  %v2475_v25 = vsel %vm176_vm1, %v2463_v50, 0.0  ;;  %v2462_v9 = vmul.f32 %v2456_v3, %v2456_v3 }
0x11a5   :  { %2476 = vadd.xlane.f32.xlu1 %v2475_v25 }
0x11a6   :  { %v2458_v42 = vsub.f32 %v7191_v57, %v2452_v52  ;;  %v2472_v33 = vsel %vm176_vm1, %v2462_v9, 0.0  ;;  %v2465_v56 = vmul.f32 %v7216_v49, %v7216_v49 }
0x11a7   :  { %2473 = vadd.xlane.f32.xlu0 %v2472_v33 }
0x11a8   :  { %v2481_v19 = vsel %vm176_vm1, %v2465_v56, 0.0  ;;  %v2464_v20 = vmul.f32 %v2458_v42, %v2458_v42 }
0x11a9   :  { %2482 = vadd.xlane.f32.xlu1 %v2481_v19 }
0x11aa   :  { %v2478_v53 = vsel %vm176_vm1, %v2464_v20, 0.0 }
0x11ab   :  { %2479 = vadd.xlane.f32.xlu0 %v2478_v53 }
0x1225   :  { %v2471_v16 = vpop.xlane.xlu1 %2470 }
0x1226   :  { %v2485_v17 = vmul.f32 0.03125, %v2471_v16 }
0x1227   :  { %v2468_v4 = vpop.xlane.xlu0 %2467 }
0x1228   :  { %v2491_v27 = vadd.f32 1e-05, %v2485_v17  ;;  %v2484_v44 = vmul.f32 0.03125, %v2468_v4 }
0x122a   :  { %v2490_v10 = vadd.f32 1e-05, %v2484_v44  ;;  %6067 = vrsqrt.f32 %v2491_v27 }
0x122c   :  { %6069 = vrsqrt.f32 %v2490_v10 }
0x122e   :  { %v2477_v30 = vpop.xlane.xlu1 %2476 }
0x122f   :  { %v2487_v63 = vmul.f32 0.03125, %v2477_v30 }
0x1230   :  { %v2474_v5 = vpop.xlane.xlu0 %2473 }
0x1231   :  { %v2493_v12 = vadd.f32 1e-05, %v2487_v63  ;;  %v2486_v24 = vmul.f32 0.03125, %v2474_v5 }
0x1232   :  { %v2483_v22 = vpop.xlane.xlu1 %2482 }
0x1233   :  { %v2492_v35 = vadd.f32 1e-05, %v2486_v24  ;;  %v2489_v6 = vmul.f32 0.03125, %v2483_v22  ;;  %6071 = vrsqrt.f32 %v2493_v12 }
0x1234   :  { %v2480_v58 = vpop.xlane.xlu0 %2479 }
0x1235   :  { %6073 = vrsqrt.f32 %v2492_v35  ;;  %v2495_v13 = vadd.f32 1e-05, %v2489_v6  ;;  %v2488_v32 = vmul.f32 0.03125, %v2480_v58 }
0x1237   :  { %v2494_v59 = vadd.f32 1e-05, %v2488_v32  ;;  %v6068_v37 = vpop.eup %6067  ;;  %6075 = vrsqrt.f32 %v2495_v13 }
0x1238   :  { %v2503_v60 = vmul.f32 %v6068_v37, %v7198_v62  ;;  %v4903_v62 = vld [vmem:[%s8051_s9 + $0x4] sm:$0xf] }
0x1239   :  { %v6070_v2 = vpop.eup %6069  ;;  %6077 = vrsqrt.f32 %v2494_v59 }
0x123a   :  { %v2502_v38 = vmul.f32 %v6070_v2, %v7201_v39  ;;  %v7375_v2 = vld [vmem:[%s8052_s2 + $0x8] sm:$0xff] }
0x123c   :  { %5646 = vmatprep.mubr.msk.f32.mxu0 %vm176_vm1, %v2502_v38 }
0x123d   :  { %5647 = vmatmul.mubr.msk.f32.vlgmr.msra.gmra.mxu0 %vm176_vm1, %v2503_v60 }
0x1240   :  { %v6072_v11 = vpop.eup %6071 }
0x1241   :  { %v2505_v15 = vmul.f32 %v6072_v11, %v7210_v8  ;;  %v2516_v8 = vrot.slane %v4903_v62, %v6440_v46  ;;  %v7381_v11 = vld [vmem:[%s8052_s2] sm:$0xff] }
0x1242   :  { %v6074_v55 = vpop.eup %6073 }
0x1243   :  { %v2504_v61 = vmul.f32 %v6074_v55, %v2456_v3 }
0x1244   :  { %v6076_v1 = vpop.eup %6075 }
0x1245   :  { %5649 = vmatprep.mubr.msk.f32.mxu0 %vm176_vm1, %v2504_v61  ;;  %v2507_v39 = vmul.f32 %v6076_v1, %v7216_v49  ;;  %v7388_v1 = vld [vmem:[%s8052_s2 + $0x18] sm:$0xff] }
0x1246   :  { %v6078_v18 = vpop.eup %6077  ;;  %5650 = vmatmul.mubr.msk.f32.gmra.mxu0 %vm176_vm1, %v2505_v15 }
0x1247   :  { %v2506_v29 = vmul.f32 %v6078_v18, %v2458_v42 }
0x1249   :  { %5652 = vmatprep.mubr.msk.f32.mxu0 %vm176_vm1, %v2506_v29 }
0x124a   :  { %5653 = vmatmul.mubr.msk.f32.gmra.mxu0 %vm176_vm1, %v2507_v39 }
0x12fd   :  { %v5648_v0 = vpop.f32.mrf.mxu0 }
0x12fe   :  { %v7261_v25 = vadd.f32 %v5648_v0, %v2516_v8  ;;  %v7395_v0 = vld [vmem:[%s8052_s2 + $0x10] sm:$0xff] }
0x12ff   :  { %v2601_v26 = vpop.f32.mrf.mxu0 }
0x1300   :  { %v7251_v41 = vadd.f32 %v2601_v26, %v2516_v8  ;;  %v7401_v26 = vld [vmem:[%s8052_s2 + $0x28] sm:$0xff] }
0x1302   :  { %5667 = vmatprep.mubr.msk.f32.mxu0 %vm395_vm2, %v7251_v41 }
0x1306   :  { %v5651_v3 = vpop.f32.mrf.mxu0 }
0x1307   :  { %v7265_v9 = vadd.f32 %v5651_v3, %v2516_v8 }
0x1308   :  { %v2611_v47 = vpop.f32.mrf.mxu0 }
0x1309   :  { %v7271_v42 = vadd.f32 %v2611_v47, %v2516_v8 }
0x130a   :  { %v5654_v50 = vpop.f32.mrf.mxu0 }
0x130b   :  { %v7255_v28 = vadd.f32 %v5654_v50, %v2516_v8 }
0x130c   :  { %v2621_v49 = vpop.f32.mrf.mxu0 }
0x130d   :  { %v7257_v52 = vadd.f32 %v2621_v49, %v2516_v8  ;;  %2646 = vrot.lane.b32.xlu0 %v7255_v28, %s6223_s19 }
0x130f   :  { %2644 = vrot.lane.b32.xlu1 %v7257_v52, %s6223_s19 }
0x1311   :  { %2638 = vrot.lane.b32.xlu0 %v7261_v25, %s6223_s19 }
0x1313   :  { %2642 = vrot.lane.b32.xlu1 %v7265_v9, %s6223_s19 }
0x1315   :  { %2986 = vrot.lane.b32.xlu0 %v7255_v28, %s6225_s21 }
0x1317   :  { %2640 = vrot.lane.b32.xlu1 %v7271_v42, %s6223_s19 }
0x1319   :  { %2982 = vrot.lane.b32.xlu0 %v7265_v9, %s6225_s21 }
0x131b   :  { %2636 = vrot.lane.b32.xlu1 %v7251_v41, %s6223_s19 }
0x131d   :  { %2978 = vrot.lane.b32.xlu0 %v7261_v25, %s6225_s21 }
0x131f   :  { %2984 = vrot.lane.b32.xlu1 %v7257_v52, %s6225_s21 }
0x1321   :  { %2964 = vrot.lane.b32.xlu0 %v7251_v41, %s6226_s12 }
0x1323   :  { %2980 = vrot.lane.b32.xlu1 %v7271_v42, %s6225_s21 }
0x1325   :  { %2968 = vrot.lane.b32.xlu0 %v7271_v42, %s6226_s12 }
0x1327   :  { %2976 = vrot.lane.b32.xlu1 %v7251_v41, %s6225_s21 }
0x1329   :  { %2972 = vrot.lane.b32.xlu0 %v7257_v52, %s6226_s12 }
0x132b   :  { %2966 = vrot.lane.b32.xlu1 %v7261_v25, %s6226_s12 }
0x132d   :  { %2843 = vrot.lane.b32.xlu0 %v7255_v28, %s6224_s20 }
0x132f   :  { %2970 = vrot.lane.b32.xlu1 %v7265_v9, %s6226_s12 }
0x1331   :  { %2835 = vrot.lane.b32.xlu0 %v7261_v25, %s6224_s20 }
0x1333   :  { %2974 = vrot.lane.b32.xlu1 %v7255_v28, %s6226_s12 }
0x1335   :  { %3183 = vrot.lane.b32.xlu0 %v7255_v28, %s6227_s13 }
0x1337   :  { %2839 = vrot.lane.b32.xlu1 %v7265_v9, %s6224_s20 }
0x1339   :  { %3179 = vrot.lane.b32.xlu0 %v7265_v9, %s6227_s13 }
0x133b   :  { %2837 = vrot.lane.b32.xlu1 %v7271_v42, %s6224_s20 }
0x133d   :  { %3175 = vrot.lane.b32.xlu0 %v7261_v25, %s6227_s13 }
0x133f   :  { %2833 = vrot.lane.b32.xlu1 %v7251_v41, %s6224_s20 }
0x1343   :  { %3177 = vrot.lane.b32.xlu1 %v7271_v42, %s6227_s13 }
0x1347   :  { %3173 = vrot.lane.b32.xlu1 %v7251_v41, %s6227_s13 }
0x134b   :  { %2841 = vrot.lane.b32.xlu1 %v7257_v52, %s6224_s20 }
0x134f   :  { %3181 = vrot.lane.b32.xlu1 %v7257_v52, %s6227_s13 }
0x137f   :  { %v2647_v33 = vpop.permute.xlu0 %2646 }
0x1380   :  { %5655 = vmatprep.subr.msk.mxu0 %vm395_vm2, %v2647_v33 }
0x1381   :  { %5656 = vmatpush3.xpose.msk.msra.mxu0 %vm395_vm2, %v2647_v33  ;;  %v2645_v56 = vpop.permute.xlu1 %2644  ;;  %v7409_v33 = vld [vmem:[%s8052_s2 + $0x20] sm:$0xff] }
0x1382   :  { %5657 = vmatprep.subr.msk.mxu0 %vm395_vm2, %v2645_v56 }
0x1383   :  { %v2639_v19 = vpop.permute.xlu0 %2638 }
0x1385   :  { %5658 = vmatpush3.xpose.msk.msra.mxu0 %vm395_vm2, %v2645_v56  ;;  %v2643_v20 = vpop.permute.xlu1 %2642 }
0x1386   :  { %5659 = vmatprep.subr.msk.mxu0 %vm395_vm2, %v2643_v20 }
0x1387   :  { %v2987_v53 = vpop.permute.xlu0 %2986 }
0x1389   :  { %5660 = vmatpush3.xpose.msk.msra.mxu0 %vm395_vm2, %v2643_v20  ;;  %v2641_v54 = vpop.permute.xlu1 %2640 }
0x138a   :  { %5661 = vmatprep.subr.msk.mxu0 %vm395_vm2, %v2641_v54 }
0x138b   :  { %v2983_v23 = vpop.permute.xlu0 %2982 }
0x138d   :  { %5662 = vmatpush3.xpose.msk.msra.mxu0 %vm395_vm2, %v2641_v54  ;;  %v2637_v34 = vpop.permute.xlu1 %2636 }
0x138e   :  { %5663 = vmatprep.subr.msk.mxu0 %vm395_vm2, %v2639_v19 }
0x138f   :  { %v2979_v48 = vpop.permute.xlu0 %2978 }
0x1391   :  { %5664 = vmatpush3.xpose.msk.msra.mxu0 %vm395_vm2, %v2639_v19  ;;  %v2985_v16 = vpop.permute.xlu1 %2984 }
0x1392   :  { %5665 = vmatprep.subr.msk.mxu0 %vm395_vm2, %v2637_v34 }
0x1393   :  { %v2965_v17 = vpop.permute.xlu0 %2964 }
0x1395   :  { %5666 = vmatpush3.xpose.msk.msra.mxu0 %vm395_vm2, %v2637_v34  ;;  %v2981_v4 = vpop.permute.xlu1 %2980 }
0x1396   :  { %5697 = vmatprep.subr.msk.mxu0 %vm395_vm2, %v2987_v53 }
0x1397   :  { %v2969_v27 = vpop.permute.xlu0 %2968 }
0x1398   :  { %5668 = vmatmul.mubr.msk.f32.vlgmr.msra.gmra.mxu0 %vm395_vm2, %v7261_v25 }
0x1399   :  { %5670 = vmatprep.mubr.msk.f32.mxu0 %vm395_vm2, %v7271_v42  ;;  %5698 = vmatpush3.xpose.msk.msra.mxu0 %vm395_vm2, %v2987_v53  ;;  %v2977_v44 = vpop.permute.xlu1 %2976 }
0x139a   :  { %5699 = vmatprep.subr.msk.mxu0 %vm395_vm2, %v2985_v16 }
0x139b   :  { %v2973_v10 = vpop.permute.xlu0 %2972 }
0x139c   :  { %5671 = vmatmul.mubr.msk.f32.gmra.mxu0 %vm395_vm2, %v7265_v9 }
0x139d   :  { %5673 = vmatprep.mubr.msk.f32.mxu0 %vm395_vm2, %v7257_v52  ;;  %5700 = vmatpush3.xpose.msk.msra.mxu0 %vm395_vm2, %v2985_v16  ;;  %v2967_v30 = vpop.permute.xlu1 %2966 }
0x139e   :  { %5701 = vmatprep.subr.msk.mxu0 %vm395_vm2, %v2983_v23 }
0x139f   :  { %v2844_v63 = vpop.permute.xlu0 %2843 }
0x13a0   :  { %5674 = vmatmul.mubr.msk.f32.gmra.mxu0 %vm395_vm2, %v7255_v28  ;;  %5676 = vmatprep.subr.mxu1 %v2844_v63 }
0x13a1   :  { %5677 = vmatpush3.msra.mxu1 %v2844_v63  ;;  %5702 = vmatpush3.xpose.msk.msra.mxu0 %vm395_vm2, %v2983_v23  ;;  %v2971_v5 = vpop.permute.xlu1 %2970 }
0x13a2   :  { %5709 = vmatprep.mubr.msk.f32.mxu0 %vm395_vm2, %v2965_v17  ;;  %5703 = vmatprep.subr.msk.mxu0 %vm395_vm2, %v2981_v4 }
0x13a3   :  { %v2836_v32 = vpop.permute.xlu0 %2835 }
0x13a5   :  { %5704 = vmatpush3.xpose.msk.msra.mxu0 %vm395_vm2, %v2981_v4  ;;  %v2975_v12 = vpop.permute.xlu1 %2974 }
0x13a6   :  { %5705 = vmatprep.subr.msk.mxu0 %vm395_vm2, %v2979_v48 }
0x13a7   :  { %v7369_v59 = vpop.permute.xlu0 %3183 }
0x13a9   :  { %5706 = vmatpush3.xpose.msk.msra.mxu0 %vm395_vm2, %v2979_v48  ;;  %v2840_v24 = vpop.permute.xlu1 %2839 }
0x13aa   :  { %5707 = vmatprep.subr.msk.mxu0 %vm395_vm2, %v2977_v44 }
0x13ad   :  { %5708 = vmatpush3.xpose.msk.msra.mxu0 %vm395_vm2, %v2977_v44  ;;  %v2838_v22 = vpop.permute.xlu1 %2837 }
0x13b0   :  { %5710 = vmatmul.mubr.msk.f32.vlgmr.msra.gmra.mxu0 %vm395_vm2, %v2967_v30 }
0x13b1   :  { %5712 = vmatprep.mubr.msk.f32.mxu0 %vm395_vm2, %v2969_v27  ;;  %v2834_v35 = vpop.permute.xlu1 %2833 }
0x13b4   :  { %5713 = vmatmul.mubr.msk.f32.gmra.mxu0 %vm395_vm2, %v2971_v5 }
0x13b5   :  { %5715 = vmatprep.mubr.msk.f32.mxu0 %vm395_vm2, %v2973_v10  ;;  %v7364_v6 = vpop.permute.xlu1 %3177 }
0x13b8   :  { %5716 = vmatmul.mubr.msk.f32.gmra.mxu0 %vm395_vm2, %v2975_v12 }
0x13b9   :  { %v7367_v58 = vpop.permute.xlu1 %3173 }
0x13bd   :  { %v2842_v13 = vpop.permute.xlu1 %2841 }
0x13be   :  { %5678 = vmatprep.subr.mxu1 %v2842_v13 }
0x13bf   :  { %5679 = vmatpush3.msra.mxu1 %v2842_v13  ;;  %v7448_v13 = vpop.permute.xlu0 %3179 }
0x13c0   :  { %5680 = vmatprep.subr.mxu1 %v2840_v24 }
0x13c1   :  { %5681 = vmatpush3.msra.mxu1 %v2840_v24 }
0x13c2   :  { %5682 = vmatprep.subr.mxu1 %v2838_v22 }
0x13c3   :  { %5683 = vmatpush3.msra.mxu1 %v2838_v22 }
0x13c4   :  { %5684 = vmatprep.subr.mxu1 %v2836_v32 }
0x13c5   :  { %5685 = vmatpush3.msra.mxu1 %v2836_v32  ;;  %v7450_v32 = vpop.permute.xlu1 %3181 }
0x13c6   :  { %5686 = vmatprep.subr.mxu1 %v2834_v35 }
0x13c7   :  { %5687 = vmatpush3.msra.mxu1 %v2834_v35 }
0x13c8   :  { %5718 = vmatprep.subr.mxu1 %v7369_v59 }
0x1458   :  { %v5669_v37 = vpop.f32.mrf.mxu0 }
0x1459   :  { %v2744_v38 = vadd.f32 %v7375_v2, %v5669_v37  ;;  %v7452_v37 = vpop.permute.xlu0 %3175 }
0x145a   :  { %v2738_v60 = vpop.f32.mrf.mxu0 }
0x145b   :  { %v2739_v55 = vadd.f32 %v7381_v11, %v2738_v60  ;;  %v2770_v61 = vsel %vm515_vm3, %v2744_v38, -inf }
0x145c   :  { %2771 = vmax.xlane.f32.xlu1 %v2770_v61  ;;  %v5672_v15 = vpop.f32.mrf.mxu0 }
0x145d   :  { %v2754_v18 = vadd.f32 %v7388_v1, %v5672_v15  ;;  %v2767_v29 = vsel %vm515_vm3, %v2739_v55, -inf }
0x145e   :  { %v2748_v39 = vpop.f32.mrf.mxu0  ;;  %2768 = vmax.xlane.f32.xlu0 %v2767_v29 }
0x145f   :  { %v2749_v8 = vadd.f32 %v7395_v0, %v2748_v39  ;;  %v2776_v47 = vsel %vm515_vm3, %v2754_v18, -inf }
0x1460   :  { %v5675_v62 = vpop.f32.mrf.mxu0 }
0x1461   :  { %v2764_v3 = vadd.f32 %v7401_v26, %v5675_v62  ;;  %v2773_v19 = vsel %vm515_vm3, %v2749_v8, -inf }
0x1462   :  { %v2758_v50 = vpop.f32.mrf.mxu0  ;;  %2777 = vmax.xlane.f32.xlu0 %v2776_v47 }
0x1463   :  { %v2782_v49 = vsel %vm515_vm3, %v2764_v3, -inf  ;;  %v2759_v56 = vadd.f32 %v7409_v33, %v2758_v50 }
0x1464   :  { %2783 = vmax.xlane.f32.xlu1 %v2782_v49 }
0x1465   :  { %v2779_v20 = vsel %vm515_vm3, %v2759_v56, -inf }
0x1466   :  { %2774 = vmax.xlane.f32.xlu0 %v2773_v19 }
0x146a   :  { %2780 = vmax.xlane.f32.xlu0 %v2779_v20 }
0x1470   :  { %v5711_v53 = vpop.f32.mrf.mxu0 }
0x1471   :  { %v7415_v54 = vadd.f32 %v7375_v2, %v5711_v53 }
0x1472   :  { %v3078_v23 = vpop.f32.mrf.mxu0 }
0x1473   :  { %v7418_v34 = vadd.f32 %v7381_v11, %v3078_v23  ;;  %v3110_v48 = vsel %vm515_vm3, %v7415_v54, -inf }
0x1474   :  { %3111 = vmax.xlane.f32.xlu1 %v3110_v48  ;;  %v5714_v16 = vpop.f32.mrf.mxu0 }
0x1475   :  { %v7423_v17 = vadd.f32 %v7388_v1, %v5714_v16  ;;  %v3107_v4 = vsel %vm515_vm3, %v7418_v34, -inf }
0x1476   :  { %3108 = vmax.xlane.f32.xlu0 %v3107_v4  ;;  %v3088_v27 = vpop.f32.mrf.mxu0 }
0x1477   :  { %v7428_v44 = vadd.f32 %v7395_v0, %v3088_v27  ;;  %v3116_v10 = vsel %vm515_vm3, %v7423_v17, -inf }
0x1478   :  { %3117 = vmax.xlane.f32.xlu1 %v3116_v10  ;;  %v5717_v30 = vpop.f32.mrf.mxu0 }
0x1479   :  { %v7433_v63 = vadd.f32 %v7401_v26, %v5717_v30  ;;  %v3113_v5 = vsel %vm515_vm3, %v7428_v44, -inf }
0x147a   :  { %3114 = vmax.xlane.f32.xlu0 %v3113_v5  ;;  %v3098_v12 = vpop.f32.mrf.mxu0 }
0x147b   :  { %v7438_v24 = vadd.f32 %v7409_v33, %v3098_v12  ;;  %v3122_v22 = vsel %vm515_vm3, %v7433_v63, -inf }
0x147c   :  { %3123 = vmax.xlane.f32.xlu1 %v3122_v22 }
0x147d   :  { %v3119_v35 = vsel %vm515_vm3, %v7438_v24, -inf }
0x147e   :  { %3120 = vmax.xlane.f32.xlu0 %v3119_v35 }
0x148d   :  { %3324 = vrot.lane.b32.xlu1 %v7257_v52, %s6228_s14 }
0x1494   :  { %3326 = vrot.lane.b32.xlu0 %v7255_v28, %s6228_s14 }
0x14e5   :  { %v2772_v60 = vpop.xlane.xlu1 %2771 }
0x14e6   :  { %v2786_v61 = vsub.f32 %v2744_v38, %v2772_v60 }
0x14e7   :  { %v2769_v15 = vpop.xlane.xlu0 %2768 }
0x14e8   :  { %v2793_v29 = vmul.f32 1.442695, %v2786_v61  ;;  %v2785_v39 = vsub.f32 %v2739_v55, %v2769_v15 }
0x14ea   :  { %6079 = vpow2.f32 %v2793_v29  ;;  %v2791_v62 = vmul.f32 1.442695, %v2785_v39 }
0x14eb   :  { %v2778_v47 = vpop.xlane.xlu0 %2777 }
0x14ec   :  { %6081 = vpow2.f32 %v2791_v62  ;;  %v2788_v50 = vsub.f32 %v2754_v18, %v2778_v47 }
0x14ed   :  { %v2784_v49 = vpop.xlane.xlu1 %2783 }
0x14ee   :  { %v2797_v19 = vmul.f32 1.442695, %v2788_v50  ;;  %v2790_v20 = vsub.f32 %v2764_v3, %v2784_v49 }
0x14ef   :  { %v2775_v53 = vpop.xlane.xlu0 %2774 }
0x14f0   :  { %6083 = vpow2.f32 %v2797_v19  ;;  %v2801_v23 = vmul.f32 1.442695, %v2790_v20  ;;  %v2787_v48 = vsub.f32 %v2749_v8, %v2775_v53 }
0x14f2   :  { %6085 = vpow2.f32 %v2801_v23  ;;  %v2795_v16 = vmul.f32 1.442695, %v2787_v48 }
0x14f3   :  { %v2781_v4 = vpop.xlane.xlu0 %2780 }
0x14f4   :  { %6087 = vpow2.f32 %v2795_v16  ;;  %v2789_v38 = vsub.f32 %v2759_v56, %v2781_v4 }
0x14f6   :  { %v2799_v27 = vmul.f32 1.442695, %v2789_v38 }
0x14f7   :  { %v7454_v10 = vpop.eup %6079 }
0x14f8   :  { %6089 = vpow2.f32 %v2799_v27  ;;  %v2806_v55 = vsel %vm515_vm3, %v7454_v10, 0.0 }
0x14f9   :  { %v7458_v18 = vpop.eup %6081  ;;  %2807 = vadd.xlane.f32.xlu1 %v2806_v55 }
0x14fa   :  { %v2803_v3 = vsel %vm515_vm3, %v7458_v18, 0.0 }
0x14fb   :  { %2804 = vadd.xlane.f32.xlu0 %v2803_v3 }
0x14fd   :  { %v7462_v8 = vpop.eup %6083  ;;  %v3112_v30 = vpop.xlane.xlu1 %3111 }
0x14fe   :  { %v3126_v5 = vsub.f32 %v7415_v54, %v3112_v30  ;;  %v2812_v56 = vsel %vm515_vm3, %v7462_v8, 0.0 }
0x14ff   :  { %v7467_v12 = vpop.eup %6085  ;;  %v3109_v22 = vpop.xlane.xlu0 %3108  ;;  %2813 = vadd.xlane.f32.xlu1 %v2812_v56 }
0x1500   :  { %v3133_v35 = vmul.f32 1.442695, %v3126_v5  ;;  %v3125_v60 = vsub.f32 %v7418_v34, %v3109_v22  ;;  %v2818_v54 = vsel %vm515_vm3, %v7467_v12, 0.0 }
0x1501   :  { %v7470_v61 = vpop.eup %6087  ;;  %v3118_v19 = vpop.xlane.xlu1 %3117 }
0x1502   :  { %6091 = vpow2.f32 %v3133_v35  ;;  %v3131_v15 = vmul.f32 1.442695, %v3125_v60  ;;  %v2809_v29 = vsel %vm515_vm3, %v7470_v61, 0.0  ;;  %v3128_v53 = vsub.f32 %v7423_v17, %v3118_v19 }
0x1503   :  { %2810 = vadd.xlane.f32.xlu0 %v2809_v29  ;;  %2819 = vadd.xlane.f32.xlu1 %v2818_v54  ;;  %v3115_v20 = vpop.xlane.xlu0 %3114 }
0x1504   :  { %6093 = vpow2.f32 %v3131_v15  ;;  %v3127_v48 = vsub.f32 %v7428_v44, %v3115_v20  ;;  %v3137_v4 = vmul.f32 1.442695, %v3128_v53 }
0x1505   :  { %v7476_v39 = vpop.eup %6089  ;;  %v3124_v23 = vpop.xlane.xlu1 %3123 }
0x1506   :  { %v2815_v62 = vsel %vm515_vm3, %v7476_v39, 0.0  ;;  %v3130_v38 = vsub.f32 %v7433_v63, %v3124_v23  ;;  %v3135_v27 = vmul.f32 1.442695, %v3127_v48  ;;  %6095 = vpow2.f32 %v3137_v4 }
0x1507   :  { %2816 = vadd.xlane.f32.xlu0 %v2815_v62  ;;  %v3121_v16 = vpop.xlane.xlu0 %3120 }
0x1508   :  { %v3129_v55 = vsub.f32 %v7438_v24, %v3121_v16  ;;  %v3141_v3 = vmul.f32 1.442695, %v3130_v38  ;;  %6097 = vpow2.f32 %v3135_v27 }
0x1509   :  { %v3325_v60 = vpop.permute.xlu1 %3324 }
0x150a   :  { %v3139_v30 = vmul.f32 1.442695, %v3129_v55  ;;  %6099 = vpow2.f32 %v3141_v3 }
0x150b   :  { %v3327_v15 = vpop.permute.xlu0 %3326 }
0x150c   :  { %6101 = vpow2.f32 %v3139_v30 }
0x150f   :  { %v7480_v34 = vpop.eup %6091 }
0x1510   :  { %v3146_v47 = vsel %vm515_vm3, %v7480_v34, 0.0 }
0x1511   :  { %v7484_v50 = vpop.eup %6093  ;;  %3147 = vadd.xlane.f32.xlu1 %v3146_v47 }
0x1512   :  { %v3143_v49 = vsel %vm515_vm3, %v7484_v50, 0.0 }
0x1513   :  { %3144 = vadd.xlane.f32.xlu0 %v3143_v49  ;;  %v7496_v5 = vpop.eup %6095 }
0x1514   :  { %v3152_v17 = vsel %vm515_vm3, %v7496_v5, 0.0 }
0x1515   :  { %v7498_v56 = vpop.eup %6097 }
0x1516   :  { %v3149_v63 = vsel %vm515_vm3, %v7498_v56, 0.0 }
0x1517   :  { %v7502_v44 = vpop.eup %6099 }
0x1518   :  { %v3158_v22 = vsel %vm515_vm3, %v7502_v44, 0.0 }
0x1519   :  { %v7506_v24 = vpop.eup %6101 }
0x151a   :  { %v3155_v35 = vsel %vm515_vm3, %v7506_v24, 0.0 }
0x1522   :  { %3320 = vrot.lane.b32.xlu1 %v7271_v42, %s6228_s14 }
0x1529   :  { %3322 = vrot.lane.b32.xlu0 %v7265_v9, %s6228_s14 }
0x1546   :  { %3153 = vadd.xlane.f32.xlu1 %v3152_v17 }
0x1548   :  { %3150 = vadd.xlane.f32.xlu0 %v3149_v63 }
0x154a   :  { %3159 = vadd.xlane.f32.xlu1 %v3158_v22 }
0x154c   :  { %3156 = vadd.xlane.f32.xlu0 %v3155_v35 }
0x155b   :  { %3316 = vrot.lane.b32.xlu1 %v7251_v41, %s6228_s14 }
0x155f   :  { %3306 = vrot.lane.b32.xlu1 %v7261_v25, %s6229_s15 }
0x1562   :  { %3318 = vrot.lane.b32.xlu0 %v7261_v25, %s6228_s14 }
0x1563   :  { %3310 = vrot.lane.b32.xlu1 %v7265_v9, %s6229_s15 }
0x1566   :  { %3304 = vrot.lane.b32.xlu0 %v7251_v41, %s6229_s15 }
0x1567   :  { %3314 = vrot.lane.b32.xlu1 %v7255_v28, %s6229_s15 }
0x156a   :  { %3308 = vrot.lane.b32.xlu0 %v7271_v42, %s6229_s15 }
0x156b   :  { %3521 = vrot.lane.b32.xlu1 %v7257_v52, %s6230_s16 }
0x156e   :  { %3312 = vrot.lane.b32.xlu0 %v7257_v52, %s6229_s15 }
0x156f   :  { %3517 = vrot.lane.b32.xlu1 %v7271_v42, %s6230_s16 }
0x1572   :  { %3523 = vrot.lane.b32.xlu0 %v7255_v28, %s6230_s16 }
0x1573   :  { %3515 = vrot.lane.b32.xlu1 %v7261_v25, %s6230_s16 }
0x1576   :  { %3519 = vrot.lane.b32.xlu0 %v7265_v9, %s6230_s16 }
0x1577   :  { %3513 = vrot.lane.b32.xlu1 %v7251_v41, %s6230_s16 }
0x157a   :  { %3666 = vrot.lane.b32.xlu0 %v7255_v28, %s6231_s3 }
0x157b   :  { %3664 = vrot.lane.b32.xlu1 %v7257_v52, %s6231_s3 }
0x1582   :  { %v2808_v29 = vpop.xlane.xlu1 %2807 }
0x1583   :  { %6103 = vrcp.f32 %v2808_v29 }
0x1584   :  { %v2805_v54 = vpop.xlane.xlu0 %2804 }
0x1585   :  { %6105 = vrcp.f32 %v2805_v54 }
0x1588   :  { %v2814_v62 = vpop.xlane.xlu1 %2813 }
0x1589   :  { %6107 = vrcp.f32 %v2814_v62 }
0x158c   :  { %v2811_v47 = vpop.xlane.xlu0 %2810  ;;  %v2820_v49 = vpop.xlane.xlu1 %2819 }
0x158d   :  { %6109 = vrcp.f32 %v2811_v47 }
0x158e   :  { %6111 = vrcp.f32 %v2820_v49 }
0x1590   :  { %v2817_v19 = vpop.xlane.xlu0 %2816  ;;  %v6104_v20 = vpop.eup %6103 }
0x1591   :  { %6113 = vrcp.f32 %v2817_v19  ;;  %v2828_v48 = vmul.f32 %v6104_v20, %v7454_v10 }
0x1592   :  { %v6106_v53 = vpop.eup %6105 }
0x1593   :  { %v2827_v23 = vmul.f32 %v6106_v53, %v7458_v18 }
0x1595   :  { %5688 = vmatprep.mubr.msk.f32.mxu1 %vm515_vm3, %v2827_v23 }
0x1596   :  { %5689 = vmatmul.mubr.msk.f32.vlgmr.msra.gmra.mxu1 %vm515_vm3, %v2828_v48  ;;  %v6108_v16 = vpop.eup %6107 }
0x1597   :  { %5719 = vmatpush3.msra.mxu1 %v7369_v59  ;;  %v2830_v27 = vmul.f32 %v6108_v16, %v7462_v8 }
0x1598   :  { %5720 = vmatprep.subr.mxu1 %v7450_v32 }
0x1599   :  { %5721 = vmatpush3.msra.mxu1 %v7450_v32 }
0x159a   :  { %v6110_v4 = vpop.eup %6109  ;;  %5722 = vmatprep.subr.mxu1 %v7448_v13  ;;  %v3148_v38 = vpop.xlane.xlu1 %3147 }
0x159b   :  { %5723 = vmatpush3.msra.mxu1 %v7448_v13  ;;  %v2829_v18 = vmul.f32 %v6110_v4, %v7470_v61  ;;  %6115 = vrcp.f32 %v3148_v38  ;;  %v6112_v59 = vpop.eup %6111 }
0x159c   :  { %5724 = vmatprep.subr.mxu1 %v7364_v6  ;;  %v3145_v10 = vpop.xlane.xlu0 %3144  ;;  %v2832_v61 = vmul.f32 %v6112_v59, %v7467_v12 }
0x159d   :  { %6117 = vrcp.f32 %v3145_v10  ;;  %5725 = vmatpush3.msra.mxu1 %v7364_v6  ;;  %5691 = vmatprep.mubr.msk.f32.mxu1 %vm515_vm3, %v2829_v18 }
0x159e   :  { %v6114_v32 = vpop.eup %6113  ;;  %5726 = vmatprep.subr.mxu1 %v7452_v37  ;;  %5692 = vmatmul.mubr.msk.f32.gmra.mxu1 %vm515_vm3, %v2830_v27  ;;  %v3321_v12 = vpop.permute.xlu1 %3320 }
0x159f   :  { %5727 = vmatpush3.msra.mxu1 %v7452_v37  ;;  %v2831_v13 = vmul.f32 %v6114_v32, %v7476_v39 }
0x15a0   :  { %5728 = vmatprep.subr.mxu1 %v7367_v58 }
0x15a1   :  { %5729 = vmatpush3.msra.mxu1 %v7367_v58  ;;  %5694 = vmatprep.mubr.msk.f32.mxu1 %vm515_vm3, %v2831_v13  ;;  %v3323_v58 = vpop.permute.xlu0 %3322 }
0x15a2   :  { %5739 = vmatprep.subr.msk.mxu1 %vm395_vm2, %v3327_v15  ;;  %5695 = vmatmul.mubr.msk.f32.gmra.mxu1 %vm515_vm3, %v2832_v61 }
0x15a8   :  { %v6116_v6 = vpop.eup %6115 }
0x15a9   :  { %v3168_v37 = vmul.f32 %v6116_v6, %v7480_v34 }
0x15aa   :  { %v6118_v8 = vpop.eup %6117 }
0x15ab   :  { %v3167_v55 = vmul.f32 %v6118_v8, %v7484_v50 }
0x15ad   :  { %5730 = vmatprep.mubr.msk.f32.mxu1 %vm515_vm3, %v3167_v55 }
0x15ae   :  { %5731 = vmatmul.mubr.msk.f32.vlgmr.msra.gmra.mxu1 %vm515_vm3, %v3168_v37 }
0x15af   :  { %5740 = vmatpush3.xpose.msk.msra.mxu1 %vm395_vm2, %v3327_v15 }
0x15b0   :  { %5741 = vmatprep.subr.msk.mxu1 %vm395_vm2, %v3325_v60 }
0x15b3   :  { %5742 = vmatpush3.xpose.msk.msra.mxu1 %vm395_vm2, %v3325_v60 }
0x15b4   :  { %5743 = vmatprep.subr.msk.mxu1 %vm395_vm2, %v3323_v58 }
0x15b7   :  { %5744 = vmatpush3.xpose.msk.msra.mxu1 %vm395_vm2, %v3323_v58 }
0x15b8   :  { %5745 = vmatprep.subr.msk.mxu1 %vm395_vm2, %v3321_v12 }
0x15bb   :  { %5746 = vmatpush3.xpose.msk.msra.mxu1 %vm395_vm2, %v3321_v12 }
0x15cf   :  { %v3154_v39 = vpop.xlane.xlu1 %3153 }
0x15d0   :  { %6119 = vrcp.f32 %v3154_v39 }
0x15d1   :  { %v3151_v34 = vpop.xlane.xlu0 %3150 }
0x15d2   :  { %6121 = vrcp.f32 %v3151_v34 }
0x15d3   :  { %v3160_v50 = vpop.xlane.xlu1 %3159 }
0x15d4   :  { %6123 = vrcp.f32 %v3160_v50 }
0x15d5   :  { %v3157_v3 = vpop.xlane.xlu0 %3156 }
0x15d6   :  { %6125 = vrcp.f32 %v3157_v3 }
0x15d7   :  { %v3317_v30 = vpop.permute.xlu1 %3316 }
0x15d9   :  { %v3319_v17 = vpop.permute.xlu0 %3318 }
0x15da   :  { %5747 = vmatprep.subr.msk.mxu1 %vm395_vm2, %v3319_v17 }
0x15db   :  { %5748 = vmatpush3.xpose.msk.msra.mxu1 %vm395_vm2, %v3319_v17  ;;  %v3307_v63 = vpop.permute.xlu1 %3306 }
0x15dc   :  { %5749 = vmatprep.subr.msk.mxu1 %vm395_vm2, %v3317_v30 }
0x15dd   :  { %v3305_v22 = vpop.permute.xlu0 %3304  ;;  %v6120_v35 = vpop.eup %6119 }
0x15de   :  { %v3170_v62 = vmul.f32 %v6120_v35, %v7496_v5 }
0x15df   :  { %v6122_v60 = vpop.eup %6121  ;;  %5750 = vmatpush3.xpose.msk.msra.mxu1 %vm395_vm2, %v3317_v30  ;;  %v3311_v15 = vpop.permute.xlu1 %3310 }
0x15e0   :  { %v3169_v29 = vmul.f32 %v6122_v60, %v7498_v56 }
0x15e1   :  { %v3309_v54 = vpop.permute.xlu0 %3308  ;;  %v6124_v47 = vpop.eup %6123 }
0x15e2   :  { %5733 = vmatprep.mubr.msk.f32.mxu1 %vm515_vm3, %v3169_v29  ;;  %v3172_v23 = vmul.f32 %v6124_v47, %v7502_v44 }
0x15e3   :  { %v6126_v49 = vpop.eup %6125  ;;  %5734 = vmatmul.mubr.msk.f32.gmra.mxu1 %vm515_vm3, %v3170_v62  ;;  %v3315_v19 = vpop.permute.xlu1 %3314 }
0x15e4   :  { %v3171_v20 = vmul.f32 %v6126_v49, %v7506_v24 }
0x15e5   :  { %v3313_v53 = vpop.permute.xlu0 %3312 }
0x15e6   :  { %5736 = vmatprep.mubr.msk.f32.mxu1 %vm515_vm3, %v3171_v20 }
0x15e7   :  { %5737 = vmatmul.mubr.msk.f32.gmra.mxu1 %vm515_vm3, %v3172_v23  ;;  %v3522_v56 = vpop.permute.xlu1 %3521 }
0x15e8   :  { %5751 = vmatprep.mubr.msk.f32.mxu1 %vm395_vm2, %v3305_v22 }
0x15e9   :  { %v3524_v5 = vpop.permute.xlu0 %3523 }
0x15ea   :  { %5760 = vmatprep.subr.mxu0 %v3524_v5 }
0x15eb   :  { %5752 = vmatmul.mubr.msk.f32.vlgmr.msra.gmra.mxu1 %vm395_vm2, %v3307_v63  ;;  %5761 = vmatpush3.msra.mxu0 %v3524_v5  ;;  %v3518_v48 = vpop.permute.xlu1 %3517 }
0x15ec   :  { %5754 = vmatprep.mubr.msk.f32.mxu1 %vm395_vm2, %v3309_v54  ;;  %5762 = vmatprep.subr.mxu0 %v3522_v56 }
0x15ed   :  { %v3520_v24 = vpop.permute.xlu0 %3519  ;;  %5763 = vmatpush3.msra.mxu0 %v3522_v56 }
0x15ee   :  { %5764 = vmatprep.subr.mxu0 %v3520_v24 }
0x15ef   :  { %5755 = vmatmul.mubr.msk.f32.gmra.mxu1 %vm395_vm2, %v3311_v15  ;;  %5765 = vmatpush3.msra.mxu0 %v3520_v24  ;;  %v3516_v44 = vpop.permute.xlu1 %3515 }
0x15f0   :  { %5757 = vmatprep.mubr.msk.f32.mxu1 %vm395_vm2, %v3313_v53  ;;  %5766 = vmatprep.subr.mxu0 %v3518_v48 }
0x15f1   :  { %5767 = vmatpush3.msra.mxu0 %v3518_v48  ;;  %v7597_v4 = vpop.permute.xlu0 %3666 }
0x15f2   :  { %5768 = vmatprep.subr.mxu0 %v3516_v44 }
0x15f3   :  { %5758 = vmatmul.mubr.msk.f32.gmra.mxu1 %vm395_vm2, %v3315_v19  ;;  %5769 = vmatpush3.msra.mxu0 %v3516_v44  ;;  %v3514_v16 = vpop.permute.xlu1 %3513 }
0x15f4   :  { %5770 = vmatprep.subr.mxu0 %v3514_v16 }
0x15f5   :  { %5771 = vmatpush3.msra.mxu0 %v3514_v16 }
0x15f6   :  { %5781 = vmatprep.subr.msk.mxu0 %vm395_vm2, %v7597_v4 }
0x15f7   :  { %v7641_v19 = vpop.permute.xlu1 %3664 }
0x1656   :  { %v7601_v38 = vpop.f32.mrf.mxu1 }
0x1658   :  { %v7603_v18 = vpop.f32.mrf.mxu1 }
0x165e   :  { %v7605_v10 = vpop.f32.mrf.mxu1 }
0x1660   :  { %v7607_v27 = vpop.f32.mrf.mxu1 }
0x1662   :  { %v7609_v59 = vpop.f32.mrf.mxu1 }
0x1664   :  { %v7611_v32 = vpop.f32.mrf.mxu1 }
0x166e   :  { %v7613_v13 = vpop.f32.mrf.mxu1 }
0x1670   :  { %v7615_v61 = vpop.f32.mrf.mxu1 }
0x16a3   :  { %v7617_v6 = vpop.f32.mrf.mxu1 }
0x16a5   :  { %v7619_v8 = vpop.f32.mrf.mxu1 }
0x16a7   :  { %v7621_v55 = vpop.f32.mrf.mxu1 }
0x16a9   :  { %v7623_v37 = vpop.f32.mrf.mxu1 }
0x16ab   :  { %v5753_v58 = vpop.f32.mrf.mxu1 }
0x16ac   :  { %v3424_v12 = vadd.f32 %v7375_v2, %v5753_v58 }
0x16ad   :  { %v3418_v39 = vpop.f32.mrf.mxu1 }
0x16ae   :  { %v3419_v34 = vadd.f32 %v7381_v11, %v3418_v39  ;;  %v3450_v50 = vsel %vm515_vm3, %v3424_v12, -inf }
0x16af   :  { %3451 = vmax.xlane.f32.xlu1 %v3450_v50  ;;  %v5756_v3 = vpop.f32.mrf.mxu1 }
0x16b0   :  { %v3434_v30 = vadd.f32 %v7388_v1, %v5756_v3  ;;  %v3447_v17 = vsel %vm515_vm3, %v3419_v34, -inf }
0x16b1   :  { %3448 = vmax.xlane.f32.xlu0 %v3447_v17  ;;  %v3428_v63 = vpop.f32.mrf.mxu1 }
0x16b2   :  { %v3429_v35 = vadd.f32 %v7395_v0, %v3428_v63  ;;  %v3456_v15 = vsel %vm515_vm3, %v3434_v30, -inf }
0x16b3   :  { %v5759_v22 = vpop.f32.mrf.mxu1 }
0x16b4   :  { %v3444_v60 = vadd.f32 %v7401_v26, %v5759_v22  ;;  %v3453_v47 = vsel %vm515_vm3, %v3429_v35, -inf }
0x16b5   :  { %3457 = vmax.xlane.f32.xlu0 %v3456_v15  ;;  %v3438_v29 = vpop.f32.mrf.mxu1 }
0x16b6   :  { %v3462_v54 = vsel %vm515_vm3, %v3444_v60, -inf  ;;  %v3439_v62 = vadd.f32 %v7409_v33, %v3438_v29 }
0x16b7   :  { %3463 = vmax.xlane.f32.xlu1 %v3462_v54 }
0x16b8   :  { %v3459_v49 = vsel %vm515_vm3, %v3439_v62, -inf }
0x16b9   :  { %3454 = vmax.xlane.f32.xlu0 %v3453_v47 }
0x16bd   :  { %3460 = vmax.xlane.f32.xlu0 %v3459_v49 }
0x16c8   :  { %3660 = vrot.lane.b32.xlu1 %v7271_v42, %s6231_s3 }
0x16d3   :  { %3662 = vrot.lane.b32.xlu0 %v7265_v9, %s6231_s3 }
0x1738   :  { %v3452_v20 = vpop.xlane.xlu1 %3451 }
0x1739   :  { %v3466_v53 = vsub.f32 %v3424_v12, %v3452_v20 }
0x173a   :  { %v3449_v23 = vpop.xlane.xlu0 %3448 }
0x173b   :  { %v3473_v56 = vmul.f32 1.442695, %v3466_v53  ;;  %v3465_v5 = vsub.f32 %v3419_v34, %v3449_v23 }
0x173d   :  { %6127 = vpow2.f32 %v3473_v56  ;;  %v3471_v48 = vmul.f32 1.442695, %v3465_v5 }
0x173e   :  { %v3458_v24 = vpop.xlane.xlu0 %3457 }
0x173f   :  { %6129 = vpow2.f32 %v3471_v48  ;;  %v3468_v44 = vsub.f32 %v3434_v30, %v3458_v24 }
0x1740   :  { %v3464_v54 = vpop.xlane.xlu1 %3463 }
0x1741   :  { %v3477_v16 = vmul.f32 1.442695, %v3468_v44  ;;  %v3470_v47 = vsub.f32 %v3444_v60, %v3464_v54 }
0x1742   :  { %v3455_v58 = vpop.xlane.xlu0 %3454 }
0x1743   :  { %6131 = vpow2.f32 %v3477_v16  ;;  %v3467_v39 = vsub.f32 %v3429_v35, %v3455_v58  ;;  %v3481_v20 = vmul.f32 1.442695, %v3470_v47 }
0x1744   :  { %v3661_v60 = vpop.permute.xlu1 %3660 }
0x1745   :  { %v3475_v50 = vmul.f32 1.442695, %v3467_v39 }
0x1746   :  { %v3461_v35 = vpop.xlane.xlu0 %3460 }
0x1747   :  { %6133 = vpow2.f32 %v3475_v50  ;;  %v3469_v29 = vsub.f32 %v3439_v62, %v3461_v35 }
0x1749   :  { %v3479_v49 = vmul.f32 1.442695, %v3469_v29 }
0x174a   :  { %v6128_v3 = vpop.eup %6127  ;;  %v3663_v62 = vpop.permute.xlu0 %3662 }
0x174b   :  { %v3486_v17 = vsel %vm515_vm3, %v6128_v3, 0.0  ;;  %6135 = vpow2.f32 %v3479_v49 }
0x174c   :  { %v6130_v63 = vpop.eup %6129  ;;  %3487 = vadd.xlane.f32.xlu1 %v3486_v17  ;;  %6137 = vpow2.f32 %v3481_v20 }
0x174d   :  { %v3483_v12 = vsel %vm515_vm3, %v6130_v63, 0.0 }
0x174e   :  { %3484 = vadd.xlane.f32.xlu0 %v3483_v12 }
0x1750   :  { %v6132_v34 = vpop.eup %6131 }
0x1751   :  { %v3492_v22 = vsel %vm515_vm3, %v6132_v34, 0.0 }
0x1752   :  { %3493 = vadd.xlane.f32.xlu1 %v3492_v22 }
0x1754   :  { %v6134_v15 = vpop.eup %6133 }
0x1755   :  { %v3489_v30 = vsel %vm515_vm3, %v6134_v15, 0.0 }
0x1756   :  { %3490 = vadd.xlane.f32.xlu0 %v3489_v30 }
0x1758   :  { %v6136_v53 = vpop.eup %6135 }
0x1759   :  { %v3495_v23 = vsel %vm515_vm3, %v6136_v53, 0.0  ;;  %v6138_v56 = vpop.eup %6137 }
0x175a   :  { %v3498_v5 = vsel %vm515_vm3, %v6138_v56, 0.0 }
0x1763   :  { %3656 = vrot.lane.b32.xlu1 %v7251_v41, %s6231_s3 }
0x176c   :  { %3658 = vrot.lane.b32.xlu0 %v7261_v25, %s6231_s3 }
0x1787   :  { %3496 = vadd.xlane.f32.xlu1 %v3495_v23 }
0x178b   :  { %3499 = vadd.xlane.f32.xlu0 %v3498_v5 }
0x1798   :  { %3646 = vrot.lane.b32.xlu1 %v7261_v25, %s6232_s17 }
0x179c   :  { %3650 = vrot.lane.b32.xlu1 %v7265_v9, %s6232_s17 }
0x17a0   :  { %3654 = vrot.lane.b32.xlu1 %v7255_v28, %s6232_s17 }
0x17a1   :  { %3644 = vrot.lane.b32.xlu0 %v7251_v41, %s6232_s17 }
0x17a5   :  { %3648 = vrot.lane.b32.xlu0 %v7271_v42, %s6232_s17 }
0x17a9   :  { %3652 = vrot.lane.b32.xlu0 %v7257_v52, %s6232_s17 }
0x17d5   :  { %v3488_v48 = vpop.xlane.xlu1 %3487 }
0x17d6   :  { %6139 = vrcp.f32 %v3488_v48 }
0x17d7   :  { %v3485_v24 = vpop.xlane.xlu0 %3484 }
0x17d8   :  { %6141 = vrcp.f32 %v3485_v24 }
0x17db   :  { %v3494_v44 = vpop.xlane.xlu1 %3493 }
0x17dc   :  { %6143 = vrcp.f32 %v3494_v44 }
0x17df   :  { %v3491_v16 = vpop.xlane.xlu0 %3490 }
0x17e0   :  { %6145 = vrcp.f32 %v3491_v16 }
0x17e3   :  { %v6140_v58 = vpop.eup %6139 }
0x17e4   :  { %v3508_v17 = vmul.f32 %v6140_v58, %v6128_v3  ;;  %v3657_v3 = vpop.permute.xlu1 %3656 }
0x17e5   :  { %v6142_v39 = vpop.eup %6141 }
0x17e6   :  { %v3507_v50 = vmul.f32 %v6142_v39, %v6130_v63 }
0x17e8   :  { %5772 = vmatprep.mubr.msk.f32.mxu0 %vm515_vm3, %v3507_v50 }
0x17e9   :  { %5773 = vmatmul.mubr.msk.f32.vlgmr.msra.gmra.mxu0 %vm515_vm3, %v3508_v17  ;;  %v6144_v12 = vpop.eup %6143 }
0x17ea   :  { %5782 = vmatpush3.xpose.msk.msra.mxu0 %vm395_vm2, %v7597_v4  ;;  %v3510_v63 = vmul.f32 %v6144_v12, %v6132_v34  ;;  %v3659_v4 = vpop.permute.xlu0 %3658 }
0x17eb   :  { %5783 = vmatprep.subr.msk.mxu0 %vm395_vm2, %v7641_v19 }
0x17ed   :  { %v6146_v22 = vpop.eup %6145 }
0x17ee   :  { %5784 = vmatpush3.xpose.msk.msra.mxu0 %vm395_vm2, %v7641_v19  ;;  %v3509_v30 = vmul.f32 %v6146_v22, %v6134_v15 }
0x17ef   :  { %5785 = vmatprep.subr.msk.mxu0 %vm395_vm2, %v3663_v62 }
0x17f0   :  { %5775 = vmatprep.mubr.msk.f32.mxu0 %vm515_vm3, %v3509_v30 }
0x17f1   :  { %5776 = vmatmul.mubr.msk.f32.gmra.mxu0 %vm515_vm3, %v3510_v63 }
0x17f2   :  { %5786 = vmatpush3.xpose.msk.msra.mxu0 %vm395_vm2, %v3663_v62 }
0x17f3   :  { %5787 = vmatprep.subr.msk.mxu0 %vm395_vm2, %v3661_v60 }
0x17f6   :  { %5788 = vmatpush3.xpose.msk.msra.mxu0 %vm395_vm2, %v3661_v60 }
0x17f7   :  { %5789 = vmatprep.subr.msk.mxu0 %vm395_vm2, %v3659_v4 }
0x17fa   :  { %5790 = vmatpush3.xpose.msk.msra.mxu0 %vm395_vm2, %v3659_v4 }
0x17fb   :  { %5791 = vmatprep.subr.msk.mxu0 %vm395_vm2, %v3657_v3 }
0x17fe   :  { %5792 = vmatpush3.xpose.msk.msra.mxu0 %vm395_vm2, %v3657_v3 }
0x1810   :  { %v3497_v19 = vpop.xlane.xlu1 %3496 }
0x1811   :  { %6147 = vrcp.f32 %v3497_v19 }
0x1814   :  { %v3500_v34 = vpop.xlane.xlu0 %3499  ;;  %v3647_v49 = vpop.permute.xlu1 %3646 }
0x1815   :  { %6149 = vrcp.f32 %v3500_v34 }
0x1818   :  { %v3645_v29 = vpop.permute.xlu0 %3644  ;;  %v3651_v23 = vpop.permute.xlu1 %3650 }
0x181c   :  { %v3649_v20 = vpop.permute.xlu0 %3648 }
0x181e   :  { %v6148_v15 = vpop.eup %6147 }
0x181f   :  { %v3511_v35 = vmul.f32 %v6148_v15, %v6136_v53  ;;  %v3655_v53 = vpop.permute.xlu1 %3654 }
0x1820   :  { %v3653_v5 = vpop.permute.xlu0 %3652 }
0x1821   :  { %5778 = vmatprep.mubr.msk.f32.mxu0 %vm515_vm3, %v3511_v35 }
0x1822   :  { %v6150_v54 = vpop.eup %6149 }
0x1823   :  { %v3512_v47 = vmul.f32 %v6150_v54, %v6138_v56 }
0x1825   :  { %5779 = vmatmul.mubr.msk.f32.gmra.mxu0 %vm515_vm3, %v3512_v47 }
0x1826   :  { %5793 = vmatprep.mubr.msk.f32.mxu0 %vm395_vm2, %v3645_v29 }
0x1829   :  { %5794 = vmatmul.mubr.msk.f32.vlgmr.msra.gmra.mxu0 %vm395_vm2, %v3647_v49 }
0x182a   :  { %5796 = vmatprep.mubr.msk.f32.mxu0 %vm395_vm2, %v3649_v20 }
0x182d   :  { %5797 = vmatmul.mubr.msk.f32.gmra.mxu0 %vm395_vm2, %v3651_v23 }
0x182e   :  { %5799 = vmatprep.mubr.msk.f32.mxu0 %vm395_vm2, %v3653_v5 }
0x1831   :  { %5800 = vmatmul.mubr.msk.f32.gmra.mxu0 %vm395_vm2, %v3655_v53 }
0x18a9   :  { %v7691_v56 = vpop.f32.mrf.mxu0 }
0x18ab   :  { %v7693_v60 = vpop.f32.mrf.mxu0 }
0x18b1   :  { %v7695_v62 = vpop.f32.mrf.mxu0 }
0x18b3   :  { %v7697_v48 = vpop.f32.mrf.mxu0 }
0x18e5   :  { %v7699_v24 = vpop.f32.mrf.mxu0 }
0x18e7   :  { %v7701_v44 = vpop.f32.mrf.mxu0 }
0x18e9   :  { %v5795_v16 = vpop.f32.mrf.mxu0 }
0x18ea   :  { %v3764_v58 = vadd.f32 %v7375_v2, %v5795_v16 }
0x18eb   :  { %v3758_v39 = vpop.f32.mrf.mxu0 }
0x18ec   :  { %v3759_v50 = vadd.f32 %v7381_v11, %v3758_v39  ;;  %v3790_v17 = vsel %vm515_vm3, %v3764_v58, -inf }
0x18ed   :  { %3791 = vmax.xlane.f32.xlu1 %v3790_v17  ;;  %v5798_v12 = vpop.f32.mrf.mxu0 }
0x18ee   :  { %v3774_v22 = vadd.f32 %v7388_v1, %v5798_v12  ;;  %v3787_v30 = vsel %vm515_vm3, %v3759_v50, -inf }
0x18ef   :  { %3788 = vmax.xlane.f32.xlu0 %v3787_v30  ;;  %v3768_v63 = vpop.f32.mrf.mxu0 }
0x18f0   :  { %v3769_v3 = vadd.f32 %v7395_v0, %v3768_v63  ;;  %v3796_v2 = vsel %vm515_vm3, %v3774_v22, -inf }
0x18f1   :  { %v5801_v4 = vpop.f32.mrf.mxu0 }
0x18f2   :  { %v3784_v19 = vadd.f32 %v7401_v26, %v5801_v4  ;;  %v3793_v1 = vsel %vm515_vm3, %v3769_v3, -inf }
0x18f3   :  { %3797 = vmax.xlane.f32.xlu0 %v3796_v2  ;;  %v3778_v34 = vpop.f32.mrf.mxu0 }
0x18f4   :  { %v3802_v11 = vsel %vm515_vm3, %v3784_v19, -inf  ;;  %v3779_v15 = vadd.f32 %v7409_v33, %v3778_v34 }
0x18f5   :  { %3803 = vmax.xlane.f32.xlu1 %v3802_v11 }
0x18f6   :  { %v3799_v35 = vsel %vm515_vm3, %v3779_v15, -inf }
0x18f7   :  { %3794 = vmax.xlane.f32.xlu0 %v3793_v1 }
0x18fb   :  { %3800 = vmax.xlane.f32.xlu0 %v3799_v35 }
0x1906   :  { %3861 = vrot.lane.b32.xlu1 %v7257_v52, %s6233_s18 }
0x190a   :  { %3859 = vrot.lane.b32.xlu1 %v7265_v9, %s6233_s18 }
0x190e   :  { %3857 = vrot.lane.b32.xlu1 %v7271_v42, %s6233_s18 }
0x1911   :  { %3863 = vrot.lane.b32.xlu0 %v7255_v28, %s6233_s18 }
0x1976   :  { %v3792_v0 = vpop.xlane.xlu1 %3791 }
0x1977   :  { %v3806_v26 = vsub.f32 %v3764_v58, %v3792_v0 }
0x1978   :  { %v3789_v33 = vpop.xlane.xlu0 %3788 }
0x1979   :  { %v3813_v29 = vmul.f32 1.442695, %v3806_v26  ;;  %v3805_v54 = vsub.f32 %v3759_v50, %v3789_v33 }
0x197b   :  { %6151 = vpow2.f32 %v3813_v29  ;;  %v3811_v47 = vmul.f32 1.442695, %v3805_v54 }
0x197c   :  { %v3798_v49 = vpop.xlane.xlu0 %3797 }
0x197d   :  { %6153 = vpow2.f32 %v3811_v47  ;;  %v3808_v20 = vsub.f32 %v3774_v22, %v3798_v49 }
0x197e   :  { %v3804_v52 = vpop.xlane.xlu1 %3803 }
0x197f   :  { %v3817_v23 = vmul.f32 1.442695, %v3808_v20  ;;  %v3810_v5 = vsub.f32 %v3784_v19, %v3804_v52  ;;  %v4989_v20 = vld [vmem:[%s8053_s5 + $0x38] sm:$0xff]  ;;  %v4988_v52 = vld [vmem:[%s8053_s5 + $0x30] sm:$0xff] }
0x1980   :  { %v3795_v9 = vpop.xlane.xlu0 %3794 }
0x1981   :  { %6155 = vpow2.f32 %v3817_v23  ;;  %v3821_v53 = vmul.f32 1.442695, %v3810_v5  ;;  %v3807_v42 = vsub.f32 %v3769_v3, %v3795_v9  ;;  %v4987_v23 = vld [vmem:[%s8053_s5 + $0x28] sm:$0xff]  ;;  %v4986_v5 = vld [vmem:[%s8053_s5 + $0x20] sm:$0xff] }
0x1982   :  { %v3862_v16 = vpop.permute.xlu1 %3861 }
0x1983   :  { %6157 = vpow2.f32 %v3821_v53  ;;  %v3815_v28 = vmul.f32 1.442695, %v3807_v42 }
0x1984   :  { %v3801_v39 = vpop.xlane.xlu0 %3800 }
0x1985   :  { %6159 = vpow2.f32 %v3815_v28  ;;  %v3809_v58 = vsub.f32 %v3779_v15, %v3801_v39 }
0x1986   :  { %v3860_v12 = vpop.permute.xlu1 %3859 }
0x1987   :  { %v3819_v17 = vmul.f32 1.442695, %v3809_v58 }
0x1988   :  { %v7723_v50 = vpop.eup %6151  ;;  %v3864_v30 = vpop.permute.xlu0 %3863 }
0x1989   :  { %6161 = vpow2.f32 %v3819_v17  ;;  %5802 = vmatprep.subr.mxu1 %v3864_v30  ;;  %v3826_v22 = vsel %vm515_vm3, %v7723_v50, 0.0 }
0x198a   :  { %v6154_v63 = vpop.eup %6153  ;;  %5803 = vmatpush3.msra.mxu1 %v3864_v30  ;;  %3827 = vadd.xlane.f32.xlu1 %v3826_v22  ;;  %v3858_v19 = vpop.permute.xlu1 %3857 }
0x198b   :  { %5804 = vmatprep.subr.mxu1 %v3862_v16  ;;  %v3823_v4 = vsel %vm515_vm3, %v6154_v63, 0.0 }
0x198c   :  { %3824 = vadd.xlane.f32.xlu0 %v3823_v4  ;;  %5805 = vmatpush3.msra.mxu1 %v3862_v16 }
0x198d   :  { %5806 = vmatprep.subr.mxu1 %v3860_v12 }
0x198e   :  { %v6156_v3 = vpop.eup %6155  ;;  %5807 = vmatpush3.msra.mxu1 %v3860_v12 }
0x198f   :  { %5808 = vmatprep.subr.mxu1 %v3858_v19  ;;  %v3832_v2 = vsel %vm515_vm3, %v6156_v3, 0.0 }
0x1990   :  { %v6158_v34 = vpop.eup %6157  ;;  %3833 = vadd.xlane.f32.xlu1 %v3832_v2  ;;  %5809 = vmatpush3.msra.mxu1 %v3858_v19 }
0x1991   :  { %v3838_v1 = vsel %vm515_vm3, %v6158_v34, 0.0 }
0x1992   :  { %v6160_v11 = vpop.eup %6159 }
0x1993   :  { %v3829_v15 = vsel %vm515_vm3, %v6160_v11, 0.0 }
0x1994   :  { %3830 = vadd.xlane.f32.xlu0 %v3829_v15  ;;  %3839 = vadd.xlane.f32.xlu1 %v3838_v1 }
0x1996   :  { %v6162_v35 = vpop.eup %6161 }
0x1997   :  { %v3835_v0 = vsel %vm515_vm3, %v6162_v35, 0.0 }
0x1998   :  { %3836 = vadd.xlane.f32.xlu0 %v3835_v0 }
0x19a5   :  { %3853 = vrot.lane.b32.xlu1 %v7251_v41, %s6233_s18 }
0x19a9   :  { %3992 = vrot.lane.b32.xlu1 %v7613_v13, %s6234_s22 }
0x19ad   :  { %4016 = vrot.lane.b32.xlu1 %v7691_v56, %s6235_s23 }
0x19ae   :  { %3855 = vrot.lane.b32.xlu0 %v7261_v25, %s6233_s18 }
0x19b1   :  { %3996 = vrot.lane.b32.xlu1 %v7617_v6, %s6234_s22 }
0x19b2   :  { %3990 = vrot.lane.b32.xlu0 %v7615_v61, %s6234_s22 }
0x19b5   :  { %4020 = vrot.lane.b32.xlu1 %v7695_v62, %s6235_s23 }
0x19b6   :  { %4014 = vrot.lane.b32.xlu0 %v7693_v60, %s6235_s23 }
0x19b9   :  { %4000 = vrot.lane.b32.xlu1 %v7621_v55, %s6234_s22 }
0x19ba   :  { %3994 = vrot.lane.b32.xlu0 %v7619_v8, %s6234_s22 }
0x19bd   :  { %4024 = vrot.lane.b32.xlu1 %v7699_v24, %s6235_s23 }
0x19be   :  { %4018 = vrot.lane.b32.xlu0 %v7697_v48, %s6235_s23 }
0x19c2   :  { %3998 = vrot.lane.b32.xlu0 %v7623_v37, %s6234_s22 }
0x19c6   :  { %4022 = vrot.lane.b32.xlu0 %v7701_v44, %s6235_s23 }
0x1a13   :  { %v3828_v41 = vpop.xlane.xlu1 %3827 }
0x1a15   :  { %v3825_v25 = vpop.xlane.xlu0 %3824 }
0x1a16   :  { %6163 = vrcp.f32 %v3825_v25 }
0x1a17   :  { %6165 = vrcp.f32 %v3828_v41 }
0x1a19   :  { %v3834_v13 = vpop.xlane.xlu1 %3833 }
0x1a1a   :  { %6167 = vrcp.f32 %v3834_v13 }
0x1a1d   :  { %v3831_v61 = vpop.xlane.xlu0 %3830  ;;  %v3840_v6 = vpop.xlane.xlu1 %3839 }
0x1a1e   :  { %6169 = vrcp.f32 %v3831_v61 }
0x1a1f   :  { %6171 = vrcp.f32 %v3840_v6 }
0x1a21   :  { %v3837_v8 = vpop.xlane.xlu0 %3836  ;;  %v3854_v37 = vpop.permute.xlu1 %3853 }
0x1a22   :  { %6173 = vrcp.f32 %v3837_v8 }
0x1a23   :  { %v6164_v55 = vpop.eup %6163 }
0x1a24   :  { %v3847_v56 = vmul.f32 %v6164_v55, %v6154_v63  ;;  %v6166_v60 = vpop.eup %6165 }
0x1a25   :  { %v3856_v62 = vpop.permute.xlu0 %3855  ;;  %v3848_v48 = vmul.f32 %v6166_v60, %v7723_v50  ;;  %v3993_v58 = vpop.permute.xlu1 %3992 }
0x1a26   :  { %5810 = vmatprep.subr.mxu1 %v3856_v62  ;;  %5814 = vmatprep.mubr.msk.f32.mxu1 %vm515_vm3, %v3847_v56  ;;  %v4057_v1 = vsel %vm395_vm2, %v7601_v38, %v3993_v58 }
0x1a27   :  { %5811 = vmatpush3.msra.mxu1 %v3856_v62  ;;  %v6168_v24 = vpop.eup %6167 }
0x1a28   :  { %5812 = vmatprep.subr.mxu1 %v3854_v37  ;;  %v3850_v33 = vmul.f32 %v6168_v24, %v6156_v3 }
0x1a29   :  { %5813 = vmatpush3.msra.mxu1 %v3854_v37  ;;  %v3991_v17 = vpop.permute.xlu0 %3990  ;;  %v4017_v50 = vpop.permute.xlu1 %4016 }
0x1a2a   :  { %5815 = vmatmul.mubr.msk.f32.vlgmr.msra.gmra.mxu1 %vm515_vm3, %v3848_v48  ;;  %5823 = vmatprep.subr.mxu1 %v4989_v20  ;;  %v4056_v15 = vsel %vm395_vm2, %v7603_v18, %v3991_v17  ;;  %v4063_v41 = vsel %vm1811_vm4, %v4057_v1, %v4017_v50 }
0x1a2b   :  { %v6170_v44 = vpop.eup %6169  ;;  %5824 = vmatpush3.msra.mxu1 %v4989_v20 }
0x1a2c   :  { %v3849_v26 = vmul.f32 %v6170_v44, %v6160_v11  ;;  %v6172_v29 = vpop.eup %6171  ;;  %5825 = vmatprep.subr.mxu1 %v4988_v52 }
0x1a2d   :  { %v3852_v49 = vmul.f32 %v6172_v29, %v6158_v34  ;;  %5826 = vmatpush3.msra.mxu1 %v4988_v52  ;;  %v4015_v12 = vpop.permute.xlu0 %4014  ;;  %v3997_v30 = vpop.permute.xlu1 %3996 }
0x1a2e   :  { %5817 = vmatprep.mubr.msk.f32.mxu1 %vm515_vm3, %v3849_v26  ;;  %5827 = vmatprep.subr.mxu1 %v4987_v23  ;;  %v4059_v38 = vsel %vm395_vm2, %v7605_v10, %v3997_v30 }
0x1a2f   :  { %v6174_v54 = vpop.eup %6173  ;;  %5818 = vmatmul.mubr.msk.f32.gmra.mxu1 %vm515_vm3, %v3850_v33 }
0x1a30   :  { %v3851_v47 = vmul.f32 %v6174_v54, %v6162_v35  ;;  %5828 = vmatpush3.msra.mxu1 %v4987_v23  ;;  %v4062_v35 = vsel %vm1811_vm4, %v4056_v15, %v4015_v12 }
0x1a31   :  { %5829 = vmatprep.subr.mxu1 %v4986_v5  ;;  %v3995_v22 = vpop.permute.xlu0 %3994  ;;  %v4021_v63 = vpop.permute.xlu1 %4020 }
0x1a32   :  { %5820 = vmatprep.mubr.msk.f32.mxu1 %vm515_vm3, %v3851_v47  ;;  %5830 = vmatpush3.msra.mxu1 %v4986_v5  ;;  %v4058_v18 = vsel %vm395_vm2, %v7607_v27, %v3995_v22  ;;  %v4065_v55 = vsel %vm1811_vm4, %v4059_v38, %v4021_v63 }
0x1a33   :  { %5821 = vmatmul.mubr.msk.f32.gmra.mxu1 %vm515_vm3, %v3852_v49 }
0x1a35   :  { %v4019_v4 = vpop.permute.xlu0 %4018  ;;  %v4001_v3 = vpop.permute.xlu1 %4000 }
0x1a36   :  { %v4064_v6 = vsel %vm1811_vm4, %v4058_v18, %v4019_v4  ;;  %v4061_v10 = vsel %vm395_vm2, %v7609_v59, %v4001_v3 }
0x1a39   :  { %v3999_v19 = vpop.permute.xlu0 %3998  ;;  %v4025_v2 = vpop.permute.xlu1 %4024 }
0x1a3a   :  { %v4060_v62 = vsel %vm395_vm2, %v7611_v32, %v3999_v19  ;;  %v4067_v24 = vsel %vm1811_vm4, %v4061_v10, %v4025_v2  ;;  %v7818_v32 = vld [vmem:[%s8051_s9 + $0x4] sm:$0xf] }
0x1a3b   :  { %v4082_v59 = vrot.slane %v7818_v32, %v1831_v14 }
0x1a3d   :  { %v4023_v34 = vpop.permute.xlu0 %4022 }
0x1a3e   :  { %v4066_v27 = vsel %vm1811_vm4, %v4060_v62, %v4023_v34 }
0x1aea   :  { %v5816_v9 = vpop.f32.mrf.mxu1 }
0x1aeb   :  { %4040 = vrot.lane.b32.xlu1 %v5816_v9, %s6236_s1 }
0x1aec   :  { %v3955_v53 = vpop.f32.mrf.mxu1 }
0x1aed   :  { %4038 = vrot.lane.b32.xlu0 %v3955_v53, %s6236_s1 }
0x1aef   :  { %v5819_v42 = vpop.f32.mrf.mxu1 }
0x1af0   :  { %4044 = vrot.lane.b32.xlu1 %v5819_v42, %s6236_s1 }
0x1af1   :  { %v3965_v16 = vpop.f32.mrf.mxu1 }
0x1af2   :  { %4042 = vrot.lane.b32.xlu0 %v3965_v16, %s6236_s1 }
0x1af3   :  { %v5822_v28 = vpop.f32.mrf.mxu1 }
0x1af4   :  { %4048 = vrot.lane.b32.xlu1 %v5822_v28, %s6236_s1 }
0x1af5   :  { %v3975_v39 = vpop.f32.mrf.mxu1 }
0x1af6   :  { %4046 = vrot.lane.b32.xlu0 %v3975_v39, %s6236_s1 }
0x1b5d   :  { %v4041_v11 = vpop.permute.xlu1 %4040 }
0x1b5e   :  { %v4069_v13 = vsel %vm1818_vm5, %v4063_v41, %v4041_v11 }
0x1b5f   :  { %v4039_v0 = vpop.permute.xlu0 %4038 }
0x1b60   :  { %v4068_v25 = vsel %vm1818_vm5, %v4062_v35, %v4039_v0 }
0x1b61   :  { %5831 = vmatprep.mubr.msk.f32.mxu1 %vm176_vm1, %v4068_v25 }
0x1b62   :  { %5832 = vmatmul.mubr.msk.f32.vlgmr.msra.gmra.mxu1 %vm176_vm1, %v4069_v13  ;;  %v4045_v61 = vpop.permute.xlu1 %4044 }
0x1b63   :  { %v4071_v60 = vsel %vm1818_vm5, %v4065_v55, %v4045_v61 }
0x1b64   :  { %v4043_v8 = vpop.permute.xlu0 %4042 }
0x1b65   :  { %v4070_v56 = vsel %vm1818_vm5, %v4064_v6, %v4043_v8 }
0x1b66   :  { %5834 = vmatprep.mubr.msk.f32.mxu1 %vm176_vm1, %v4070_v56  ;;  %v4049_v37 = vpop.permute.xlu1 %4048 }
0x1b67   :  { %5835 = vmatmul.mubr.msk.f32.gmra.mxu1 %vm176_vm1, %v4071_v60  ;;  %v4073_v26 = vsel %vm1818_vm5, %v4067_v24, %v4049_v37  ;;  %v4998_v24 = vld [vmem:[%s8054_s6 + $0x30] sm:$0xff] }
0x1b68   :  { %v4047_v48 = vpop.permute.xlu0 %4046 }
0x1b69   :  { %v4072_v44 = vsel %vm1818_vm5, %v4066_v27, %v4047_v48  ;;  %v4999_v48 = vld [vmem:[%s8054_s6 + $0x38] sm:$0xff] }
0x1b6a   :  { %5837 = vmatprep.mubr.msk.f32.mxu1 %vm176_vm1, %v4072_v44  ;;  %5840 = vmatprep.subr.mxu0 %v4999_v48  ;;  %v4997_v44 = vld [vmem:[%s8054_s6 + $0x28] sm:$0xff] }
0x1b6b   :  { %5838 = vmatmul.mubr.msk.f32.gmra.mxu1 %vm176_vm1, %v4073_v26  ;;  %5841 = vmatpush3.msra.mxu0 %v4999_v48  ;;  %v4996_v26 = vld [vmem:[%s8054_s6 + $0x20] sm:$0xff] }
0x1b6c   :  { %5842 = vmatprep.subr.mxu0 %v4998_v24 }
0x1b6d   :  { %5843 = vmatpush3.msra.mxu0 %v4998_v24 }
0x1b6e   :  { %5844 = vmatprep.subr.mxu0 %v4997_v44 }
0x1b6f   :  { %5845 = vmatpush3.msra.mxu0 %v4997_v44 }
0x1b70   :  { %5846 = vmatprep.subr.mxu0 %v4996_v26 }
0x1b71   :  { %5847 = vmatpush3.msra.mxu0 %v4996_v26 }
0x1c22   :  { %v5833_v33 = vpop.f32.mrf.mxu1 }
0x1c23   :  { %v4173_v29 = vadd.f32 %v5833_v33, %v4082_v59 }
0x1c24   :  { %v4167_v54 = vpop.f32.mrf.mxu1 }
0x1c25   :  { %v4197_v47 = vadd.f32 %v4173_v29, %v7168_v43  ;;  %v4168_v49 = vadd.f32 %v4167_v54, %v4082_v59 }
0x1c27   :  { %v4196_v20 = vadd.f32 %v4168_v49, %v7171_v21  ;;  %v5836_v52 = vpop.f32.mrf.mxu1  ;;  %v4205_v23 = vsel %vm176_vm1, %v4197_v47, 0.0 }
0x1c28   :  { %v4183_v5 = vadd.f32 %v5836_v52, %v4082_v59  ;;  %4206 = vadd.xlane.f32.xlu1 %v4205_v23 }
0x1c29   :  { %v4177_v9 = vpop.f32.mrf.mxu1  ;;  %v4202_v53 = vsel %vm176_vm1, %v4196_v20, 0.0 }
0x1c2a   :  { %v4199_v42 = vadd.f32 %v4183_v5, %v7178_v51  ;;  %v4178_v16 = vadd.f32 %v4177_v9, %v4082_v59  ;;  %4203 = vadd.xlane.f32.xlu0 %v4202_v53 }
0x1c2b   :  { %v5839_v14 = vpop.f32.mrf.mxu1 }
0x1c2c   :  { %v4193_v28 = vadd.f32 %v5839_v14, %v4082_v59  ;;  %v4211_v39 = vsel %vm176_vm1, %v4199_v42, 0.0  ;;  %v7830_v43 = vadd.f32 %v4178_v16, %v7181_v7 }
0x1c2d   :  { %v4187_v21 = vpop.f32.mrf.mxu1 }
0x1c2e   :  { %v7833_v58 = vadd.f32 %v4193_v28, %v7186_v31  ;;  %v4188_v17 = vadd.f32 %v4187_v21, %v4082_v59  ;;  %4212 = vadd.xlane.f32.xlu0 %v4211_v39  ;;  %v4208_v12 = vsel %vm176_vm1, %v7830_v43, 0.0 }
0x1c30   :  { %v4217_v50 = vsel %vm176_vm1, %v7833_v58, 0.0  ;;  %v4200_v51 = vadd.f32 %v4188_v17, %v7191_v57 }
0x1c31   :  { %4218 = vadd.xlane.f32.xlu1 %v4217_v50 }
0x1c32   :  { %4209 = vadd.xlane.f32.xlu0 %v4208_v12  ;;  %v4214_v30 = vsel %vm176_vm1, %v4200_v51, 0.0 }
0x1c36   :  { %4215 = vadd.xlane.f32.xlu0 %v4214_v30 }
0x1cb1   :  { %v4207_v7 = vpop.xlane.xlu1 %4206 }
0x1cb2   :  { %v4221_v22 = vmul.f32 0.03125, %v4207_v7 }
0x1cb3   :  { %v4204_v63 = vpop.xlane.xlu0 %4203 }
0x1cb4   :  { %v7841_v31 = vsub.f32 %v4197_v47, %v4221_v22  ;;  %v4220_v4 = vmul.f32 0.03125, %v4204_v63 }
0x1cb6   :  { %v7843_v3 = vsub.f32 %v4196_v20, %v4220_v4  ;;  %v4233_v19 = vmul.f32 %v7841_v31, %v7841_v31 }
0x1cb7   :  { %v4213_v57 = vpop.xlane.xlu0 %4212 }
0x1cb8   :  { %v4223_v2 = vmul.f32 0.03125, %v4213_v57  ;;  %v4241_v34 = vsel %vm176_vm1, %v4233_v19, 0.0  ;;  %v4232_v11 = vmul.f32 %v7843_v3, %v7843_v3 }
0x1cb9   :  { %4242 = vadd.xlane.f32.xlu1 %v4241_v34  ;;  %v5031_v34 = vld [vmem:[%s8055_s7 + $0xe8] sm:$0xff] }
0x1cba   :  { %v7850_v15 = vsub.f32 %v4199_v42, %v4223_v2  ;;  %v4219_v1 = vpop.xlane.xlu1 %4218  ;;  %v4238_v35 = vsel %vm176_vm1, %v4232_v11, 0.0  ;;  %v5032_v2 = vld [vmem:[%s8055_s7 + $0xf0] sm:$0xff]  ;;  %v5030_v11 = vld [vmem:[%s8055_s7 + $0xe0] sm:$0xff] }
0x1cbb   :  { %v4225_v0 = vmul.f32 0.03125, %v4219_v1  ;;  %v4210_v41 = vpop.xlane.xlu0 %4209  ;;  %4239 = vadd.xlane.f32.xlu0 %v4238_v35  ;;  %v5028_v1 = vld [vmem:[%s8055_s7 + $0xd0] sm:$0xff]  ;;  %v5027_v35 = vld [vmem:[%s8055_s7 + $0xc8] sm:$0xff] }
0x1cbc   :  { %v4222_v25 = vmul.f32 0.03125, %v4210_v41  ;;  %v4235_v13 = vmul.f32 %v7850_v15, %v7850_v15  ;;  %v5025_v41 = vld [vmem:[%s8055_s7 + $0xb8] sm:$0xff] }
0x1cbd   :  { %v7856_v61 = vsub.f32 %v7833_v58, %v4225_v0  ;;  %v5026_v0 = vld [vmem:[%s8055_s7 + $0xc0] sm:$0xff] }
0x1cbe   :  { %v4228_v18 = vsub.f32 %v7830_v43, %v4222_v25  ;;  %v4247_v38 = vsel %vm176_vm1, %v4235_v13, 0.0  ;;  %v5024_v25 = vld [vmem:[%s8055_s7 + $0xb0] sm:$0xff]  ;;  %v5023_v13 = vld [vmem:[%s8055_s7 + $0xa8] sm:$0xff] }
0x1cbf   :  { %v4216_v6 = vpop.xlane.xlu0 %4215  ;;  %4248 = vadd.xlane.f32.xlu1 %v4247_v38  ;;  %v4237_v8 = vmul.f32 %v7856_v61, %v7856_v61  ;;  %v5020_v38 = vld [vmem:[%s8055_s7 + $0x90] sm:$0xff] }
0x1cc0   :  { %v4224_v55 = vmul.f32 0.03125, %v4216_v6  ;;  %v4234_v56 = vmul.f32 %v4228_v18, %v4228_v18  ;;  %v5019_v6 = vld [vmem:[%s8055_s7 + $0x88] sm:$0xff] }
0x1cc1   :  { %v4253_v60 = vsel %vm176_vm1, %v4237_v8, 0.0  ;;  %v5018_v8 = vld [vmem:[%s8055_s7 + $0x80] sm:$0xff] }
0x1cc2   :  { %v4230_v62 = vsub.f32 %v4200_v51, %v4224_v55  ;;  %v4244_v37 = vsel %vm176_vm1, %v4234_v56, 0.0  ;;  %v4288_v55 = vrot.slane %v7818_v32, %v2036_v36 }
0x1cc3   :  { %4245 = vadd.xlane.f32.xlu0 %v4244_v37  ;;  %4254 = vadd.xlane.f32.xlu1 %v4253_v60 }
0x1cc4   :  { %v4236_v10 = vmul.f32 %v4230_v62, %v4230_v62 }
0x1cc6   :  { %v4250_v27 = vsel %vm176_vm1, %v4236_v10, 0.0 }
0x1cc7   :  { %4251 = vadd.xlane.f32.xlu0 %v4250_v27 }
0x1d42   :  { %v4243_v59 = vpop.xlane.xlu1 %4242 }
0x1d43   :  { %v4257_v33 = vmul.f32 0.03125, %v4243_v59 }
0x1d44   :  { %v4240_v29 = vpop.xlane.xlu0 %4239 }
0x1d45   :  { %v4263_v54 = vadd.f32 1e-05, %v4257_v33  ;;  %v4256_v47 = vmul.f32 0.03125, %v4240_v29 }
0x1d47   :  { %v4262_v49 = vadd.f32 1e-05, %v4256_v47  ;;  %6175 = vrsqrt.f32 %v4263_v54 }
0x1d48   :  { %v4249_v20 = vpop.xlane.xlu1 %4248 }
0x1d49   :  { %6177 = vrsqrt.f32 %v4262_v49  ;;  %v4259_v52 = vmul.f32 0.03125, %v4249_v20 }
0x1d4b   :  { %v4265_v23 = vadd.f32 1e-05, %v4259_v52 }
0x1d4c   :  { %v4246_v5 = vpop.xlane.xlu0 %4245  ;;  %v4255_v9 = vpop.xlane.xlu1 %4254 }
0x1d4d   :  { %v4258_v53 = vmul.f32 0.03125, %v4246_v5  ;;  %v4261_v42 = vmul.f32 0.03125, %v4255_v9  ;;  %6179 = vrsqrt.f32 %v4265_v23 }
0x1d4f   :  { %v4264_v16 = vadd.f32 1e-05, %v4258_v53  ;;  %v4267_v14 = vadd.f32 1e-05, %v4261_v42 }
0x1d50   :  { %v4252_v28 = vpop.xlane.xlu0 %4251 }
0x1d51   :  { %6181 = vrsqrt.f32 %v4264_v16  ;;  %v4260_v39 = vmul.f32 0.03125, %v4252_v28 }
0x1d52   :  { %6183 = vrsqrt.f32 %v4267_v14 }
0x1d53   :  { %v4266_v21 = vadd.f32 1e-05, %v4260_v39 }
0x1d54   :  { %v6176_v17 = vpop.eup %6175 }
0x1d55   :  { %6185 = vrsqrt.f32 %v4266_v21  ;;  %v4275_v12 = vmul.f32 %v6176_v17, %v7841_v31  ;;  %v5033_v31 = vld [vmem:[%s8055_s7 + $0xf8] sm:$0xff] }
0x1d56   :  { %v6178_v50 = vpop.eup %6177  ;;  %5857 = vmatprep.subr.mxu1 %v5033_v31 }
0x1d57   :  { %v4274_v51 = vmul.f32 %v6178_v50, %v7843_v3  ;;  %5858 = vmatpush3.msra.mxu1 %v5033_v31 }
0x1d58   :  { %5859 = vmatprep.subr.mxu1 %v5032_v2 }
0x1d59   :  { %5848 = vmatprep.mubr.msk.f32.mxu0 %vm176_vm1, %v4274_v51  ;;  %5860 = vmatpush3.msra.mxu1 %v5032_v2 }
0x1d5a   :  { %5849 = vmatmul.mubr.msk.f32.vlgmr.msra.gmra.mxu0 %vm176_vm1, %v4275_v12  ;;  %v6180_v30 = vpop.eup %6179  ;;  %5861 = vmatprep.subr.mxu1 %v5031_v34 }
0x1d5b   :  { %v4277_v63 = vmul.f32 %v6180_v30, %v7850_v15  ;;  %5862 = vmatpush3.msra.mxu1 %v5031_v34  ;;  %v5029_v15 = vld [vmem:[%s8055_s7 + $0xd8] sm:$0xff] }
0x1d5c   :  { %5863 = vmatprep.subr.mxu1 %v5030_v11 }
0x1d5d   :  { %5864 = vmatpush3.msra.mxu1 %v5030_v11 }
0x1d5e   :  { %v6182_v7 = vpop.eup %6181  ;;  %5865 = vmatprep.subr.mxu1 %v5029_v15 }
0x1d5f   :  { %v4276_v22 = vmul.f32 %v6182_v7, %v4228_v18  ;;  %v6184_v4 = vpop.eup %6183  ;;  %5866 = vmatpush3.msra.mxu1 %v5029_v15  ;;  %v5021_v18 = vld [vmem:[%s8055_s7 + $0x98] sm:$0xff] }
0x1d60   :  { %v4279_v3 = vmul.f32 %v6184_v4, %v7856_v61  ;;  %5867 = vmatprep.subr.mxu1 %v5028_v1  ;;  %v5022_v61 = vld [vmem:[%s8055_s7 + $0xa0] sm:$0xff] }
0x1d61   :  { %5851 = vmatprep.mubr.msk.f32.mxu0 %vm176_vm1, %v4276_v22  ;;  %5868 = vmatpush3.msra.mxu1 %v5028_v1 }
0x1d62   :  { %v6186_v19 = vpop.eup %6185  ;;  %5852 = vmatmul.mubr.msk.f32.gmra.mxu0 %vm176_vm1, %v4277_v63  ;;  %5869 = vmatprep.subr.mxu1 %v5027_v35 }
0x1d63   :  { %v4278_v57 = vmul.f32 %v6186_v19, %v4230_v62  ;;  %5870 = vmatpush3.msra.mxu1 %v5027_v35 }
0x1d64   :  { %5871 = vmatprep.subr.mxu1 %v5026_v0 }
0x1d65   :  { %5854 = vmatprep.mubr.msk.f32.mxu0 %vm176_vm1, %v4278_v57  ;;  %5872 = vmatpush3.msra.mxu1 %v5026_v0 }
0x1d66   :  { %5855 = vmatmul.mubr.msk.f32.gmra.mxu0 %vm176_vm1, %v4279_v3  ;;  %5873 = vmatprep.subr.mxu1 %v5025_v41 }
0x1d67   :  { %5874 = vmatpush3.msra.mxu1 %v5025_v41 }
0x1d68   :  { %5875 = vmatprep.subr.mxu1 %v5024_v25 }
0x1d69   :  { %5876 = vmatpush3.msra.mxu1 %v5024_v25 }
0x1d6a   :  { %5877 = vmatprep.subr.mxu1 %v5023_v13 }
0x1d6b   :  { %5878 = vmatpush3.msra.mxu1 %v5023_v13 }
0x1d6c   :  { %5879 = vmatprep.subr.mxu1 %v5022_v61 }
0x1d6d   :  { %5880 = vmatpush3.msra.mxu1 %v5022_v61 }
0x1d6e   :  { %5881 = vmatprep.subr.mxu1 %v5021_v18 }
0x1d6f   :  { %5882 = vmatpush3.msra.mxu1 %v5021_v18 }
0x1d70   :  { %5883 = vmatprep.subr.mxu1 %v5020_v38 }
0x1d71   :  { %5884 = vmatpush3.msra.mxu1 %v5020_v38 }
0x1d72   :  { %5885 = vmatprep.subr.mxu1 %v5019_v6 }
0x1d73   :  { %5886 = vmatpush3.msra.mxu1 %v5019_v6 }
0x1d74   :  { %5887 = vmatprep.subr.mxu1 %v5018_v8 }
0x1d75   :  { %5888 = vmatpush3.msra.mxu1 %v5018_v8 }
0x1e1a   :  { %v5850_v56 = vpop.f32.mrf.mxu0 }
0x1e1b   :  { %v7938_v60 = vadd.f32 %v5850_v56, %v4288_v55 }
0x1e1c   :  { %v4373_v62 = vpop.f32.mrf.mxu0 }
0x1e1d   :  { %v7941_v37 = vmul.f32 0.70710677, %v7938_v60  ;;  %v7943_v10 = vadd.f32 %v4373_v62, %v4288_v55 }
0x1e1f   :  { %v4415_v27 = vand.u32 2147483647, %v7941_v37  ;;  %v7947_v48 = vmul.f32 0.70710677, %v7943_v10  ;;  %vm4529_vm12 = vcmp.lt.f32.partialorder %v7941_v37, 0.0 }
0x1e21   :  { %v4421_v24 = vmul.f32 0.3275911, %v4415_v27  ;;  %v4414_v44 = vand.u32 2147483647, %v7947_v48  ;;  %v4493_v14 = vsub.f32 0.0, %v4415_v27  ;;  %vm4528_vm13 = vcmp.lt.f32.partialorder %v7947_v48, 0.0 }
0x1e22   :  { %v5853_v26 = vpop.f32.mrf.mxu0 }
0x1e23   :  { %v4427_v59 = vadd.f32 1.0, %v4421_v24  ;;  %v4420_v36 = vmul.f32 0.3275911, %v4414_v44  ;;  %v7950_v33 = vadd.f32 %v5853_v26, %v4288_v55  ;;  %v4492_v12 = vsub.f32 0.0, %v4414_v44 }
0x1e24   :  { %v4383_v29 = vpop.f32.mrf.mxu0  ;;  %v4499_v7 = vmul.f32 %v4493_v14, %v4415_v27 }
0x1e25   :  { %6187 = vrcp.f32 %v4427_v59  ;;  %v4426_v54 = vadd.f32 1.0, %v4420_v36  ;;  %v7953_v47 = vmul.f32 0.70710677, %v7950_v33  ;;  %v7955_v49 = vadd.f32 %v4383_v29, %v4288_v55 }
0x1e26   :  { %v5856_v20 = vpop.f32.mrf.mxu0  ;;  %v4498_v57 = vmul.f32 %v4492_v12, %v4414_v44  ;;  %v4506_v2 = vmul.f32 1.442695, %v4499_v7 }
0x1e27   :  { %v7957_v52 = vadd.f32 %v5856_v20, %v4288_v55  ;;  %6189 = vrcp.f32 %v4426_v54  ;;  %v4417_v23 = vand.u32 2147483647, %v7953_v47  ;;  %v7961_v9 = vmul.f32 0.70710677, %v7955_v49 }
0x1e28   :  { %v4393_v5 = vpop.f32.mrf.mxu0  ;;  %v4504_v1 = vmul.f32 1.442695, %v4498_v57  ;;  %vm4531_vm14 = vcmp.lt.f32.partialorder %v7953_v47, 0.0  ;;  %v4404_v47 = vmul.f32 0.5, %v7955_v49 }
0x1e29   :  { %v7964_v53 = vmul.f32 0.70710677, %v7957_v52  ;;  %v4423_v42 = vmul.f32 0.3275911, %v4417_v23  ;;  %v7966_v16 = vadd.f32 %v4393_v5, %v4288_v55  ;;  %v4416_v28 = vand.u32 2147483647, %v7961_v9 }
0x1e2a   :  { %v4495_v34 = vsub.f32 0.0, %v4417_v23  ;;  %vm4530_vm15 = vcmp.lt.f32.partialorder %v7961_v9, 0.0 }
0x1e2b   :  { %v4419_v39 = vand.u32 2147483647, %v7964_v53  ;;  %v4429_v21 = vadd.f32 1.0, %v4423_v42  ;;  %v7971_v17 = vmul.f32 0.70710677, %v7966_v16  ;;  %v4494_v35 = vsub.f32 0.0, %v4416_v28 }
0x1e2c   :  { %v4422_v50 = vmul.f32 0.3275911, %v4416_v28  ;;  %v4501_v25 = vmul.f32 %v4495_v34, %v4417_v23  ;;  %vm4533_vm0 = vcmp.lt.f32.partialorder %v7964_v53, 0.0  ;;  %v4406_v9 = vmul.f32 0.5, %v7966_v16 }
0x1e2d   :  { %v4425_v51 = vmul.f32 0.3275911, %v4419_v39  ;;  %6191 = vrcp.f32 %v4429_v21  ;;  %v4418_v30 = vand.u32 2147483647, %v7971_v17  ;;  %v4497_v13 = vsub.f32 0.0, %v4419_v39 }
0x1e2e   :  { %v4428_v22 = vadd.f32 1.0, %v4422_v50  ;;  %v4500_v38 = vmul.f32 %v4494_v35, %v4416_v28  ;;  %v4510_v56 = vmul.f32 1.442695, %v4501_v25  ;;  %vm4532_vm2 = vcmp.lt.f32.partialorder %v7971_v17, 0.0 }
0x1e2f   :  { %v4431_v63 = vadd.f32 1.0, %v4425_v51  ;;  %v4424_v4 = vmul.f32 0.3275911, %v4418_v30  ;;  %v4496_v62 = vsub.f32 0.0, %v4418_v30  ;;  %v4503_v27 = vmul.f32 %v4497_v13, %v4419_v39 }
0x1e30   :  { %6193 = vrcp.f32 %v4428_v22  ;;  %v4508_v36 = vmul.f32 1.442695, %v4500_v38  ;;  %v4578_v17 = vrot.slane %v7818_v32, %v2325_v40 }
0x1e31   :  { %6195 = vrcp.f32 %v4431_v63  ;;  %v4430_v3 = vadd.f32 1.0, %v4424_v4  ;;  %v4502_v5 = vmul.f32 %v4496_v62, %v4418_v30  ;;  %v4514_v14 = vmul.f32 1.442695, %v4503_v27 }
0x1e32   :  { %v6188_v19 = vpop.eup %6187 }
0x1e33   :  { %v4439_v31 = vmul.f32 1.0614054, %v6188_v19  ;;  %6197 = vrcp.f32 %v4430_v3  ;;  %v4512_v57 = vmul.f32 1.442695, %v4502_v5 }
0x1e34   :  { %v6190_v11 = vpop.eup %6189  ;;  %6199 = vpow2.f32 %v4506_v2 }
0x1e35   :  { %v5007_v15 = vadd.f32 -1.4531521, %v4439_v31  ;;  %v4438_v0 = vmul.f32 1.0614054, %v6190_v11  ;;  %6201 = vpow2.f32 %v4504_v1 }
0x1e36   :  { %6203 = vpow2.f32 %v4510_v56 }
0x1e37   :  { %v4451_v41 = vmul.f32 %v6188_v19, %v5007_v15  ;;  %v5006_v61 = vadd.f32 -1.4531521, %v4438_v0  ;;  %6205 = vpow2.f32 %v4508_v36 }
0x1e38   :  { %6207 = vpow2.f32 %v4514_v14 }
0x1e39   :  { %v4457_v18 = vadd.f32 1.4214138, %v4451_v41  ;;  %v4450_v6 = vmul.f32 %v6190_v11, %v5006_v61  ;;  %6209 = vpow2.f32 %v4512_v57 }
0x1e3a   :  { %v7974_v8 = vpop.eup %6191 }
0x1e3b   :  { %v4463_v55 = vmul.f32 %v6188_v19, %v4457_v18  ;;  %v4456_v24 = vadd.f32 1.4214138, %v4450_v6  ;;  %v4441_v44 = vmul.f32 1.0614054, %v7974_v8 }
0x1e3d   :  { %v5013_v26 = vadd.f32 -0.28449672, %v4463_v55  ;;  %v7977_v59 = vpop.eup %6193  ;;  %v4462_v29 = vmul.f32 %v6190_v11, %v4456_v24  ;;  %v5009_v54 = vadd.f32 -1.4531521, %v4441_v44 }
0x1e3e   :  { %v7979_v20 = vpop.eup %6195  ;;  %v4440_v42 = vmul.f32 1.0614054, %v7977_v59 }
0x1e3f   :  { %v4475_v23 = vmul.f32 %v6188_v19, %v5013_v26  ;;  %v5012_v28 = vadd.f32 -0.28449672, %v4462_v29  ;;  %v4453_v39 = vmul.f32 %v7974_v8, %v5009_v54  ;;  %v4443_v21 = vmul.f32 1.0614054, %v7979_v20 }
0x1e40   :  { %v5008_v51 = vadd.f32 -1.4531521, %v4440_v42  ;;  %v7984_v12 = vpop.eup %6197 }
0x1e41   :  { %v4481_v50 = vadd.f32 0.2548296, %v4475_v23  ;;  %v4474_v7 = vmul.f32 %v6190_v11, %v5012_v28  ;;  %v4459_v22 = vadd.f32 1.4214138, %v4453_v39  ;;  %v5011_v63 = vadd.f32 -1.4531521, %v4443_v21  ;;  %v6200_v31 = vpop.eup %6199 }
0x1e42   :  { %v4452_v30 = vmul.f32 %v7977_v59, %v5008_v51  ;;  %v4442_v3 = vmul.f32 1.0614054, %v7984_v12  ;;  %v6202_v61 = vpop.eup %6201 }
0x1e43   :  { %v4487_v4 = vmul.f32 %v6188_v19, %v4481_v50  ;;  %v4480_v2 = vadd.f32 0.2548296, %v4474_v7  ;;  %v4465_v34 = vmul.f32 %v7974_v8, %v4459_v22  ;;  %v4455_v15 = vmul.f32 %v7979_v20, %v5011_v63  ;;  %v6204_v23 = vpop.eup %6203 }
0x1e44   :  { %v4458_v35 = vadd.f32 1.4214138, %v4452_v30  ;;  %v5010_v0 = vadd.f32 -1.4531521, %v4442_v3  ;;  %v6206_v7 = vpop.eup %6205  ;;  %v4402_v22 = vmul.f32 0.5, %v7943_v10 }
0x1e45   :  { %v4517_v1 = vmul.f32 %v6200_v31, %v4487_v4  ;;  %v4486_v41 = vmul.f32 %v6190_v11, %v4480_v2  ;;  %v5015_v25 = vadd.f32 -0.28449672, %v4465_v34  ;;  %v4461_v13 = vadd.f32 1.4214138, %v4455_v15  ;;  %v6208_v48 = vpop.eup %6207 }
0x1e46   :  { %v4464_v18 = vmul.f32 %v7977_v59, %v4458_v35  ;;  %v4454_v38 = vmul.f32 %v7984_v12, %v5010_v0  ;;  %v6210_v0 = vpop.eup %6209 }
0x1e47   :  { %v4523_v19 = vsub.f32 1.0, %v4517_v1  ;;  %v4516_v6 = vmul.f32 %v6202_v61, %v4486_v41  ;;  %v4477_v55 = vmul.f32 %v7974_v8, %v5015_v25  ;;  %v4467_v56 = vmul.f32 %v7979_v20, %v4461_v13 }
0x1e48   :  { %v5014_v27 = vadd.f32 -0.28449672, %v4464_v18  ;;  %v4460_v24 = vadd.f32 1.4214138, %v4454_v38 }
0x1e49   :  { %v4535_v62 = vsub.f32 0.0, %v4523_v19  ;;  %v4522_v11 = vsub.f32 1.0, %v4516_v6  ;;  %v4483_v44 = vadd.f32 0.2548296, %v4477_v55  ;;  %v5017_v26 = vadd.f32 -0.28449672, %v4467_v56 }
0x1e4a   :  { %v4476_v29 = vmul.f32 %v7977_v59, %v5014_v27  ;;  %v4466_v54 = vmul.f32 %v7984_v12, %v4460_v24 }
0x1e4b   :  { %v4541_v36 = vsel %vm4529_vm12, %v4535_v62, %v4523_v19  ;;  %v4534_v5 = vsub.f32 0.0, %v4522_v11  ;;  %v4489_v42 = vmul.f32 %v7974_v8, %v4483_v44  ;;  %v4479_v14 = vmul.f32 %v7979_v20, %v5017_v26 }
0x1e4c   :  { %v4482_v28 = vadd.f32 0.2548296, %v4476_v29  ;;  %v5016_v39 = vadd.f32 -0.28449672, %v4466_v54  ;;  %v4547_v21 = vadd.f32 1.0, %v4541_v36  ;;  %v4403_v8 = vmul.f32 0.5, %v7938_v60 }
0x1e4d   :  { %v4540_v37 = vsel %vm4528_vm13, %v4534_v5, %v4522_v11  ;;  %v4519_v50 = vmul.f32 %v6204_v23, %v4489_v42  ;;  %v4485_v51 = vadd.f32 0.2548296, %v4479_v14  ;;  %v4407_v11 = vmul.f32 0.5, %v7957_v52 }
0x1e4e   :  { %v4546_v63 = vadd.f32 1.0, %v4540_v37  ;;  %v4488_v4 = vmul.f32 %v7977_v59, %v4482_v28  ;;  %v4478_v57 = vmul.f32 %v7984_v12, %v5016_v39  ;;  %v4553_v15 = vmul.f32 %v4547_v21, %v4403_v8 }
0x1e4f   :  { %v4525_v30 = vsub.f32 1.0, %v4519_v50  ;;  %v4491_v3 = vmul.f32 %v7979_v20, %v4485_v51 }
0x1e50   :  { %v4552_v31 = vmul.f32 %v4546_v63, %v4402_v22  ;;  %v4518_v2 = vmul.f32 %v6206_v7, %v4488_v4  ;;  %v4484_v34 = vadd.f32 0.2548296, %v4478_v57  ;;  %v4702_v22 = vld [vmem:[%s8056_s8 + $0x10] sm:$0xff]  ;;  %v4701_v63 = vld [vmem:[%s8056_s8 + $0x8] sm:$0xff]  ;;  %v4700_v4 = vld [vmem:[%s8056_s8] sm:$0xff] }
0x1e51   :  { %v4537_v1 = vsub.f32 0.0, %v4525_v30  ;;  %v4521_v35 = vmul.f32 %v6208_v48, %v4491_v3 }
0x1e52   :  { %5889 = vmatprep.mubr.f32.mxu1 %v4552_v31  ;;  %v4524_v10 = vsub.f32 1.0, %v4518_v2  ;;  %v4490_v59 = vmul.f32 %v7984_v12, %v4484_v34  ;;  %v4405_v12 = vmul.f32 0.5, %v7950_v33 }
0x1e53   :  { %5890 = vmatmul.mubr.f32.vlgmr.msra.gmra.mxu1 %v4553_v15  ;;  %v4543_v41 = vsel %vm4531_vm14, %v4537_v1, %v4525_v30  ;;  %v4527_v60 = vsub.f32 1.0, %v4521_v35  ;;  %v5034_v35 = vld [vmem:[%s8051_s9 + $0x8] sm:$0xf] }
0x1e54   :  { %v4536_v25 = vsub.f32 0.0, %v4524_v10  ;;  %v4520_v13 = vmul.f32 %v6210_v0, %v4490_v59  ;;  %v4549_v19 = vadd.f32 1.0, %v4543_v41 }
0x1e55   :  { %v4539_v20 = vsub.f32 0.0, %v4527_v60 }
0x1e56   :  { %v4542_v61 = vsel %vm4530_vm15, %v4536_v25, %v4524_v10  ;;  %v4526_v18 = vsub.f32 1.0, %v4520_v13  ;;  %v4555_v62 = vmul.f32 %v4549_v19, %v4405_v12  ;;  %v4707_v10 = vrot.slane %v5034_v35, %v6440_v46 }
0x1e57   :  { %v4548_v38 = vadd.f32 1.0, %v4542_v61  ;;  %v4545_v6 = vsel %vm4533_vm0, %v4539_v20, %v4527_v60 }
0x1e58   :  { %v4538_v55 = vsub.f32 0.0, %v4526_v18  ;;  %v4551_v24 = vadd.f32 1.0, %v4545_v6 }
0x1e59   :  { %v4554_v56 = vmul.f32 %v4548_v38, %v4404_v47 }
0x1e5a   :  { %v4544_v27 = vsel %vm4532_vm2, %v4538_v55, %v4526_v18  ;;  %v4557_v49 = vmul.f32 %v4551_v24, %v4407_v11 }
0x1e5b   :  { %5892 = vmatprep.mubr.f32.mxu1 %v4554_v56  ;;  %v4550_v53 = vadd.f32 1.0, %v4544_v27 }
0x1e5c   :  { %5893 = vmatmul.mubr.f32.gmra.mxu1 %v4555_v62 }
0x1e5d   :  { %v4556_v44 = vmul.f32 %v4550_v53, %v4406_v9 }
0x1e5f   :  { %5895 = vmatprep.mubr.f32.mxu1 %v4556_v44 }
0x1e60   :  { %5896 = vmatmul.mubr.f32.gmra.mxu1 %v4557_v49 }
0x1f13   :  { %v5891_v26 = vpop.f32.mrf.mxu1 }
0x1f15   :  { %v4645_v33 = vpop.f32.mrf.mxu1 }
0x1f1c   :  { %v5894_v36 = vpop.f32.mrf.mxu1 }
0x1f1e   :  { %v4653_v29 = vpop.f32.mrf.mxu1 }
0x1f1f   :  { %v4654_v54 = vadd.f32 %v4653_v29, %v4578_v17 }
0x1f20   :  { %v5897_v23 = vpop.f32.mrf.mxu1 }
0x1f21   :  { %v4670_v16 = vadd.f32 %v4654_v54, %v7830_v43  ;;  %v4667_v5 = vadd.f32 %v5897_v23, %v4578_v17 }
0x1f22   :  { %v4662_v42 = vpop.f32.mrf.mxu1 }
0x1f23   :  { %v4671_v52 = vadd.f32 %v4667_v5, %v7833_v58  ;;  %v4672_v14 = vsel %vm176_vm1, %v4670_v16, 0.0  ;;  %v4703_v58 = vld [vmem:[%s8056_s8 + $0x18] sm:$0xff] }
0x1f24   :  { %4673 = vadd.xlane.f32.xlu0 %v4672_v14  ;;  %5898 = vmatprep.subr.mxu0 %v4703_v58 }
0x1f25   :  { %v4675_v28 = vsel %vm176_vm1, %v4671_v52, 0.0  ;;  %5899 = vmatpush3.msra.mxu0 %v4703_v58 }
0x1f26   :  { %4676 = vadd.xlane.f32.xlu1 %v4675_v28  ;;  %5900 = vmatprep.subr.mxu0 %v4702_v22 }
0x1f27   :  { %5901 = vmatpush3.msra.mxu0 %v4702_v22 }
0x1f28   :  { %5902 = vmatprep.subr.mxu0 %v4701_v63 }
0x1f29   :  { %5903 = vmatpush3.msra.mxu0 %v4701_v63 }
0x1f2a   :  { %5904 = vmatprep.subr.mxu0 %v4700_v4 }
0x1f2b   :  { %5905 = vmatpush3.msra.mxu0 %v4700_v4 }
0x1fad   :  { %v4674_v39 = vpop.xlane.xlu0 %4673 }
0x1fae   :  { %v4678_v45 = vmul.f32 0.03125, %v4674_v39 }
0x1faf   :  { %v4677_v21 = vpop.xlane.xlu1 %4676 }
0x1fb0   :  { %v4680_v40 = vsub.f32 %v4670_v16, %v4678_v45  ;;  %v4679_v32 = vmul.f32 0.03125, %v4677_v21 }
0x1fb2   :  { %v4681_v37 = vsub.f32 %v4671_v52, %v4679_v32  ;;  %v4682_v50 = vmul.f32 %v4680_v40, %v4680_v40 }
0x1fb4   :  { %v4684_v51 = vsel %vm176_vm1, %v4682_v50, 0.0  ;;  %v4683_v43 = vmul.f32 %v4681_v37, %v4681_v37 }
0x1fb5   :  { %4685 = vadd.xlane.f32.xlu0 %v4684_v51 }
0x1fb6   :  { %v4687_v7 = vsel %vm176_vm1, %v4683_v43, 0.0 }
0x1fb7   :  { %4688 = vadd.xlane.f32.xlu1 %v4687_v7 }
0x203e   :  { %v4686_v57 = vpop.xlane.xlu0 %4685 }
0x203f   :  { %v4690_v8 = vmul.f32 0.03125, %v4686_v57 }
0x2040   :  { %v4689_v30 = vpop.xlane.xlu1 %4688 }
0x2041   :  { %v4692_v3 = vadd.f32 1e-05, %v4690_v8  ;;  %v4691_v48 = vmul.f32 0.03125, %v4689_v30 }
0x2043   :  { %6211 = vrsqrt.f32 %v4692_v3  ;;  %v4693_v31 = vadd.f32 1e-05, %v4691_v48 }
0x2045   :  { %6213 = vrsqrt.f32 %v4693_v31 }
0x2050   :  { %v6212_v2 = vpop.eup %6211 }
0x2051   :  { %v4696_v34 = vmul.f32 %v6212_v2, %v4680_v40 }
0x2052   :  { %v6214_v15 = vpop.eup %6213 }
0x2053   :  { %v4697_v1 = vmul.f32 %v6214_v15, %v4681_v37  ;;  %5906 = vmatprep.mubr.msk.f32.mxu0 %vm176_vm1, %v4696_v34 }
0x2055   :  { %5907 = vmatmul.mubr.msk.f32.vlgmr.msra.gmra.mxu0 %vm176_vm1, %v4697_v1 }
0x2115   :  { %v5908_v59 = vpop.f32.mrf.mxu0 }
0x2116   :  { %v4786_v0 = vadd.f32 %v5908_v59, %v4707_v10 }
0x2117   :  { %v4780_v41 = vpop.f32.mrf.mxu0 }
0x2118   :  { %4790 = vst [vmem:[%s8057_s10 + $0x8] sm:$0xff] %v4786_v0  ;;  %v4781_v60 = vadd.f32 %v4780_v41, %v4707_v10 }
0x211a   :  { %4789 = vst [vmem:[%s8057_s10] sm:$0xff] %v4781_v60 }

</bundles_post_ra>
